<compile_context>
chip_gen: v7x
topology: tpu7x:2x2x1
jax: 0.10.0
libtpu: 0.0.40
codegen_flags: <defaults>
</compile_context>

<pallas_src>
import functools

import jax
import jax.numpy as jnp
import numpy as np
from jax.experimental import pallas as pl
from jax.experimental.pallas import tpu as pltpu

LANES1 = 384  # conv1 output lane width (11*32 = 352, padded to 3 full vregs)


# ----------------------------------------------------------------------------
# The single fused Pallas kernel
# ----------------------------------------------------------------------------
def _mnist_resnet_kernel(nb_blocks, n_tile, *refs):
    it = iter(refs)
    xcat_ref = next(it)
    t1_ref, bst1_ref = next(it), next(it)
    t2_ref, c2_ref, bst2_ref = next(it), next(it), next(it)
    blocks = [(next(it), next(it), next(it)) for _ in range(nb_blocks)]
    spool_ref, bnpool_ref = next(it), next(it)
    t3_ref, bst3_ref = next(it), next(it)
    wfc_ref, bfc_ref = next(it), next(it)
    o_ref = next(it)

    f32, bf16 = jnp.float32, jnp.bfloat16
    rows16 = 16 * n_tile          # sublanes for the conv1 stage (16 / image)
    rows8 = 8 * n_tile            # sublanes for the 8x8 trunk (8 / image)

    def mxu(a, w):                # bf16 MXU matmul, f32 accumulation
        return jnp.dot(a.astype(bf16), w.astype(bf16),
                       preferred_element_type=f32)

    # ---- Conv(1->32, k4) -> ReLU -> BN : 1x14x14 -> 32x11x11 ---------------
    # xcat already holds the 4 kernel-row-shifted copies of each input row on
    # its lanes (built host-side), so this is a single K=56 matmul.
    y = mxu(xcat_ref[...], t1_ref[...])                     # (16n, 384)
    y = jnp.maximum(y + bst1_ref[0:1, :], 0.0)
    y = y * bst1_ref[1:2, :] + bst1_ref[2:3, :]

    # ---- Conv(32->16, k4) -> ReLU -> BN : 32x11x11 -> 16x8x8 ---------------
    # Kernel-row shifts via sublane roll (no mask needed: rows that would wrap
    # are dropped by the compaction), then ONE small compaction matmul.
    acc = mxu(y, t2_ref[0])
    for i in range(1, 4):
        acc = acc + mxu(pltpu.roll(y, shift=rows16 - i, axis=0), t2_ref[i])
    y = mxu(c2_ref[...], acc)                               # (8n, 128)
    y = jnp.maximum(y + bst2_ref[0:1, :], 0.0)
    y = y * bst2_ref[1:2, :] + bst2_ref[2:3, :]

    # ---- ResBlocks: 'same' 3x3 convs = roll + mask + lane-aligned concat ---
    # (BN is pre-folded into the Toeplitz weights/bias: conv->BN, no ReLU.)
    p_in_img = jax.lax.broadcasted_iota(jnp.int32, (rows8, 128), 0) & 7
    not_top = p_in_img >= 1        # row p-1 exists
    not_bot = p_in_img <= 6        # row p+1 exists

    def conv3x3_same(v, w_ref):
        up = jnp.where(not_top, pltpu.roll(v, shift=1, axis=0), 0.0)          # x[p-1]
        dn = jnp.where(not_bot, pltpu.roll(v, shift=rows8 - 1, axis=0), 0.0)  # x[p+1]
        xk = jnp.concatenate([up, v, dn], axis=1)            # (8n, 384), aligned
        return mxu(xk, w_ref[...])                           # single K=384 matmul

    for wa_ref, wb_ref, bb_ref in blocks:
        res = y
        t = jnp.maximum(conv3x3_same(y, wa_ref) + bb_ref[0:1, :], 0.0)
        t = conv3x3_same(t, wb_ref) + bb_ref[1:2, :]
        y = jnp.maximum(t + res, 0.0)                        # (8n, 128)

    # TODO(synk): nn.Dropout is identity at inference; no in-kernel RNG mask.

    # ---- MaxPool2d(2,2) -> BN : 16x8x8 -> 16x4x4 ---------------------------
    # Row pairs via roll+max (result valid on even sublanes, never compacted);
    # column pairs via two cheap 128x128 lane-select matmuls.
    rmax = jnp.maximum(y, pltpu.roll(y, shift=rows8 - 1, axis=0))
    pooled = jnp.maximum(mxu(rmax, spool_ref[0]), mxu(rmax, spool_ref[1]))
    pooled = pooled * bnpool_ref[0:1, :] + bnpool_ref[1:2, :]   # (8n, 128)

    # ---- Conv(16->16, k3) -> ReLU -> BN : 16x4x4 -> 16x2x2 -----------------
    # Pooled image row r lives on sublane 8b+2r, so kernel-row shifts are 2i.
    acc = mxu(pooled, t3_ref[0])
    for i in range(1, 3):
        acc = acc + mxu(pltpu.roll(pooled, shift=rows8 - 2 * i, axis=0),
                        t3_ref[i])
    y = jnp.maximum(acc + bst3_ref[0:1, :], 0.0)
    y = y * bst3_ref[1:2, :] + bst3_ref[2:3, :]              # (8n, 128)

    # ---- Flatten (NCHW order baked into the FC weights) + Linear(64->10) ---
    # Output row of conv3 for (image b, row p) sits on sublane 8b+2p; combine
    # the two rows with one roll, write a lane-dense 128-wide padded result.
    out = mxu(y, wfc_ref[0]) + mxu(pltpu.roll(y, shift=rows8 - 2, axis=0),
                                   wfc_ref[1])
    o_ref[...] = (out + bfc_ref[...]).astype(o_ref.dtype)    # logits @ rows 8b


# ----------------------------------------------------------------------------
# Host-side operand construction (one-time, outside the kernel)
# ----------------------------------------------------------------------------
def _toeplitz(w, width, pad, in_lanes, out_lanes):
    """Conv weight (kh,kw,cin,cout) -> (kh, in_lanes, out_lanes) matrices.

    Input lanes are (win, ci) -> win*cin + ci, output lanes (q, co) -> q*cout
    + co; zero width-padding is baked in; extra lanes are zero padded."""
    w = np.asarray(w, np.float32)
    kh, kw, cin, cout = w.shape
    ow = width + 2 * pad - kw + 1
    m = np.zeros((kh, width, cin, ow, cout), np.float32)
    for q in range(ow):
        for j in range(kw):
            win = q + j - pad
            if 0 <= win < width:
                m[:, win, :, q, :] = w[:, j]
    m = m.reshape(kh, width * cin, ow * cout)
    out = np.zeros((kh, in_lanes, out_lanes), np.float32)
    out[:, :width * cin, :ow * cout] = m
    return out


def _pad_lanes(v, lanes):
    out = np.zeros((lanes,), np.float32)
    out[:v.shape[0]] = v
    return out


def _bst(bias, scale, shift, reps, lanes):
    """(3, lanes) rows = [bias; scale; shift], each tiled over the output
    columns and zero-padded to the lane width."""
    rows = np.stack([_pad_lanes(np.tile(np.asarray(a, np.float32), reps), lanes)
                     for a in (bias, scale, shift)])
    return jnp.asarray(rows, jnp.float32)


def _compact2(n_tile):
    """(8n, 16n) 0/1 matrix: keep rows 0..7 of each 16-row image block."""
    c = np.zeros((8 * n_tile, 16 * n_tile), np.float32)
    for b in range(n_tile):
        for p in range(8):
            c[b * 8 + p, b * 16 + p] = 1.0
    return jnp.asarray(c, jnp.bfloat16)


def _pool_col_select():
    """(2, 128, 128) lane selects: out lane qq*16+ci <- in lane (2qq+par)*16+ci."""
    s = np.zeros((2, 128, 128), np.float32)
    for par in range(2):
        for qq in range(4):
            for ci in range(16):
                s[par, (2 * qq + par) * 16 + ci, qq * 16 + ci] = 1.0
    return s


def _bn_fold(bn, eps=1e-5):
    gamma, beta, mean, var = (np.asarray(a, np.float32) for a in bn)
    scale = gamma / np.sqrt(var + eps)
    shift = beta - mean * scale
    return scale, shift


def build_operands(params, n_tile):
    """Flatten raw parameters into the kernel operand tuple (per-step batch
    n_tile).  MXU operands are bf16, VPU epilogue rows stay f32."""
    bf16 = jnp.bfloat16
    ops = []

    # conv1 -> relu -> bn1 : one stacked-K (56, 384) Toeplitz
    w, b = params['conv1']
    s, t = _bn_fold(params['bn1'])
    t1 = _toeplitz(w, width=14, pad=0, in_lanes=14,
                   out_lanes=LANES1).reshape(4 * 14, LANES1)
    ops += [jnp.asarray(t1, bf16), _bst(b, s, t, reps=11, lanes=LANES1)]

    # conv2 -> relu -> bn2 : per-kernel-row Toeplitz + one compaction matrix
    w, b = params['conv2']
    s, t = _bn_fold(params['bn2'])
    t2 = _toeplitz(w, width=11, pad=0, in_lanes=LANES1, out_lanes=128)
    ops += [jnp.asarray(t2, bf16), _compact2(n_tile),
            _bst(b, s, t, reps=8, lanes=128)]

    # resblocks: fold BN scale/shift into conv weights/bias (conv->BN order,
    # no ReLU in between, so folding is valid even for negative scales)
    for blk in params['blocks']:
        biases = []
        for cname, bname in (('conv1', 'bn1'), ('conv2', 'bn2')):
            w, b = blk[cname]
            s, t = _bn_fold(blk[bname])
            wf = np.asarray(w, np.float32) * s[None, None, None, :]
            bf = np.asarray(b, np.float32) * s + t
            tw = _toeplitz(wf, width=8, pad=1, in_lanes=128,
                           out_lanes=128).reshape(3 * 128, 128)
            ops.append(jnp.asarray(tw, bf16))
            biases.append(np.tile(bf, 8))
        ops.append(jnp.asarray(np.stack(biases), jnp.float32))

    # maxpool column selects + bn-after-pool
    ops.append(jnp.asarray(_pool_col_select(), bf16))
    s, t = _bn_fold(params['bn_pool'])
    ops.append(jnp.asarray(np.stack([_pad_lanes(np.tile(s, 4), 128),
                                     _pad_lanes(np.tile(t, 4), 128)]),
                           jnp.float32))

    # conv3 -> relu -> bn3
    w, b = params['conv3']
    s, t = _bn_fold(params['bn3'])
    t3 = _toeplitz(w, width=4, pad=0, in_lanes=128, out_lanes=128)
    ops += [jnp.asarray(t3, bf16), _bst(b, s, t, reps=2, lanes=128)]

    # flatten (NCHW order) + fc, zero-padded to a lane-dense 128-wide output
    wfc = np.asarray(params['fc_w'], np.float32)            # (64, 10)
    wmat = np.zeros((2, 128, 128), np.float32)
    for p in range(2):
        for q in range(2):
            for c in range(16):
                wmat[p, q * 16 + c, :10] = wfc[c * 4 + p * 2 + q]
    ops.append(jnp.asarray(wmat, bf16))
    bfc = np.zeros((1, 128), np.float32)
    bfc[0, :10] = np.asarray(params['fc_b'], np.float32)
    ops.append(jnp.asarray(bfc, jnp.float32))
    return tuple(ops)


# ----------------------------------------------------------------------------
# Deterministic synthetic parameters (shapes from MnistResNet.__init__)
# ----------------------------------------------------------------------------
def _conv_init(key, kh, kw, cin, cout):
    k1, k2 = jax.random.split(key)
    w = 0.1 * jax.random.normal(k1, (kh, kw, cin, cout), dtype=jnp.float32)
    b = 0.05 * jax.random.normal(k2, (cout,), dtype=jnp.float32)
    return w, b


def _bn_init(key, c):
    k1, k2, k3, k4 = jax.random.split(key, 4)
    gamma = 1.0 + 0.1 * jax.random.normal(k1, (c,), dtype=jnp.float32)
    beta = 0.05 * jax.random.normal(k2, (c,), dtype=jnp.float32)
    mean = 0.05 * jax.random.normal(k3, (c,), dtype=jnp.float32)
    var = 0.9 + 0.2 * jax.random.uniform(k4, (c,), dtype=jnp.float32)
    return gamma, beta, mean, var


def init_params(key, nb_blocks=3):
    keys = jax.random.split(key, 8 + 4 * nb_blocks)
    p = {}
    p['conv1'] = _conv_init(keys[0], 4, 4, 1, 32)
    p['bn1'] = _bn_init(keys[1], 32)
    p['conv2'] = _conv_init(keys[2], 4, 4, 32, 16)
    p['bn2'] = _bn_init(keys[3], 16)
    blocks = []
    for i in range(nb_blocks):
        kk = keys[4 + 4 * i: 8 + 4 * i]
        blocks.append({'conv1': _conv_init(kk[0], 3, 3, 16, 16),
                       'bn1': _bn_init(kk[1], 16),
                       'conv2': _conv_init(kk[2], 3, 3, 16, 16),
                       'bn2': _bn_init(kk[3], 16)})
    p['blocks'] = blocks
    off = 4 + 4 * nb_blocks
    p['bn_pool'] = _bn_init(keys[off], 16)
    p['conv3'] = _conv_init(keys[off + 1], 3, 3, 16, 16)
    p['bn3'] = _bn_init(keys[off + 2], 16)
    kfc1, kfc2 = jax.random.split(keys[off + 3])
    p['fc_w'] = 0.1 * jax.random.normal(kfc1, (64, 10), dtype=jnp.float32)
    p['fc_b'] = 0.05 * jax.random.normal(kfc2, (10,), dtype=jnp.float32)
    return p


# ----------------------------------------------------------------------------
# Forward: one fused pallas_call, batch grid, layout plumbing in the wrapper
# ----------------------------------------------------------------------------
def _build_xcat(x_nchw):
    """(N,1,14,14) -> (N*16, 56) bf16: 16 sublanes per image (rows 11..15 are
    zero padding) and the 4 kernel-row-shifted copies of each row on lanes."""
    n = x_nchw.shape[0]
    x = x_nchw.reshape(n, 14, 14).astype(jnp.float32)
    pieces = [jnp.pad(x[:, i:, :], ((0, 0), (0, i + 2), (0, 0)))
              for i in range(4)]
    xcat = jnp.concatenate(pieces, axis=-1)                  # (n, 16, 56)
    return xcat.reshape(n * 16, 56).astype(jnp.bfloat16)


def _cost(n, nb_blocks, operands, xcat):
    r16, r8 = 16 * n, 8 * n
    mm = ([(r16, 56, LANES1)]                                # conv1
          + [(r16, LANES1, 128)] * 4                         # conv2 kernel rows
          + [(r8, r16, 128)]                                 # conv2 compaction
          + [(r8, 384, 128)] * (2 * nb_blocks)               # resblock convs
          + [(r8, 128, 128)] * 2                             # pool lane selects
          + [(r8, 128, 128)] * 3                             # conv3 kernel rows
          + [(r8, 128, 128)] * 2)                            # fc
    flops = int(sum(2 * m * k * c for m, k, c in mm))
    bytes_accessed = int(xcat.size * xcat.dtype.itemsize
                         + sum(o.size * o.dtype.itemsize for o in operands)
                         + 8 * n * 128 * 4)
    return flops, bytes_accessed


def mnist_resnet_forward(x_nchw, operands, n_tile=None):
    n = x_nchw.shape[0]
    assert x_nchw.shape[1:] == (1, 14, 14), x_nchw.shape
    if n_tile is None:
        n_tile = n
    assert n % n_tile == 0, (n, n_tile)
    nb_blocks = (len(operands) - 11) // 3
    # Operands are baked for a fixed per-grid-step batch; verify it matches.
    assert operands[3].shape == (8 * n_tile, 16 * n_tile), \
        (operands[3].shape, n_tile)

    xcat = _build_xcat(x_nchw)                               # (n*16, 56) bf16

    def _const_spec(a):
        nd = a.ndim
        return pl.BlockSpec(a.shape, lambda b, _nd=nd: (0,) * _nd)

    flops, bytes_accessed = _cost(n, nb_blocks, operands, xcat)
    out2d = pl.pallas_call(
        functools.partial(_mnist_resnet_kernel, nb_blocks, n_tile),
        out_shape=jax.ShapeDtypeStruct((8 * n, 128), jnp.float32),
        grid=(n // n_tile,),
        in_specs=([pl.BlockSpec((16 * n_tile, 56), lambda b: (b, 0))]
                  + [_const_spec(op) for op in operands]),
        out_specs=pl.BlockSpec((8 * n_tile, 128), lambda b: (b, 0)),
        compiler_params=pltpu.CompilerParams(
            dimension_semantics=("parallel",),
            vmem_limit_bytes=32 * 1024 * 1024),
        cost_estimate=pl.CostEstimate(flops=flops, transcendentals=0,
                                      bytes_accessed=bytes_accessed),
    )(xcat, *operands)
    # Logits for image b live on sublane 8*b, lanes 0..9 of the padded output.
    return out2d[0::8, :10]


if __name__ == "__main__":
    key = jax.random.PRNGKey(0)
    kp, kx = jax.random.split(key)
    params = init_params(kp, nb_blocks=3)
    x = jax.random.normal(kx, (2, 1, 14, 14), dtype=jnp.float32)
    operands = build_operands(params, n_tile=x.shape[0])

    fwd = jax.jit(mnist_resnet_forward)
    out = fwd(x, operands)
    jax.block_until_ready(out)
    assert out.shape == (2, 10), out.shape
    assert out.dtype == jnp.float32
    print("KERNEL_OK")
</pallas_src>

<mosaic_0001>
module attributes {stable_mosaic.version = 11 : i64} {
  func.func @_mnist_resnet_kernel(%arg0: i32, %arg1: memref<32x56xbf16, #tpu.memory_space<vmem>>, %arg2: memref<56x384xbf16, #tpu.memory_space<vmem>>, %arg3: memref<3x384xf32, #tpu.memory_space<vmem>>, %arg4: memref<4x384x128xbf16, #tpu.memory_space<vmem>>, %arg5: memref<16x32xbf16, #tpu.memory_space<vmem>>, %arg6: memref<3x128xf32, #tpu.memory_space<vmem>>, %arg7: memref<384x128xbf16, #tpu.memory_space<vmem>>, %arg8: memref<384x128xbf16, #tpu.memory_space<vmem>>, %arg9: memref<2x128xf32, #tpu.memory_space<vmem>>, %arg10: memref<384x128xbf16, #tpu.memory_space<vmem>>, %arg11: memref<384x128xbf16, #tpu.memory_space<vmem>>, %arg12: memref<2x128xf32, #tpu.memory_space<vmem>>, %arg13: memref<384x128xbf16, #tpu.memory_space<vmem>>, %arg14: memref<384x128xbf16, #tpu.memory_space<vmem>>, %arg15: memref<2x128xf32, #tpu.memory_space<vmem>>, %arg16: memref<2x128x128xbf16, #tpu.memory_space<vmem>>, %arg17: memref<2x128xf32, #tpu.memory_space<vmem>>, %arg18: memref<3x128x128xbf16, #tpu.memory_space<vmem>>, %arg19: memref<3x128xf32, #tpu.memory_space<vmem>>, %arg20: memref<2x128x128xbf16, #tpu.memory_space<vmem>>, %arg21: memref<1x128xf32, #tpu.memory_space<vmem>>, %arg22: memref<16x128xf32, #tpu.memory_space<vmem>>) attributes {dimension_semantics = [#tpu.dimension_semantics<parallel>], iteration_bounds = array<i64: 1>, scalar_prefetch = 0 : i64, scratch_operands = 0 : i64, tpu.core_type = #tpu.core_type<tc>, window_params = [{transform_indices = @transform_0, window_bounds = array<i64: 32, 56>}, {pipeline_mode = #tpu.pipeline_mode<synchronous>, transform_indices = @transform_1, window_bounds = array<i64: 56, 384>}, {pipeline_mode = #tpu.pipeline_mode<synchronous>, transform_indices = @transform_2, window_bounds = array<i64: 3, 384>}, {pipeline_mode = #tpu.pipeline_mode<synchronous>, transform_indices = @transform_3, window_bounds = array<i64: 4, 384, 128>}, {pipeline_mode = #tpu.pipeline_mode<synchronous>, transform_indices = @transform_4, window_bounds = array<i64: 16, 32>}, {pipeline_mode = #tpu.pipeline_mode<synchronous>, transform_indices = @transform_5, window_bounds = array<i64: 3, 128>}, {pipeline_mode = #tpu.pipeline_mode<synchronous>, transform_indices = @transform_6, window_bounds = array<i64: 384, 128>}, {pipeline_mode = #tpu.pipeline_mode<synchronous>, transform_indices = @transform_7, window_bounds = array<i64: 384, 128>}, {pipeline_mode = #tpu.pipeline_mode<synchronous>, transform_indices = @transform_8, window_bounds = array<i64: 2, 128>}, {pipeline_mode = #tpu.pipeline_mode<synchronous>, transform_indices = @transform_9, window_bounds = array<i64: 384, 128>}, {pipeline_mode = #tpu.pipeline_mode<synchronous>, transform_indices = @transform_10, window_bounds = array<i64: 384, 128>}, {pipeline_mode = #tpu.pipeline_mode<synchronous>, transform_indices = @transform_11, window_bounds = array<i64: 2, 128>}, {pipeline_mode = #tpu.pipeline_mode<synchronous>, transform_indices = @transform_12, window_bounds = array<i64: 384, 128>}, {pipeline_mode = #tpu.pipeline_mode<synchronous>, transform_indices = @transform_13, window_bounds = array<i64: 384, 128>}, {pipeline_mode = #tpu.pipeline_mode<synchronous>, transform_indices = @transform_14, window_bounds = array<i64: 2, 128>}, {pipeline_mode = #tpu.pipeline_mode<synchronous>, transform_indices = @transform_15, window_bounds = array<i64: 2, 128, 128>}, {pipeline_mode = #tpu.pipeline_mode<synchronous>, transform_indices = @transform_16, window_bounds = array<i64: 2, 128>}, {pipeline_mode = #tpu.pipeline_mode<synchronous>, transform_indices = @transform_17, window_bounds = array<i64: 3, 128, 128>}, {pipeline_mode = #tpu.pipeline_mode<synchronous>, transform_indices = @transform_18, window_bounds = array<i64: 3, 128>}, {pipeline_mode = #tpu.pipeline_mode<synchronous>, transform_indices = @transform_19, window_bounds = array<i64: 2, 128, 128>}, {pipeline_mode = #tpu.pipeline_mode<synchronous>, transform_indices = @transform_20, window_bounds = array<i64: 1, 128>}, {transform_indices = @transform_21, window_bounds = array<i64: 16, 128>}]} {
    %c0 = arith.constant 0 : index
    %c0_0 = arith.constant 0 : index
    %0 = vector.load %arg1[%c0, %c0_0] : memref<32x56xbf16, #tpu.memory_space<vmem>>, vector<32x56xbf16>
    %c0_1 = arith.constant 0 : index
    %c0_2 = arith.constant 0 : index
    %1 = vector.load %arg2[%c0_1, %c0_2] : memref<56x384xbf16, #tpu.memory_space<vmem>>, vector<56x384xbf16>
    %cst = arith.constant dense<0.000000e+00> : vector<32x384xf32>
    %2 = tpu.matmul %0, %1, %cst {dimension_numbers = #tpu.dot_dimension_numbers<[1], [0], [0], [1], [0, 0, 1, 1], [], []>} : vector<32x56xbf16>, vector<56x384xbf16>, vector<32x384xf32> -> vector<32x384xf32>
    %c0_3 = arith.constant 0 : index
    %c0_4 = arith.constant 0 : index
    %3 = vector.load %arg3[%c0_3, %c0_4] : memref<3x384xf32, #tpu.memory_space<vmem>>, vector<1x384xf32>
    %4 = vector.broadcast %3 : vector<1x384xf32> to vector<32x384xf32>
    %5 = arith.addf %2, %4 : vector<32x384xf32>
    %cst_5 = arith.constant 0.000000e+00 : f32
    %6 = vector.broadcast %cst_5 : f32 to vector<32x384xf32>
    %7 = arith.maximumf %5, %6 : vector<32x384xf32>
    %c1 = arith.constant 1 : index
    %c0_6 = arith.constant 0 : index
    %8 = vector.load %arg3[%c1, %c0_6] : memref<3x384xf32, #tpu.memory_space<vmem>>, vector<1x384xf32>
    %9 = vector.broadcast %8 : vector<1x384xf32> to vector<32x384xf32>
    %10 = arith.mulf %7, %9 : vector<32x384xf32>
    %c2 = arith.constant 2 : index
    %c0_7 = arith.constant 0 : index
    %11 = vector.load %arg3[%c2, %c0_7] : memref<3x384xf32, #tpu.memory_space<vmem>>, vector<1x384xf32>
    %12 = vector.broadcast %11 : vector<1x384xf32> to vector<32x384xf32>
    %13 = arith.addf %10, %12 : vector<32x384xf32>
    %c0_8 = arith.constant 0 : index
    %c0_9 = arith.constant 0 : index
    %c0_10 = arith.constant 0 : index
    %14 = vector.load %arg4[%c0_8, %c0_9, %c0_10] : memref<4x384x128xbf16, #tpu.memory_space<vmem>>, vector<1x384x128xbf16>
    %15 = vector.shape_cast %14 : vector<1x384x128xbf16> to vector<384x128xbf16>
    %16 = arith.truncf %13 : vector<32x384xf32> to vector<32x384xbf16>
    %cst_11 = arith.constant dense<0.000000e+00> : vector<32x128xf32>
    %17 = tpu.matmul %16, %15, %cst_11 {dimension_numbers = #tpu.dot_dimension_numbers<[1], [0], [0], [1], [0, 0, 1, 1], [], []>} : vector<32x384xbf16>, vector<384x128xbf16>, vector<32x128xf32> -> vector<32x128xf32>
    %c31_i32 = arith.constant 31 : i32
    %18 = tpu.dynamic_rotate %13 by %c31_i32 dim 0 : vector<32x384xf32>, i32 -> vector<32x384xf32>
    %c1_12 = arith.constant 1 : index
    %c0_13 = arith.constant 0 : index
    %c0_14 = arith.constant 0 : index
    %19 = vector.load %arg4[%c1_12, %c0_13, %c0_14] : memref<4x384x128xbf16, #tpu.memory_space<vmem>>, vector<1x384x128xbf16>
    %20 = vector.shape_cast %19 : vector<1x384x128xbf16> to vector<384x128xbf16>
    %21 = arith.truncf %18 : vector<32x384xf32> to vector<32x384xbf16>
    %cst_15 = arith.constant dense<0.000000e+00> : vector<32x128xf32>
    %22 = tpu.matmul %21, %20, %cst_15 {dimension_numbers = #tpu.dot_dimension_numbers<[1], [0], [0], [1], [0, 0, 1, 1], [], []>} : vector<32x384xbf16>, vector<384x128xbf16>, vector<32x128xf32> -> vector<32x128xf32>
    %23 = arith.addf %17, %22 : vector<32x128xf32>
    %c30_i32 = arith.constant 30 : i32
    %24 = tpu.dynamic_rotate %13 by %c30_i32 dim 0 : vector<32x384xf32>, i32 -> vector<32x384xf32>
    %c2_16 = arith.constant 2 : index
    %c0_17 = arith.constant 0 : index
    %c0_18 = arith.constant 0 : index
    %25 = vector.load %arg4[%c2_16, %c0_17, %c0_18] : memref<4x384x128xbf16, #tpu.memory_space<vmem>>, vector<1x384x128xbf16>
    %26 = vector.shape_cast %25 : vector<1x384x128xbf16> to vector<384x128xbf16>
    %27 = arith.truncf %24 : vector<32x384xf32> to vector<32x384xbf16>
    %cst_19 = arith.constant dense<0.000000e+00> : vector<32x128xf32>
    %28 = tpu.matmul %27, %26, %cst_19 {dimension_numbers = #tpu.dot_dimension_numbers<[1], [0], [0], [1], [0, 0, 1, 1], [], []>} : vector<32x384xbf16>, vector<384x128xbf16>, vector<32x128xf32> -> vector<32x128xf32>
    %29 = arith.addf %23, %28 : vector<32x128xf32>
    %c29_i32 = arith.constant 29 : i32
    %30 = tpu.dynamic_rotate %13 by %c29_i32 dim 0 : vector<32x384xf32>, i32 -> vector<32x384xf32>
    %c3 = arith.constant 3 : index
    %c0_20 = arith.constant 0 : index
    %c0_21 = arith.constant 0 : index
    %31 = vector.load %arg4[%c3, %c0_20, %c0_21] : memref<4x384x128xbf16, #tpu.memory_space<vmem>>, vector<1x384x128xbf16>
    %32 = vector.shape_cast %31 : vector<1x384x128xbf16> to vector<384x128xbf16>
    %33 = arith.truncf %30 : vector<32x384xf32> to vector<32x384xbf16>
    %cst_22 = arith.constant dense<0.000000e+00> : vector<32x128xf32>
    %34 = tpu.matmul %33, %32, %cst_22 {dimension_numbers = #tpu.dot_dimension_numbers<[1], [0], [0], [1], [0, 0, 1, 1], [], []>} : vector<32x384xbf16>, vector<384x128xbf16>, vector<32x128xf32> -> vector<32x128xf32>
    %35 = arith.addf %29, %34 : vector<32x128xf32>
    %c0_23 = arith.constant 0 : index
    %c0_24 = arith.constant 0 : index
    %36 = vector.load %arg5[%c0_23, %c0_24] : memref<16x32xbf16, #tpu.memory_space<vmem>>, vector<16x32xbf16>
    %37 = arith.truncf %35 : vector<32x128xf32> to vector<32x128xbf16>
    %cst_25 = arith.constant dense<0.000000e+00> : vector<16x128xf32>
    %38 = tpu.matmul %36, %37, %cst_25 {dimension_numbers = #tpu.dot_dimension_numbers<[1], [0], [0], [1], [0, 0, 1, 1], [], []>} : vector<16x32xbf16>, vector<32x128xbf16>, vector<16x128xf32> -> vector<16x128xf32>
    %c0_26 = arith.constant 0 : index
    %c0_27 = arith.constant 0 : index
    %39 = vector.load %arg6[%c0_26, %c0_27] : memref<3x128xf32, #tpu.memory_space<vmem>>, vector<1x128xf32>
    %40 = vector.broadcast %39 : vector<1x128xf32> to vector<16x128xf32>
    %41 = arith.addf %38, %40 : vector<16x128xf32>
    %cst_28 = arith.constant 0.000000e+00 : f32
    %42 = vector.broadcast %cst_28 : f32 to vector<16x128xf32>
    %43 = arith.maximumf %41, %42 : vector<16x128xf32>
    %c1_29 = arith.constant 1 : index
    %c0_30 = arith.constant 0 : index
    %44 = vector.load %arg6[%c1_29, %c0_30] : memref<3x128xf32, #tpu.memory_space<vmem>>, vector<1x128xf32>
    %45 = vector.broadcast %44 : vector<1x128xf32> to vector<16x128xf32>
    %46 = arith.mulf %43, %45 : vector<16x128xf32>
    %c2_31 = arith.constant 2 : index
    %c0_32 = arith.constant 0 : index
    %47 = vector.load %arg6[%c2_31, %c0_32] : memref<3x128xf32, #tpu.memory_space<vmem>>, vector<1x128xf32>
    %48 = vector.broadcast %47 : vector<1x128xf32> to vector<16x128xf32>
    %49 = arith.addf %46, %48 : vector<16x128xf32>
    %50 = tpu.iota {dimensions = array<i32: 0>} : vector<16x128xi32>
    %c7_i32 = arith.constant 7 : i32
    %51 = vector.broadcast %c7_i32 : i32 to vector<16x128xi32>
    %52 = arith.andi %50, %51 : vector<16x128xi32>
    %c1_i32 = arith.constant 1 : i32
    %53 = vector.broadcast %c1_i32 : i32 to vector<16x128xi32>
    %54 = arith.cmpi sge, %52, %53 : vector<16x128xi32>
    %c6_i32 = arith.constant 6 : i32
    %55 = vector.broadcast %c6_i32 : i32 to vector<16x128xi32>
    %56 = arith.cmpi sle, %52, %55 : vector<16x128xi32>
    %c1_i32_33 = arith.constant 1 : i32
    %57 = tpu.dynamic_rotate %49 by %c1_i32_33 dim 0 : vector<16x128xf32>, i32 -> vector<16x128xf32>
    %cst_34 = arith.constant 0.000000e+00 : f32
    %58 = vector.broadcast %cst_34 : f32 to vector<16x128xf32>
    %59 = arith.select %54, %57, %58 : vector<16x128xi1>, vector<16x128xf32>
    %c15_i32 = arith.constant 15 : i32
    %60 = tpu.dynamic_rotate %49 by %c15_i32 dim 0 : vector<16x128xf32>, i32 -> vector<16x128xf32>
    %cst_35 = arith.constant 0.000000e+00 : f32
    %61 = vector.broadcast %cst_35 : f32 to vector<16x128xf32>
    %62 = arith.select %56, %60, %61 : vector<16x128xi1>, vector<16x128xf32>
    %63 = tpu.concatenate %59, %49, %62 in 1 : vector<16x128xf32>, vector<16x128xf32>, vector<16x128xf32> -> vector<16x384xf32>
    %c0_36 = arith.constant 0 : index
    %c0_37 = arith.constant 0 : index
    %64 = vector.load %arg7[%c0_36, %c0_37] : memref<384x128xbf16, #tpu.memory_space<vmem>>, vector<384x128xbf16>
    %65 = arith.truncf %63 : vector<16x384xf32> to vector<16x384xbf16>
    %cst_38 = arith.constant dense<0.000000e+00> : vector<16x128xf32>
    %66 = tpu.matmul %65, %64, %cst_38 {dimension_numbers = #tpu.dot_dimension_numbers<[1], [0], [0], [1], [0, 0, 1, 1], [], []>} : vector<16x384xbf16>, vector<384x128xbf16>, vector<16x128xf32> -> vector<16x128xf32>
    %c0_39 = arith.constant 0 : index
    %c0_40 = arith.constant 0 : index
    %67 = vector.load %arg9[%c0_39, %c0_40] : memref<2x128xf32, #tpu.memory_space<vmem>>, vector<1x128xf32>
    %68 = vector.broadcast %67 : vector<1x128xf32> to vector<16x128xf32>
    %69 = arith.addf %66, %68 : vector<16x128xf32>
    %cst_41 = arith.constant 0.000000e+00 : f32
    %70 = vector.broadcast %cst_41 : f32 to vector<16x128xf32>
    %71 = arith.maximumf %69, %70 : vector<16x128xf32>
    %c1_i32_42 = arith.constant 1 : i32
    %72 = tpu.dynamic_rotate %71 by %c1_i32_42 dim 0 : vector<16x128xf32>, i32 -> vector<16x128xf32>
    %cst_43 = arith.constant 0.000000e+00 : f32
    %73 = vector.broadcast %cst_43 : f32 to vector<16x128xf32>
    %74 = arith.select %54, %72, %73 : vector<16x128xi1>, vector<16x128xf32>
    %c15_i32_44 = arith.constant 15 : i32
    %75 = tpu.dynamic_rotate %71 by %c15_i32_44 dim 0 : vector<16x128xf32>, i32 -> vector<16x128xf32>
    %cst_45 = arith.constant 0.000000e+00 : f32
    %76 = vector.broadcast %cst_45 : f32 to vector<16x128xf32>
    %77 = arith.select %56, %75, %76 : vector<16x128xi1>, vector<16x128xf32>
    %78 = tpu.concatenate %74, %71, %77 in 1 : vector<16x128xf32>, vector<16x128xf32>, vector<16x128xf32> -> vector<16x384xf32>
    %c0_46 = arith.constant 0 : index
    %c0_47 = arith.constant 0 : index
    %79 = vector.load %arg8[%c0_46, %c0_47] : memref<384x128xbf16, #tpu.memory_space<vmem>>, vector<384x128xbf16>
    %80 = arith.truncf %78 : vector<16x384xf32> to vector<16x384xbf16>
    %cst_48 = arith.constant dense<0.000000e+00> : vector<16x128xf32>
    %81 = tpu.matmul %80, %79, %cst_48 {dimension_numbers = #tpu.dot_dimension_numbers<[1], [0], [0], [1], [0, 0, 1, 1], [], []>} : vector<16x384xbf16>, vector<384x128xbf16>, vector<16x128xf32> -> vector<16x128xf32>
    %c1_49 = arith.constant 1 : index
    %c0_50 = arith.constant 0 : index
    %82 = vector.load %arg9[%c1_49, %c0_50] : memref<2x128xf32, #tpu.memory_space<vmem>>, vector<1x128xf32>
    %83 = vector.broadcast %82 : vector<1x128xf32> to vector<16x128xf32>
    %84 = arith.addf %81, %83 : vector<16x128xf32>
    %85 = arith.addf %84, %49 : vector<16x128xf32>
    %cst_51 = arith.constant 0.000000e+00 : f32
    %86 = vector.broadcast %cst_51 : f32 to vector<16x128xf32>
    %87 = arith.maximumf %85, %86 : vector<16x128xf32>
    %c1_i32_52 = arith.constant 1 : i32
    %88 = tpu.dynamic_rotate %87 by %c1_i32_52 dim 0 : vector<16x128xf32>, i32 -> vector<16x128xf32>
    %cst_53 = arith.constant 0.000000e+00 : f32
    %89 = vector.broadcast %cst_53 : f32 to vector<16x128xf32>
    %90 = arith.select %54, %88, %89 : vector<16x128xi1>, vector<16x128xf32>
    %c15_i32_54 = arith.constant 15 : i32
    %91 = tpu.dynamic_rotate %87 by %c15_i32_54 dim 0 : vector<16x128xf32>, i32 -> vector<16x128xf32>
    %cst_55 = arith.constant 0.000000e+00 : f32
    %92 = vector.broadcast %cst_55 : f32 to vector<16x128xf32>
    %93 = arith.select %56, %91, %92 : vector<16x128xi1>, vector<16x128xf32>
    %94 = tpu.concatenate %90, %87, %93 in 1 : vector<16x128xf32>, vector<16x128xf32>, vector<16x128xf32> -> vector<16x384xf32>
    %c0_56 = arith.constant 0 : index
    %c0_57 = arith.constant 0 : index
    %95 = vector.load %arg10[%c0_56, %c0_57] : memref<384x128xbf16, #tpu.memory_space<vmem>>, vector<384x128xbf16>
    %96 = arith.truncf %94 : vector<16x384xf32> to vector<16x384xbf16>
    %cst_58 = arith.constant dense<0.000000e+00> : vector<16x128xf32>
    %97 = tpu.matmul %96, %95, %cst_58 {dimension_numbers = #tpu.dot_dimension_numbers<[1], [0], [0], [1], [0, 0, 1, 1], [], []>} : vector<16x384xbf16>, vector<384x128xbf16>, vector<16x128xf32> -> vector<16x128xf32>
    %c0_59 = arith.constant 0 : index
    %c0_60 = arith.constant 0 : index
    %98 = vector.load %arg12[%c0_59, %c0_60] : memref<2x128xf32, #tpu.memory_space<vmem>>, vector<1x128xf32>
    %99 = vector.broadcast %98 : vector<1x128xf32> to vector<16x128xf32>
    %100 = arith.addf %97, %99 : vector<16x128xf32>
    %cst_61 = arith.constant 0.000000e+00 : f32
    %101 = vector.broadcast %cst_61 : f32 to vector<16x128xf32>
    %102 = arith.maximumf %100, %101 : vector<16x128xf32>
    %c1_i32_62 = arith.constant 1 : i32
    %103 = tpu.dynamic_rotate %102 by %c1_i32_62 dim 0 : vector<16x128xf32>, i32 -> vector<16x128xf32>
    %cst_63 = arith.constant 0.000000e+00 : f32
    %104 = vector.broadcast %cst_63 : f32 to vector<16x128xf32>
    %105 = arith.select %54, %103, %104 : vector<16x128xi1>, vector<16x128xf32>
    %c15_i32_64 = arith.constant 15 : i32
    %106 = tpu.dynamic_rotate %102 by %c15_i32_64 dim 0 : vector<16x128xf32>, i32 -> vector<16x128xf32>
    %cst_65 = arith.constant 0.000000e+00 : f32
    %107 = vector.broadcast %cst_65 : f32 to vector<16x128xf32>
    %108 = arith.select %56, %106, %107 : vector<16x128xi1>, vector<16x128xf32>
    %109 = tpu.concatenate %105, %102, %108 in 1 : vector<16x128xf32>, vector<16x128xf32>, vector<16x128xf32> -> vector<16x384xf32>
    %c0_66 = arith.constant 0 : index
    %c0_67 = arith.constant 0 : index
    %110 = vector.load %arg11[%c0_66, %c0_67] : memref<384x128xbf16, #tpu.memory_space<vmem>>, vector<384x128xbf16>
    %111 = arith.truncf %109 : vector<16x384xf32> to vector<16x384xbf16>
    %cst_68 = arith.constant dense<0.000000e+00> : vector<16x128xf32>
    %112 = tpu.matmul %111, %110, %cst_68 {dimension_numbers = #tpu.dot_dimension_numbers<[1], [0], [0], [1], [0, 0, 1, 1], [], []>} : vector<16x384xbf16>, vector<384x128xbf16>, vector<16x128xf32> -> vector<16x128xf32>
    %c1_69 = arith.constant 1 : index
    %c0_70 = arith.constant 0 : index
    %113 = vector.load %arg12[%c1_69, %c0_70] : memref<2x128xf32, #tpu.memory_space<vmem>>, vector<1x128xf32>
    %114 = vector.broadcast %113 : vector<1x128xf32> to vector<16x128xf32>
    %115 = arith.addf %112, %114 : vector<16x128xf32>
    %116 = arith.addf %115, %87 : vector<16x128xf32>
    %cst_71 = arith.constant 0.000000e+00 : f32
    %117 = vector.broadcast %cst_71 : f32 to vector<16x128xf32>
    %118 = arith.maximumf %116, %117 : vector<16x128xf32>
    %c1_i32_72 = arith.constant 1 : i32
    %119 = tpu.dynamic_rotate %118 by %c1_i32_72 dim 0 : vector<16x128xf32>, i32 -> vector<16x128xf32>
    %cst_73 = arith.constant 0.000000e+00 : f32
    %120 = vector.broadcast %cst_73 : f32 to vector<16x128xf32>
    %121 = arith.select %54, %119, %120 : vector<16x128xi1>, vector<16x128xf32>
    %c15_i32_74 = arith.constant 15 : i32
    %122 = tpu.dynamic_rotate %118 by %c15_i32_74 dim 0 : vector<16x128xf32>, i32 -> vector<16x128xf32>
    %cst_75 = arith.constant 0.000000e+00 : f32
    %123 = vector.broadcast %cst_75 : f32 to vector<16x128xf32>
    %124 = arith.select %56, %122, %123 : vector<16x128xi1>, vector<16x128xf32>
    %125 = tpu.concatenate %121, %118, %124 in 1 : vector<16x128xf32>, vector<16x128xf32>, vector<16x128xf32> -> vector<16x384xf32>
    %c0_76 = arith.constant 0 : index
    %c0_77 = arith.constant 0 : index
    %126 = vector.load %arg13[%c0_76, %c0_77] : memref<384x128xbf16, #tpu.memory_space<vmem>>, vector<384x128xbf16>
    %127 = arith.truncf %125 : vector<16x384xf32> to vector<16x384xbf16>
    %cst_78 = arith.constant dense<0.000000e+00> : vector<16x128xf32>
    %128 = tpu.matmul %127, %126, %cst_78 {dimension_numbers = #tpu.dot_dimension_numbers<[1], [0], [0], [1], [0, 0, 1, 1], [], []>} : vector<16x384xbf16>, vector<384x128xbf16>, vector<16x128xf32> -> vector<16x128xf32>
    %c0_79 = arith.constant 0 : index
    %c0_80 = arith.constant 0 : index
    %129 = vector.load %arg15[%c0_79, %c0_80] : memref<2x128xf32, #tpu.memory_space<vmem>>, vector<1x128xf32>
    %130 = vector.broadcast %129 : vector<1x128xf32> to vector<16x128xf32>
    %131 = arith.addf %128, %130 : vector<16x128xf32>
    %cst_81 = arith.constant 0.000000e+00 : f32
    %132 = vector.broadcast %cst_81 : f32 to vector<16x128xf32>
    %133 = arith.maximumf %131, %132 : vector<16x128xf32>
    %c1_i32_82 = arith.constant 1 : i32
    %134 = tpu.dynamic_rotate %133 by %c1_i32_82 dim 0 : vector<16x128xf32>, i32 -> vector<16x128xf32>
    %cst_83 = arith.constant 0.000000e+00 : f32
    %135 = vector.broadcast %cst_83 : f32 to vector<16x128xf32>
    %136 = arith.select %54, %134, %135 : vector<16x128xi1>, vector<16x128xf32>
    %c15_i32_84 = arith.constant 15 : i32
    %137 = tpu.dynamic_rotate %133 by %c15_i32_84 dim 0 : vector<16x128xf32>, i32 -> vector<16x128xf32>
    %cst_85 = arith.constant 0.000000e+00 : f32
    %138 = vector.broadcast %cst_85 : f32 to vector<16x128xf32>
    %139 = arith.select %56, %137, %138 : vector<16x128xi1>, vector<16x128xf32>
    %140 = tpu.concatenate %136, %133, %139 in 1 : vector<16x128xf32>, vector<16x128xf32>, vector<16x128xf32> -> vector<16x384xf32>
    %c0_86 = arith.constant 0 : index
    %c0_87 = arith.constant 0 : index
    %141 = vector.load %arg14[%c0_86, %c0_87] : memref<384x128xbf16, #tpu.memory_space<vmem>>, vector<384x128xbf16>
    %142 = arith.truncf %140 : vector<16x384xf32> to vector<16x384xbf16>
    %cst_88 = arith.constant dense<0.000000e+00> : vector<16x128xf32>
    %143 = tpu.matmul %142, %141, %cst_88 {dimension_numbers = #tpu.dot_dimension_numbers<[1], [0], [0], [1], [0, 0, 1, 1], [], []>} : vector<16x384xbf16>, vector<384x128xbf16>, vector<16x128xf32> -> vector<16x128xf32>
    %c1_89 = arith.constant 1 : index
    %c0_90 = arith.constant 0 : index
    %144 = vector.load %arg15[%c1_89, %c0_90] : memref<2x128xf32, #tpu.memory_space<vmem>>, vector<1x128xf32>
    %145 = vector.broadcast %144 : vector<1x128xf32> to vector<16x128xf32>
    %146 = arith.addf %143, %145 : vector<16x128xf32>
    %147 = arith.addf %146, %118 : vector<16x128xf32>
    %cst_91 = arith.constant 0.000000e+00 : f32
    %148 = vector.broadcast %cst_91 : f32 to vector<16x128xf32>
    %149 = arith.maximumf %147, %148 : vector<16x128xf32>
    %c15_i32_92 = arith.constant 15 : i32
    %150 = tpu.dynamic_rotate %149 by %c15_i32_92 dim 0 : vector<16x128xf32>, i32 -> vector<16x128xf32>
    %151 = arith.maximumf %149, %150 : vector<16x128xf32>
    %c0_93 = arith.constant 0 : index
    %c0_94 = arith.constant 0 : index
    %c0_95 = arith.constant 0 : index
    %152 = vector.load %arg16[%c0_93, %c0_94, %c0_95] : memref<2x128x128xbf16, #tpu.memory_space<vmem>>, vector<1x128x128xbf16>
    %153 = vector.shape_cast %152 : vector<1x128x128xbf16> to vector<128x128xbf16>
    %154 = arith.truncf %151 : vector<16x128xf32> to vector<16x128xbf16>
    %cst_96 = arith.constant dense<0.000000e+00> : vector<16x128xf32>
    %155 = tpu.matmul %154, %153, %cst_96 {dimension_numbers = #tpu.dot_dimension_numbers<[1], [0], [0], [1], [0, 0, 1, 1], [], []>} : vector<16x128xbf16>, vector<128x128xbf16>, vector<16x128xf32> -> vector<16x128xf32>
    %c1_97 = arith.constant 1 : index
    %c0_98 = arith.constant 0 : index
    %c0_99 = arith.constant 0 : index
    %156 = vector.load %arg16[%c1_97, %c0_98, %c0_99] : memref<2x128x128xbf16, #tpu.memory_space<vmem>>, vector<1x128x128xbf16>
    %157 = vector.shape_cast %156 : vector<1x128x128xbf16> to vector<128x128xbf16>
    %158 = arith.truncf %151 : vector<16x128xf32> to vector<16x128xbf16>
    %cst_100 = arith.constant dense<0.000000e+00> : vector<16x128xf32>
    %159 = tpu.matmul %158, %157, %cst_100 {dimension_numbers = #tpu.dot_dimension_numbers<[1], [0], [0], [1], [0, 0, 1, 1], [], []>} : vector<16x128xbf16>, vector<128x128xbf16>, vector<16x128xf32> -> vector<16x128xf32>
    %160 = arith.maximumf %155, %159 : vector<16x128xf32>
    %c0_101 = arith.constant 0 : index
    %c0_102 = arith.constant 0 : index
    %161 = vector.load %arg17[%c0_101, %c0_102] : memref<2x128xf32, #tpu.memory_space<vmem>>, vector<1x128xf32>
    %162 = vector.broadcast %161 : vector<1x128xf32> to vector<16x128xf32>
    %163 = arith.mulf %160, %162 : vector<16x128xf32>
    %c1_103 = arith.constant 1 : index
    %c0_104 = arith.constant 0 : index
    %164 = vector.load %arg17[%c1_103, %c0_104] : memref<2x128xf32, #tpu.memory_space<vmem>>, vector<1x128xf32>
    %165 = vector.broadcast %164 : vector<1x128xf32> to vector<16x128xf32>
    %166 = arith.addf %163, %165 : vector<16x128xf32>
    %c0_105 = arith.constant 0 : index
    %c0_106 = arith.constant 0 : index
    %c0_107 = arith.constant 0 : index
    %167 = vector.load %arg18[%c0_105, %c0_106, %c0_107] : memref<3x128x128xbf16, #tpu.memory_space<vmem>>, vector<1x128x128xbf16>
    %168 = vector.shape_cast %167 : vector<1x128x128xbf16> to vector<128x128xbf16>
    %169 = arith.truncf %166 : vector<16x128xf32> to vector<16x128xbf16>
    %cst_108 = arith.constant dense<0.000000e+00> : vector<16x128xf32>
    %170 = tpu.matmul %169, %168, %cst_108 {dimension_numbers = #tpu.dot_dimension_numbers<[1], [0], [0], [1], [0, 0, 1, 1], [], []>} : vector<16x128xbf16>, vector<128x128xbf16>, vector<16x128xf32> -> vector<16x128xf32>
    %c14_i32 = arith.constant 14 : i32
    %171 = tpu.dynamic_rotate %166 by %c14_i32 dim 0 : vector<16x128xf32>, i32 -> vector<16x128xf32>
    %c1_109 = arith.constant 1 : index
    %c0_110 = arith.constant 0 : index
    %c0_111 = arith.constant 0 : index
    %172 = vector.load %arg18[%c1_109, %c0_110, %c0_111] : memref<3x128x128xbf16, #tpu.memory_space<vmem>>, vector<1x128x128xbf16>
    %173 = vector.shape_cast %172 : vector<1x128x128xbf16> to vector<128x128xbf16>
    %174 = arith.truncf %171 : vector<16x128xf32> to vector<16x128xbf16>
    %cst_112 = arith.constant dense<0.000000e+00> : vector<16x128xf32>
    %175 = tpu.matmul %174, %173, %cst_112 {dimension_numbers = #tpu.dot_dimension_numbers<[1], [0], [0], [1], [0, 0, 1, 1], [], []>} : vector<16x128xbf16>, vector<128x128xbf16>, vector<16x128xf32> -> vector<16x128xf32>
    %176 = arith.addf %170, %175 : vector<16x128xf32>
    %c12_i32 = arith.constant 12 : i32
    %177 = tpu.dynamic_rotate %166 by %c12_i32 dim 0 : vector<16x128xf32>, i32 -> vector<16x128xf32>
    %c2_113 = arith.constant 2 : index
    %c0_114 = arith.constant 0 : index
    %c0_115 = arith.constant 0 : index
    %178 = vector.load %arg18[%c2_113, %c0_114, %c0_115] : memref<3x128x128xbf16, #tpu.memory_space<vmem>>, vector<1x128x128xbf16>
    %179 = vector.shape_cast %178 : vector<1x128x128xbf16> to vector<128x128xbf16>
    %180 = arith.truncf %177 : vector<16x128xf32> to vector<16x128xbf16>
    %cst_116 = arith.constant dense<0.000000e+00> : vector<16x128xf32>
    %181 = tpu.matmul %180, %179, %cst_116 {dimension_numbers = #tpu.dot_dimension_numbers<[1], [0], [0], [1], [0, 0, 1, 1], [], []>} : vector<16x128xbf16>, vector<128x128xbf16>, vector<16x128xf32> -> vector<16x128xf32>
    %182 = arith.addf %176, %181 : vector<16x128xf32>
    %c0_117 = arith.constant 0 : index
    %c0_118 = arith.constant 0 : index
    %183 = vector.load %arg19[%c0_117, %c0_118] : memref<3x128xf32, #tpu.memory_space<vmem>>, vector<1x128xf32>
    %184 = vector.broadcast %183 : vector<1x128xf32> to vector<16x128xf32>
    %185 = arith.addf %182, %184 : vector<16x128xf32>
    %cst_119 = arith.constant 0.000000e+00 : f32
    %186 = vector.broadcast %cst_119 : f32 to vector<16x128xf32>
    %187 = arith.maximumf %185, %186 : vector<16x128xf32>
    %c1_120 = arith.constant 1 : index
    %c0_121 = arith.constant 0 : index
    %188 = vector.load %arg19[%c1_120, %c0_121] : memref<3x128xf32, #tpu.memory_space<vmem>>, vector<1x128xf32>
    %189 = vector.broadcast %188 : vector<1x128xf32> to vector<16x128xf32>
    %190 = arith.mulf %187, %189 : vector<16x128xf32>
    %c2_122 = arith.constant 2 : index
    %c0_123 = arith.constant 0 : index
    %191 = vector.load %arg19[%c2_122, %c0_123] : memref<3x128xf32, #tpu.memory_space<vmem>>, vector<1x128xf32>
    %192 = vector.broadcast %191 : vector<1x128xf32> to vector<16x128xf32>
    %193 = arith.addf %190, %192 : vector<16x128xf32>
    %c0_124 = arith.constant 0 : index
    %c0_125 = arith.constant 0 : index
    %c0_126 = arith.constant 0 : index
    %194 = vector.load %arg20[%c0_124, %c0_125, %c0_126] : memref<2x128x128xbf16, #tpu.memory_space<vmem>>, vector<1x128x128xbf16>
    %195 = vector.shape_cast %194 : vector<1x128x128xbf16> to vector<128x128xbf16>
    %196 = arith.truncf %193 : vector<16x128xf32> to vector<16x128xbf16>
    %cst_127 = arith.constant dense<0.000000e+00> : vector<16x128xf32>
    %197 = tpu.matmul %196, %195, %cst_127 {dimension_numbers = #tpu.dot_dimension_numbers<[1], [0], [0], [1], [0, 0, 1, 1], [], []>} : vector<16x128xbf16>, vector<128x128xbf16>, vector<16x128xf32> -> vector<16x128xf32>
    %c14_i32_128 = arith.constant 14 : i32
    %198 = tpu.dynamic_rotate %193 by %c14_i32_128 dim 0 : vector<16x128xf32>, i32 -> vector<16x128xf32>
    %c1_129 = arith.constant 1 : index
    %c0_130 = arith.constant 0 : index
    %c0_131 = arith.constant 0 : index
    %199 = vector.load %arg20[%c1_129, %c0_130, %c0_131] : memref<2x128x128xbf16, #tpu.memory_space<vmem>>, vector<1x128x128xbf16>
    %200 = vector.shape_cast %199 : vector<1x128x128xbf16> to vector<128x128xbf16>
    %201 = arith.truncf %198 : vector<16x128xf32> to vector<16x128xbf16>
    %cst_132 = arith.constant dense<0.000000e+00> : vector<16x128xf32>
    %202 = tpu.matmul %201, %200, %cst_132 {dimension_numbers = #tpu.dot_dimension_numbers<[1], [0], [0], [1], [0, 0, 1, 1], [], []>} : vector<16x128xbf16>, vector<128x128xbf16>, vector<16x128xf32> -> vector<16x128xf32>
    %203 = arith.addf %197, %202 : vector<16x128xf32>
    %c0_133 = arith.constant 0 : index
    %c0_134 = arith.constant 0 : index
    %204 = vector.load %arg21[%c0_133, %c0_134] : memref<1x128xf32, #tpu.memory_space<vmem>>, vector<1x128xf32>
    %205 = vector.broadcast %204 : vector<1x128xf32> to vector<16x128xf32>
    %206 = arith.addf %203, %205 : vector<16x128xf32>
    %c0_135 = arith.constant 0 : index
    %c0_136 = arith.constant 0 : index
    %207 = vector.load %arg22[%c0_135, %c0_136] : memref<16x128xf32, #tpu.memory_space<vmem>>, vector<16x128xf32>
    tpu.vector_store %arg22[%c0_135, %c0_136], %206 {strides = array<i32>} : memref<16x128xf32, #tpu.memory_space<vmem>>, vector<16x128xf32>,
    return
  }
  func.func @transform_0(%arg0: i32) -> (i32, i32) {
    %c0_i32 = arith.constant 0 : i32
    %c0_i32_0 = arith.constant 0 : i32
    return %arg0, %c0_i32 : i32, i32
  }
  func.func @transform_1(%arg0: i32) -> (i32, i32) {
    %c0_i32 = arith.constant 0 : i32
    %c0_i32_0 = arith.constant 0 : i32
    %c0_i32_1 = arith.constant 0 : i32
    return %c0_i32, %c0_i32_0 : i32, i32
  }
  func.func @transform_2(%arg0: i32) -> (i32, i32) {
    %c0_i32 = arith.constant 0 : i32
    %c0_i32_0 = arith.constant 0 : i32
    %c0_i32_1 = arith.constant 0 : i32
    return %c0_i32, %c0_i32_0 : i32, i32
  }
  func.func @transform_3(%arg0: i32) -> (i32, i32, i32) {
    %c0_i32 = arith.constant 0 : i32
    %c0_i32_0 = arith.constant 0 : i32
    %c0_i32_1 = arith.constant 0 : i32
    %c0_i32_2 = arith.constant 0 : i32
    return %c0_i32, %c0_i32_0, %c0_i32_1 : i32, i32, i32
  }
  func.func @transform_4(%arg0: i32) -> (i32, i32) {
    %c0_i32 = arith.constant 0 : i32
    %c0_i32_0 = arith.constant 0 : i32
    %c0_i32_1 = arith.constant 0 : i32
    return %c0_i32, %c0_i32_0 : i32, i32
  }
  func.func @transform_5(%arg0: i32) -> (i32, i32) {
    %c0_i32 = arith.constant 0 : i32
    %c0_i32_0 = arith.constant 0 : i32
    %c0_i32_1 = arith.constant 0 : i32
    return %c0_i32, %c0_i32_0 : i32, i32
  }
  func.func @transform_6(%arg0: i32) -> (i32, i32) {
    %c0_i32 = arith.constant 0 : i32
    %c0_i32_0 = arith.constant 0 : i32
    %c0_i32_1 = arith.constant 0 : i32
    return %c0_i32, %c0_i32_0 : i32, i32
  }
  func.func @transform_7(%arg0: i32) -> (i32, i32) {
    %c0_i32 = arith.constant 0 : i32
    %c0_i32_0 = arith.constant 0 : i32
    %c0_i32_1 = arith.constant 0 : i32
    return %c0_i32, %c0_i32_0 : i32, i32
  }
  func.func @transform_8(%arg0: i32) -> (i32, i32) {
    %c0_i32 = arith.constant 0 : i32
    %c0_i32_0 = arith.constant 0 : i32
    %c0_i32_1 = arith.constant 0 : i32
    return %c0_i32, %c0_i32_0 : i32, i32
  }
  func.func @transform_9(%arg0: i32) -> (i32, i32) {
    %c0_i32 = arith.constant 0 : i32
    %c0_i32_0 = arith.constant 0 : i32
    %c0_i32_1 = arith.constant 0 : i32
    return %c0_i32, %c0_i32_0 : i32, i32
  }
  func.func @transform_10(%arg0: i32) -> (i32, i32) {
    %c0_i32 = arith.constant 0 : i32
    %c0_i32_0 = arith.constant 0 : i32
    %c0_i32_1 = arith.constant 0 : i32
    return %c0_i32, %c0_i32_0 : i32, i32
  }
  func.func @transform_11(%arg0: i32) -> (i32, i32) {
    %c0_i32 = arith.constant 0 : i32
    %c0_i32_0 = arith.constant 0 : i32
    %c0_i32_1 = arith.constant 0 : i32
    return %c0_i32, %c0_i32_0 : i32, i32
  }
  func.func @transform_12(%arg0: i32) -> (i32, i32) {
    %c0_i32 = arith.constant 0 : i32
    %c0_i32_0 = arith.constant 0 : i32
    %c0_i32_1 = arith.constant 0 : i32
    return %c0_i32, %c0_i32_0 : i32, i32
  }
  func.func @transform_13(%arg0: i32) -> (i32, i32) {
    %c0_i32 = arith.constant 0 : i32
    %c0_i32_0 = arith.constant 0 : i32
    %c0_i32_1 = arith.constant 0 : i32
    return %c0_i32, %c0_i32_0 : i32, i32
  }
  func.func @transform_14(%arg0: i32) -> (i32, i32) {
    %c0_i32 = arith.constant 0 : i32
    %c0_i32_0 = arith.constant 0 : i32
    %c0_i32_1 = arith.constant 0 : i32
    return %c0_i32, %c0_i32_0 : i32, i32
  }
  func.func @transform_15(%arg0: i32) -> (i32, i32, i32) {
    %c0_i32 = arith.constant 0 : i32
    %c0_i32_0 = arith.constant 0 : i32
    %c0_i32_1 = arith.constant 0 : i32
    %c0_i32_2 = arith.constant 0 : i32
    return %c0_i32, %c0_i32_0, %c0_i32_1 : i32, i32, i32
  }
  func.func @transform_16(%arg0: i32) -> (i32, i32) {
    %c0_i32 = arith.constant 0 : i32
    %c0_i32_0 = arith.constant 0 : i32
    %c0_i32_1 = arith.constant 0 : i32
    return %c0_i32, %c0_i32_0 : i32, i32
  }
  func.func @transform_17(%arg0: i32) -> (i32, i32, i32) {
    %c0_i32 = arith.constant 0 : i32
    %c0_i32_0 = arith.constant 0 : i32
    %c0_i32_1 = arith.constant 0 : i32
    %c0_i32_2 = arith.constant 0 : i32
    return %c0_i32, %c0_i32_0, %c0_i32_1 : i32, i32, i32
  }
  func.func @transform_18(%arg0: i32) -> (i32, i32) {
    %c0_i32 = arith.constant 0 : i32
    %c0_i32_0 = arith.constant 0 : i32
    %c0_i32_1 = arith.constant 0 : i32
    return %c0_i32, %c0_i32_0 : i32, i32
  }
  func.func @transform_19(%arg0: i32) -> (i32, i32, i32) {
    %c0_i32 = arith.constant 0 : i32
    %c0_i32_0 = arith.constant 0 : i32
    %c0_i32_1 = arith.constant 0 : i32
    %c0_i32_2 = arith.constant 0 : i32
    return %c0_i32, %c0_i32_0, %c0_i32_1 : i32, i32, i32
  }
  func.func @transform_20(%arg0: i32) -> (i32, i32) {
    %c0_i32 = arith.constant 0 : i32
    %c0_i32_0 = arith.constant 0 : i32
    %c0_i32_1 = arith.constant 0 : i32
    return %c0_i32, %c0_i32_0 : i32, i32
  }
  func.func @transform_21(%arg0: i32) -> (i32, i32) {
    %c0_i32 = arith.constant 0 : i32
    %c0_i32_0 = arith.constant 0 : i32
    return %arg0, %c0_i32 : i32, i32
  }
}

</mosaic_0001>

<bundles_post_ra>
// kernel: mnist_resnet_forward.1
= control target key start
LH: loop header
LB: loop body
LE: loop exit
PB: predicated region body
PF: predicated region fallthrough
CT: control target
= control target key end

     0   :  { %s7485_s0 = inlined_call_operand.vmem [shape: bf16[32,56], index: 0, kind: input, shape index: {}]   ;;  %s7486_s1 = inlined_call_operand.hbm [shape: bf16[56,384], index: 1, kind: input, shape index: {}]   ;;  %s7487_s2 = inlined_call_operand.hbm [shape: f32[3,384], index: 2, kind: input, shape index: {}]   ;;  %s7488_s3 = inlined_call_operand.hbm [shape: bf16[4,384,128], index: 3, kind: input, shape index: {}]   ;;  %s7489_s4 = inlined_call_operand.hbm [shape: bf16[16,32], index: 4, kind: input, shape index: {}]   ;;  %s7490_s5 = inlined_call_operand.hbm [shape: f32[3,128], index: 5, kind: input, shape index: {}]   ;;  %s7491_s6 = inlined_call_operand.vmem [shape: bf16[384,128], index: 6, kind: input, shape index: {}]   ;;  %s7492_s7 = inlined_call_operand.hbm [shape: bf16[384,128], index: 7, kind: input, shape index: {}]   ;;  %s7493_s8 = inlined_call_operand.hbm [shape: f32[2,128], index: 8, kind: input, shape index: {}]   ;;  %s7494_s9 = inlined_call_operand.hbm [shape: bf16[384,128], index: 9, kind: input, shape index: {}]   ;;  %s7495_s10 = inlined_call_operand.hbm [shape: bf16[384,128], index: 10, kind: input, shape index: {}]   ;;  %s7496_s11 = inlined_call_operand.hbm [shape: f32[2,128], index: 11, kind: input, shape index: {}]   ;;  %s7497_s12 = inlined_call_operand.hbm [shape: bf16[384,128], index: 12, kind: input, shape index: {}]   ;;  %s7498_s13 = inlined_call_operand.hbm [shape: bf16[384,128], index: 13, kind: input, shape index: {}]   ;;  %s7499_s14 = inlined_call_operand.hbm [shape: f32[2,128], index: 14, kind: input, shape index: {}]   ;;  %s7500_s15 = inlined_call_operand.vmem [shape: bf16[2,128,128], index: 15, kind: input, shape index: {}]   ;;  %s7501_s16 = inlined_call_operand.vmem [shape: f32[2,128], index: 16, kind: input, shape index: {}]   ;;  %s7502_s17 = inlined_call_operand.hbm [shape: bf16[3,128,128], index: 17, kind: input, shape index: {}]   ;;  %s7503_s18 = inlined_call_operand.vmem [shape: f32[3,128], index: 18, kind: input, shape index: {}]   ;;  %s7504_s19 = inlined_call_operand.hbm [shape: bf16[2,128,128], index: 19, kind: input, shape index: {}]   ;;  %s7505_s20 = inlined_call_operand.vmem [shape: f32[1,128], index: 20, kind: input, shape index: {}]   ;;  %s7506_s21 = inlined_call_operand.vmem [shape: f32[16,128], index: 21, kind: output, shape index: {}]  }
   0x1   :  { %7514 = sst [smem:[#allocation33_spill]] %s7485_s0 }
   0x2   :  { %7515 = sst [smem:[#allocation34_spill]] %s7486_s1 }
   0x3   :  { %7516 = sst [smem:[#allocation35_spill]] %s7487_s2 }
   0x4   :  { %7517 = sst [smem:[#allocation36_spill]] %s7488_s3 }
   0x5   :  { %7518 = sst [smem:[#allocation37_spill]] %s7489_s4 }
   0x6   :  { %7519 = sst [smem:[#allocation38_spill]] %s7490_s5 }
   0x7   :  { %7520 = sst [smem:[#allocation39_spill]] %s7506_s21 }
   0x8   :  { %26 = vsyncpa [#allocation3], 0 }
   0x9   :  { %27 = vsyncpa [#allocation5], 0 }
   0xa   :  { %28 = vsyncpa [#allocation8], 0 }
   0xb   :  { %29 = vsyncpa [#allocation11], 0 }
   0xc   :  { %30 = vsyncpa [#allocation14], 0 }
   0xd   :  { %31 = vsyncpa [#allocation17], 0 }
   0xe   :  { %32 = vsyncpa [#allocation20], 0 }
   0xf   :  { %33 = vsyncpa [#allocation23], 0  ;;  %s6384_s2 = smov [#allocation4]   ;;  %s7521_s3 = sld [smem:[#allocation35_spill]] }
  0x10   :  { %s54_s25 = sshll.u32 %s6384_s2, 4  ;;  %s55_s25 = int_to_ptr.vmem [resolvable:$true] %s54_s25 }
  0x15   :  { %s6038_s28 = scalar_lea.hbm %s7521_s3, 192 }
  0x16   :  { %p6039_p0 = scmp.ne.s32.totalorder %s7521_s3, %s6038_s28  ;;  %p6042_p1 = scmp.lt.u32.totalorder %s6038_s28, %s7521_s3 }
  0x18   :  { %p6044_p2 = pnand %p6042_p1, %p6039_p0 }
  0x1a   :  { %6047 = shalt.err (!%p6044_p2)
}
  0x1b   :  { %s6048_s5 = scalar_lea.vmem %s55_s25, 192  ;;  %p6053_p4 = scmp.lt.s32.totalorder %s55_s25, %s55_s25 }
  0x1c   :  { %p6049_p3 = scmp.ne.s32.totalorder %s55_s25, %s6048_s5  ;;  %p6054_p5 = scmp.lt.s32.totalorder %s6048_s5, %s6048_s5 }
  0x1e   :  { %p6055_p6 = por %p6054_p5, %p6053_p4 }
  0x20   :  { %p6056_p7 = pnand %p6055_p6, %p6049_p3 }
  0x22   :  { %6059 = shalt.err (!%p6056_p7)
}
  0x23   :  { %57 = dma.hbm_to_vmem [thread:$0]  %s7521_s3, 192, %s55_s25, [#allocation5]  }
  0x24   :  { %s6385_s1 = smov [#allocation7]   ;;  %s6386_s2 = smov [#allocation10]  }
  0x25   :  { %s75_s24 = sshll.u32 %s6385_s1, 4  ;;  %s99_s26 = sshll.u32 %s6386_s2, 4  ;;  %s76_s24 = int_to_ptr.vmem [resolvable:$true] %s75_s24  ;;  %s100_s26 = int_to_ptr.vmem [resolvable:$true] %s99_s26 }
  0x26   :  { %s7522_s29 = sld [smem:[#allocation37_spill]] }
  0x2c   :  { %s6060_s0 = scalar_lea.hbm %s7522_s29, 128 }
  0x2d   :  { %p6061_p8 = scmp.ne.s32.totalorder %s7522_s29, %s6060_s0  ;;  %p6064_p9 = scmp.lt.u32.totalorder %s6060_s0, %s7522_s29 }
  0x2f   :  { %p6066_p10 = pnand %p6064_p9, %p6061_p8 }
  0x31   :  { %6069 = shalt.err (!%p6066_p10)
}
  0x32   :  { %s6070_s25 = scalar_lea.vmem %s76_s24, 128  ;;  %p6075_p12 = scmp.lt.s32.totalorder %s76_s24, %s76_s24 }
  0x33   :  { %p6071_p11 = scmp.ne.s32.totalorder %s76_s24, %s6070_s25  ;;  %p6076_p13 = scmp.lt.s32.totalorder %s6070_s25, %s6070_s25 }
  0x35   :  { %p6077_p0 = por %p6076_p13, %p6075_p12 }
  0x37   :  { %p6078_p1 = pnand %p6077_p0, %p6071_p11 }
  0x39   :  { %6081 = shalt.err (!%p6078_p1)
}
  0x3a   :  { %s6387_s3 = smov 64   ;;  %s6388_s22 = smov 4  }
  0x3b   :  { %81 = dma.hbm_to_vmem [thread:$0]  %s7522_s29, 128, %s76_s24, [#allocation8], %s6387_s3, %s6387_s3, %s6388_s22  }
  0x3c   :  { %s6082_s27 = scalar_lea.hbm %s7492_s7, 3072 }
  0x3d   :  { %p6083_p2 = scmp.ne.s32.totalorder %s7492_s7, %s6082_s27  ;;  %p6086_p3 = scmp.lt.u32.totalorder %s6082_s27, %s7492_s7 }
  0x3f   :  { %p6088_p4 = pnand %p6086_p3, %p6083_p2 }
  0x41   :  { %6091 = shalt.err (!%p6088_p4)
}
  0x42   :  { %s6092_s5 = scalar_lea.vmem %s100_s26, 3072  ;;  %p6097_p6 = scmp.lt.s32.totalorder %s100_s26, %s100_s26 }
  0x43   :  { %p6093_p5 = scmp.ne.s32.totalorder %s100_s26, %s6092_s5  ;;  %p6098_p7 = scmp.lt.s32.totalorder %s6092_s5, %s6092_s5 }
  0x45   :  { %p6099_p8 = por %p6098_p7, %p6097_p6 }
  0x47   :  { %p6100_p9 = pnand %p6099_p8, %p6093_p5 }
  0x49   :  { %6103 = shalt.err (!%p6100_p9)
}
  0x4a   :  { %105 = dma.hbm_to_vmem [thread:$0]  %s7492_s7, 3072, %s100_s26, [#allocation11], %s6387_s3, %s6387_s3, %s6388_s22  }
  0x4b   :  { %s6389_s25 = smov [#allocation13]   ;;  %s6390_s1 = smov [#allocation16]  }
  0x4c   :  { %s121_s23 = sshll.u32 %s6389_s25, 4  ;;  %s146_s21 = sshll.u32 %s6390_s1, 4  ;;  %s122_s23 = int_to_ptr.vmem [resolvable:$true] %s121_s23  ;;  %s147_s21 = int_to_ptr.vmem [resolvable:$true] %s146_s21 }
  0x4d   :  { %s6104_s28 = scalar_lea.hbm %s7494_s9, 3072 }
  0x4e   :  { %p6105_p10 = scmp.ne.s32.totalorder %s7494_s9, %s6104_s28  ;;  %p6108_p11 = scmp.lt.u32.totalorder %s6104_s28, %s7494_s9 }
  0x50   :  { %p6110_p12 = pnand %p6108_p11, %p6105_p10 }
  0x52   :  { %6113 = shalt.err (!%p6110_p12)
}
  0x53   :  { %s6114_s7 = scalar_lea.vmem %s122_s23, 3072  ;;  %p6119_p0 = scmp.lt.s32.totalorder %s122_s23, %s122_s23 }
  0x54   :  { %p6115_p13 = scmp.ne.s32.totalorder %s122_s23, %s6114_s7  ;;  %p6120_p1 = scmp.lt.s32.totalorder %s6114_s7, %s6114_s7 }
  0x56   :  { %p6121_p2 = por %p6120_p1, %p6119_p0 }
  0x58   :  { %p6122_p3 = pnand %p6121_p2, %p6115_p13 }
  0x5a   :  { %6125 = shalt.err (!%p6122_p3)
}
  0x5b   :  { %127 = dma.hbm_to_vmem [thread:$0]  %s7494_s9, 3072, %s122_s23, [#allocation14], %s6387_s3, %s6387_s3, %s6388_s22  }
  0x5c   :  { %s6126_s1 = scalar_lea.hbm %s7496_s11, 32 }
  0x5d   :  { %p6127_p4 = scmp.ne.s32.totalorder %s7496_s11, %s6126_s1  ;;  %p6130_p5 = scmp.lt.u32.totalorder %s6126_s1, %s7496_s11 }
  0x5f   :  { %p6132_p6 = pnand %p6130_p5, %p6127_p4 }
  0x61   :  { %6135 = shalt.err (!%p6132_p6)
}
  0x62   :  { %s6136_s4 = scalar_lea.vmem %s147_s21, 32  ;;  %p6141_p8 = scmp.lt.s32.totalorder %s147_s21, %s147_s21 }
  0x63   :  { %p6137_p7 = scmp.ne.s32.totalorder %s147_s21, %s6136_s4  ;;  %p6142_p9 = scmp.lt.s32.totalorder %s6136_s4, %s6136_s4 }
  0x65   :  { %p6143_p10 = por %p6142_p9, %p6141_p8 }
  0x67   :  { %p6144_p11 = pnand %p6143_p10, %p6137_p7 }
  0x69   :  { %6147 = shalt.err (!%p6144_p11)
}
  0x6a   :  { %149 = dma.hbm_to_vmem [thread:$0]  %s7496_s11, 32, %s147_s21, [#allocation17]  }
  0x6b   :  { %s6391_s30 = smov [#allocation19]   ;;  %s6392_s7 = smov [#allocation22]  }
  0x6c   :  { %s167_s5 = sshll.u32 %s6391_s30, 4  ;;  %s193_s26 = sshll.u32 %s6392_s7, 4  ;;  %s168_s5 = int_to_ptr.vmem [resolvable:$true] %s167_s5  ;;  %s194_s26 = int_to_ptr.vmem [resolvable:$true] %s193_s26 }
  0x6d   :  { %s6148_s25 = scalar_lea.hbm %s7498_s13, 3072 }
  0x6e   :  { %p6149_p12 = scmp.ne.s32.totalorder %s7498_s13, %s6148_s25  ;;  %p6152_p13 = scmp.lt.u32.totalorder %s6148_s25, %s7498_s13 }
  0x70   :  { %p6154_p0 = pnand %p6152_p13, %p6149_p12 }
  0x72   :  { %6157 = shalt.err (!%p6154_p0)
}
  0x73   :  { %s6158_s11 = scalar_lea.vmem %s168_s5, 3072  ;;  %p6163_p2 = scmp.lt.s32.totalorder %s168_s5, %s168_s5 }
  0x74   :  { %p6159_p1 = scmp.ne.s32.totalorder %s168_s5, %s6158_s11  ;;  %p6164_p3 = scmp.lt.s32.totalorder %s6158_s11, %s6158_s11 }
  0x76   :  { %p6165_p4 = por %p6164_p3, %p6163_p2 }
  0x78   :  { %p6166_p5 = pnand %p6165_p4, %p6159_p1 }
  0x7a   :  { %6169 = shalt.err (!%p6166_p5)
}
  0x7b   :  { %173 = dma.hbm_to_vmem [thread:$0]  %s7498_s13, 3072, %s168_s5, [#allocation20], %s6387_s3, %s6387_s3, %s6388_s22  }
  0x7c   :  { %s6170_s23 = scalar_lea.hbm %s7502_s17, 3072 }
  0x7d   :  { %p6171_p6 = scmp.ne.s32.totalorder %s7502_s17, %s6170_s23  ;;  %p6174_p7 = scmp.lt.u32.totalorder %s6170_s23, %s7502_s17 }
  0x7f   :  { %p6176_p8 = pnand %p6174_p7, %p6171_p6 }
  0x81   :  { %6179 = shalt.err (!%p6176_p8)
}
  0x82   :  { %s6180_s25 = scalar_lea.vmem %s194_s26, 3072  ;;  %p6185_p10 = scmp.lt.s32.totalorder %s194_s26, %s194_s26 }
  0x83   :  { %p6181_p9 = scmp.ne.s32.totalorder %s194_s26, %s6180_s25  ;;  %p6186_p11 = scmp.lt.s32.totalorder %s6180_s25, %s6180_s25 }
  0x85   :  { %p6187_p12 = por %p6186_p11, %p6185_p10 }
  0x87   :  { %p6188_p13 = pnand %p6187_p12, %p6181_p9 }
  0x89   :  { %6191 = shalt.err (!%p6188_p13)
}
  0x8a   :  { %199 = dma.hbm_to_vmem [thread:$0]  %s7502_s17, 3072, %s194_s26, [#allocation23], %s6387_s3, %s6387_s3, %s6388_s22  }
  0x8b   :  { %s6393_s1 = smov [#allocation2]   ;;  %s7523_s11 = sld [smem:[#allocation34_spill]] }
  0x8c   :  { %s41_s2 = sshll.u32 %s6393_s1, 4  ;;  %s42_s2 = int_to_ptr.vmem [resolvable:$true] %s41_s2 }
  0x91   :  { %s6192_s21 = scalar_lea.hbm %s7523_s11, 1344 }
  0x92   :  { %p6193_p0 = scmp.ne.s32.totalorder %s7523_s11, %s6192_s21  ;;  %p6196_p1 = scmp.lt.u32.totalorder %s6192_s21, %s7523_s11 }
  0x94   :  { %p6198_p2 = pnand %p6196_p1, %p6193_p0 }
  0x96   :  { %6201 = shalt.err (!%p6198_p2)
}
  0x97   :  { %s6202_s30 = scalar_lea.vmem %s42_s2, 1344  ;;  %p6207_p4 = scmp.lt.s32.totalorder %s42_s2, %s42_s2 }
  0x98   :  { %p6203_p3 = scmp.ne.s32.totalorder %s42_s2, %s6202_s30  ;;  %p6208_p5 = scmp.lt.s32.totalorder %s6202_s30, %s6202_s30 }
  0x9a   :  { %p6209_p6 = por %p6208_p5, %p6207_p4 }
  0x9c   :  { %p6210_p7 = pnand %p6209_p6, %p6203_p3 }
  0x9e   :  { %6213 = shalt.err (!%p6210_p7)
}
  0x9f   :  { %s6394_s17 = smov 192   ;;  %s6395_s26 = smov 12  }
  0xa0   :  { %47 = dma.hbm_to_vmem [thread:$0]  %s7523_s11, 1344, %s42_s2, [#allocation3], %s6394_s17, %s6394_s17, %s6395_s26  }
  0xa1   :  { %s6396_s29 = smov [#allocation6]   ;;  %s6397_s13 = smov [#allocation9]  }
  0xa2   :  { %s63_s25 = sshll.u32 %s6396_s29, 4  ;;  %s88_s5 = sshll.u32 %s6397_s13, 4  ;;  %s64_s25 = int_to_ptr.vmem [resolvable:$true] %s63_s25  ;;  %s89_s5 = int_to_ptr.vmem [resolvable:$true] %s88_s5 }
  0xa3   :  { %s7524_s28 = sld [smem:[#allocation36_spill]] }
  0xa9   :  { %s6214_s21 = scalar_lea.hbm %s7524_s28, 12288 }
  0xaa   :  { %p6215_p8 = scmp.ne.s32.totalorder %s7524_s28, %s6214_s21  ;;  %p6218_p9 = scmp.lt.u32.totalorder %s6214_s21, %s7524_s28 }
  0xac   :  { %p6220_p10 = pnand %p6218_p9, %p6215_p8 }
  0xae   :  { %6223 = shalt.err (!%p6220_p10)
}
  0xaf   :  { %s6224_s2 = scalar_lea.vmem %s64_s25, 12288  ;;  %p6229_p12 = scmp.lt.s32.totalorder %s64_s25, %s64_s25 }
  0xb0   :  { %p6225_p11 = scmp.ne.s32.totalorder %s64_s25, %s6224_s2  ;;  %p6230_p13 = scmp.lt.s32.totalorder %s6224_s2, %s6224_s2 }
  0xb2   :  { %p6231_p0 = por %p6230_p13, %p6229_p12 }
  0xb4   :  { %p6232_p1 = pnand %p6231_p0, %p6225_p11 }
  0xb6   :  { %6235 = shalt.err (!%p6232_p1)
}
  0xb7   :  { %69 = dma.hbm_to_vmem [thread:$0]  %s7524_s28, 12288, %s64_s25, [#allocation5], %s6387_s3, %s6387_s3, %s6388_s22  }
  0xb8   :  { %s7525_s7 = sld [smem:[#allocation38_spill]] }
  0xbe   :  { %s6236_s24 = scalar_lea.hbm %s7525_s7, 64 }
  0xbf   :  { %p6237_p2 = scmp.ne.s32.totalorder %s7525_s7, %s6236_s24  ;;  %p6240_p3 = scmp.lt.u32.totalorder %s6236_s24, %s7525_s7 }
  0xc1   :  { %p6242_p4 = pnand %p6240_p3, %p6237_p2 }
  0xc3   :  { %6245 = shalt.err (!%p6242_p4)
}
  0xc4   :  { %s6246_s21 = scalar_lea.vmem %s89_s5, 64  ;;  %p6251_p6 = scmp.lt.s32.totalorder %s89_s5, %s89_s5 }
  0xc5   :  { %p6247_p5 = scmp.ne.s32.totalorder %s89_s5, %s6246_s21  ;;  %p6252_p7 = scmp.lt.s32.totalorder %s6246_s21, %s6246_s21 }
  0xc7   :  { %p6253_p8 = por %p6252_p7, %p6251_p6 }
  0xc9   :  { %p6254_p9 = pnand %p6253_p8, %p6247_p5 }
  0xcb   :  { %6257 = shalt.err (!%p6254_p9)
}
  0xcc   :  { %91 = dma.hbm_to_vmem [thread:$0]  %s7525_s7, 64, %s89_s5, [#allocation8]  }
  0xcd   :  { %s6398_s0 = smov [#allocation12]   ;;  %s6399_s9 = smov [#allocation15]  }
  0xce   :  { %s112_s4 = sshll.u32 %s6398_s0, 4  ;;  %s133_s23 = sshll.u32 %s6399_s9, 4  ;;  %s113_s4 = int_to_ptr.vmem [resolvable:$true] %s112_s4  ;;  %s6654_s23 = int_to_ptr.vmem [resolvable:$true] %s133_s23 }
  0xcf   :  { %s6258_s30 = scalar_lea.hbm %s7493_s8, 32 }
  0xd0   :  { %p6259_p10 = scmp.ne.s32.totalorder %s7493_s8, %s6258_s30  ;;  %p6262_p11 = scmp.lt.u32.totalorder %s6258_s30, %s7493_s8 }
  0xd2   :  { %p6264_p12 = pnand %p6262_p11, %p6259_p10 }
  0xd4   :  { %6267 = shalt.err (!%p6264_p12)
}
  0xd5   :  { %s6268_s5 = scalar_lea.vmem %s113_s4, 32  ;;  %p6273_p0 = scmp.lt.s32.totalorder %s113_s4, %s113_s4 }
  0xd6   :  { %p6269_p13 = scmp.ne.s32.totalorder %s113_s4, %s6268_s5  ;;  %p6274_p1 = scmp.lt.s32.totalorder %s6268_s5, %s6268_s5 }
  0xd8   :  { %p6275_p2 = por %p6274_p1, %p6273_p0 }
  0xda   :  { %p6276_p3 = pnand %p6275_p2, %p6269_p13 }
  0xdc   :  { %6279 = shalt.err (!%p6276_p3)
}
  0xdd   :  { %115 = dma.hbm_to_vmem [thread:$0]  %s7493_s8, 32, %s113_s4, [#allocation11]  }
  0xde   :  { %s6280_s21 = scalar_lea.hbm %s7495_s10, 3072 }
  0xdf   :  { %p6281_p4 = scmp.ne.s32.totalorder %s7495_s10, %s6280_s21  ;;  %p6284_p5 = scmp.lt.u32.totalorder %s6280_s21, %s7495_s10 }
  0xe1   :  { %p6286_p6 = pnand %p6284_p5, %p6281_p4 }
  0xe3   :  { %6289 = shalt.err (!%p6286_p6)
}
  0xe4   :  { %s6290_s2 = scalar_lea.vmem %s6654_s23, 3072  ;;  %p6295_p8 = scmp.lt.s32.totalorder %s6654_s23, %s6654_s23 }
  0xe5   :  { %p6291_p7 = scmp.ne.s32.totalorder %s6654_s23, %s6290_s2  ;;  %p6296_p9 = scmp.lt.s32.totalorder %s6290_s2, %s6290_s2 }
  0xe7   :  { %p6297_p10 = por %p6296_p9, %p6295_p8 }
  0xe9   :  { %p6298_p11 = pnand %p6297_p10, %p6291_p7 }
  0xeb   :  { %6301 = shalt.err (!%p6298_p11)
}
  0xec   :  { %139 = dma.hbm_to_vmem [thread:$0]  %s7495_s10, 3072, %s6654_s23, [#allocation14], %s6387_s3, %s6387_s3, %s6388_s22  }
  0xed   :  { %s6400_s11 = smov [#allocation18]   ;;  %s6401_s17 = smov [#allocation21]  }
  0xee   :  { %s155_s30 = sshll.u32 %s6400_s11, 4  ;;  %s180_s26 = sshll.u32 %s6401_s17, 4  ;;  %s156_s30 = int_to_ptr.vmem [resolvable:$true] %s155_s30  ;;  %s181_s26 = int_to_ptr.vmem [resolvable:$true] %s180_s26 }
  0xef   :  { %s6302_s5 = scalar_lea.hbm %s7497_s12, 3072 }
  0xf0   :  { %p6303_p12 = scmp.ne.s32.totalorder %s7497_s12, %s6302_s5  ;;  %p6306_p13 = scmp.lt.u32.totalorder %s6302_s5, %s7497_s12 }
  0xf2   :  { %p6308_p0 = pnand %p6306_p13, %p6303_p12 }
  0xf4   :  { %6311 = shalt.err (!%p6308_p0)
}
  0xf5   :  { %s6312_s10 = scalar_lea.vmem %s156_s30, 3072  ;;  %p6317_p2 = scmp.lt.s32.totalorder %s156_s30, %s156_s30 }
  0xf6   :  { %p6313_p1 = scmp.ne.s32.totalorder %s156_s30, %s6312_s10  ;;  %p6318_p3 = scmp.lt.s32.totalorder %s6312_s10, %s6312_s10 }
  0xf8   :  { %p6319_p4 = por %p6318_p3, %p6317_p2 }
  0xfa   :  { %p6320_p5 = pnand %p6319_p4, %p6313_p1 }
  0xfc   :  { %6323 = shalt.err (!%p6320_p5)
}
  0xfd   :  { %161 = dma.hbm_to_vmem [thread:$0]  %s7497_s12, 3072, %s156_s30, [#allocation17], %s6387_s3, %s6387_s3, %s6388_s22  }
  0xfe   :  { %s6324_s0 = scalar_lea.hbm %s7499_s14, 32 }
  0xff   :  { %p6325_p6 = scmp.ne.s32.totalorder %s7499_s14, %s6324_s0  ;;  %p6328_p7 = scmp.lt.u32.totalorder %s6324_s0, %s7499_s14 }
 0x101   :  { %p6330_p8 = pnand %p6328_p7, %p6325_p6 }
 0x103   :  { %6333 = shalt.err (!%p6330_p8)
}
 0x104   :  { %s6334_s11 = scalar_lea.vmem %s181_s26, 32  ;;  %p6339_p10 = scmp.lt.s32.totalorder %s181_s26, %s181_s26 }
 0x105   :  { %p6335_p9 = scmp.ne.s32.totalorder %s181_s26, %s6334_s11  ;;  %p6340_p11 = scmp.lt.s32.totalorder %s6334_s11, %s6334_s11 }
 0x107   :  { %p6341_p12 = por %p6340_p11, %p6339_p10 }
 0x109   :  { %p6342_p13 = pnand %p6341_p12, %p6335_p9 }
 0x10b   :  { %6345 = shalt.err (!%p6342_p13)
}
 0x10c   :  { %183 = dma.hbm_to_vmem [thread:$0]  %s7499_s14, 32, %s181_s26, [#allocation20]  }
 0x10d   :  { %s6402_s17 = smov [#allocation24]   ;;  %s6346_s7 = scalar_lea.hbm %s7504_s19, 2048 }
 0x10e   :  { %s207_s24 = sshll.u32 %s6402_s17, 4  ;;  %p6347_p0 = scmp.ne.s32.totalorder %s7504_s19, %s6346_s7  ;;  %s208_s24 = int_to_ptr.vmem [resolvable:$true] %s207_s24 }
 0x10f   :  { %p6350_p1 = scmp.lt.u32.totalorder %s6346_s7, %s7504_s19 }
 0x111   :  { %p6352_p2 = pnand %p6350_p1, %p6347_p0 }
 0x113   :  { %6355 = shalt.err (!%p6352_p2)
}
 0x114   :  { %s6356_s23 = scalar_lea.vmem %s208_s24, 2048  ;;  %p6361_p4 = scmp.lt.s32.totalorder %s208_s24, %s208_s24 }
 0x115   :  { %p6357_p3 = scmp.ne.s32.totalorder %s208_s24, %s6356_s23  ;;  %p6362_p5 = scmp.lt.s32.totalorder %s6356_s23, %s6356_s23 }
 0x117   :  { %p6363_p6 = por %p6362_p5, %p6361_p4 }
 0x119   :  { %p6364_p7 = pnand %p6363_p6, %p6357_p3 }
 0x11b   :  { %6367 = shalt.err (!%p6364_p7)
}
 0x11c   :  { %213 = dma.hbm_to_vmem [thread:$0]  %s7504_s19, 2048, %s208_s24, [#allocation23], %s6387_s3, %s6387_s3, %s6388_s22  }
 0x11d   :  { %6368 = dma.done.wait [#allocation3], 1344  }
 0x11e   :  { %6369 = vsyncadd [#allocation3], 4294965952 }
 0x11f   :  { %6370 = dma.done.wait [#allocation5], 12480  }
 0x120   :  { %6371 = vsyncadd [#allocation5], 4294954816 }
 0x121   :  { %6372 = dma.done.wait [#allocation8], 192  }
 0x122   :  { %6373 = vsyncadd [#allocation8], 4294967104 }
 0x123   :  { %6374 = dma.done.wait [#allocation11], 3104  }
 0x124   :  { %6375 = vsyncadd [#allocation11], 4294964192 }
 0x125   :  { %6376 = dma.done.wait [#allocation14], 6144  }
 0x126   :  { %6377 = vsyncadd [#allocation14], 4294961152 }
 0x127   :  { %6378 = dma.done.wait [#allocation17], 3104  }
 0x128   :  { %6379 = vsyncadd [#allocation17], 4294964192 }
 0x129   :  { %6380 = dma.done.wait [#allocation20], 3104  }
 0x12a   :  { %6381 = vsyncadd [#allocation20], 4294964192 }
 0x12b   :  { %6382 = dma.done.wait [#allocation23], 5120  }
 0x12c   :  { %6383 = vsyncadd [#allocation23], 4294962176  ;;  %v6403_v0 = vmov 0   ;;  %v5724_v1 = vld [vmem:[#allocation2 + $0x4] ss:$12 sps:$4 sm:$0xff]   ;;  %v278_v6 = vld [vmem:[#allocation2 + $0x48] sm:$0xff]  ;;  %v282_v44 = vlaneseq }
 0x12d   :  { %412 = vmatprep.mubr.bf16.mxu1 %v6403_v0  ;;  %v5726_v2 = vld [vmem:[#allocation2] ss:$12 sps:$4 sm:$0xff]   ;;  %380 = vmatprep.subr.bf16.mxu1 %v5724_v1  ;;  %v5727_v3 = vld [vmem:[#allocation2 + $0x1c] ss:$12 sps:$4 sm:$0xff]   ;;  %v5729_v4 = vld [vmem:[#allocation2 + $0x18] ss:$12 sps:$4 sm:$0xff]   ;;  %v4531_v8 = vcombine.high %v278_v6, %v278_v6  ;;  %v4530_v9 = vcombine.low %v278_v6, %v278_v6 }
 0x12e   :  { %381 = vmatpush1.bf16.msra.mxu1 %v5726_v2  ;;  %v5730_v5 = vld [vmem:[#allocation2 + $0x34] ss:$12 sps:$4 sm:$0xff]   ;;  %v5732_v7 = vld [vmem:[#allocation2 + $0x30] ss:$12 sps:$4 sm:$0xff]   ;;  %vm370_vm0 = vcmask 1043456   ;;  %s7526_s22 = sld [smem:[#allocation33_spill]] }
 0x12f   :  { %382 = vmatprep.subr.bf16.mxu1 %v5727_v3  ;;  %v5740_v10 = vld [vmem:[#allocation2 + $0x50] ss:$0 sps:$4 sm:$0xff]   ;;  %v5736_v11 = vld [vmem:[#allocation2 + $0x8] ss:$12 sps:$4 sm:$0xff]   ;;  %v5741_v12 = vld [vmem:[#allocation6 + $0x100] sm:$0xff]   ;;  %v372_v14 = vsel %vm370_vm0, %v4530_v9, 0 }
 0x130   :  { %v5742_v13 = vld [vmem:[#allocation6 + $0xc0] sm:$0xff]   ;;  %4909 = vmatprep.subr.bf16.mxu0 %v5741_v12  ;;  %v5743_v16 = vld [vmem:[#allocation6 + $0x108] sm:$0xff]   ;;  %v5745_v18 = vld [vmem:[#allocation6 + $0x110] sm:$0xff]   ;;  %vm363_vm1 = vcmask 457728   ;;  %v378_v20 = vsel %vm370_vm0, %v5740_v10, 0  ;;  %v6747_v45 = vshrl.u32 %v282_v44, 7 }
 0x131   :  { %4910 = vmatpush3.bf16.msra.mxu0 %v5742_v13  ;;  %v5744_v17 = vld [vmem:[#allocation6 + $0xc8] sm:$0xff]   ;;  %v5739_v21 = vld [vmem:[#allocation2 + $0x38] ss:$12 sps:$4 sm:$0xff]   ;;  %v5746_v23 = vld [vmem:[#allocation6 + $0xd0] sm:$0xff]   ;;  %vm6405_vm5 = vmmov 0   ;;  %vm1840_vm6 = vcmask 261120  }
 0x132   :  { %383 = vmatpush1.bf16.msra.mxu1 %v5729_v4  ;;  %4911 = vmatprep.subr.bf16.mxu0 %v5743_v16  ;;  %v5737_v19 = vld [vmem:[#allocation2 + $0x20] ss:$12 sps:$4 sm:$0xff]   ;;  %v5748_v25 = vld [vmem:[#allocation6 + $0x118] sm:$0xff]   ;;  %v5753_v30 = vld [vmem:[#allocation6 + $0x150] sm:$0xff]   ;;  %v284_v47 = vsub.s32 0, %v6747_v45  ;;  %v288_v48 = vsub.s32 1, %v6747_v45 }
 0x133   :  { %384 = vmatprep.subr.bf16.mxu1 %v5730_v5  ;;  %v5747_v24 = vld [vmem:[#allocation6 + $0x140] sm:$0xff]   ;;  %v5749_v26 = vld [vmem:[#allocation6 + $0xd8] sm:$0xff]   ;;  %v5750_v27 = vld [vmem:[#allocation6 + $0x148] sm:$0xff]   ;;  %v292_v60 = vsub.s32 2, %v6747_v45  ;;  %vm622_vm2 = vcmp.lt.s32.totalorder %v6747_v45, 7  ;;  %vm1186_vm3 = vcmp.lt.s32.totalorder %v6747_v45, 6 }
 0x134   :  { %v5735_v15 = vld [vmem:[%s7526_s22] sm:$0xff]   ;;  %v5738_v22 = vld [vmem:[%s7526_s22 + $0x8] sm:$0xff]   ;;  %v5756_v33 = vld [vmem:[#allocation6 + $0x158] sm:$0xff]   ;;  %vm1512_vm4 = vcmp.lt.s32.totalorder %v6747_v45, 5  ;;  %vm1910_vm9 = vcmp.lt.s32.totalorder %v6747_v45, 1  ;;  %vm4144_vm14 = vcmp.lt.s32.totalorder %v6747_v45, 4 }
 0x135   :  { %4912 = vmatpush3.bf16.msra.mxu0 %v5744_v17  ;;  %v5751_v28 = vld [vmem:[#allocation6 + $0x120] sm:$0xff]   ;;  %v5754_v31 = vld [vmem:[#allocation6 + $0x128] sm:$0xff]   ;;  %v5757_v34 = vld [vmem:[#allocation6 + $0x130] sm:$0xff]   ;;  %s7531_s29 = sld [smem:[#allocation39_spill]] }
 0x136   :  { %385 = vmatpush1.bf16.msra.mxu1 %v5732_v7  ;;  %4913 = vmatprep.subr.bf16.mxu0 %v5745_v18  ;;  %v5752_v29 = vld [vmem:[#allocation6 + $0xe0] sm:$0xff]   ;;  %v5755_v32 = vld [vmem:[#allocation6 + $0xe8] sm:$0xff]   ;;  %v5758_v35 = vld [vmem:[#allocation6 + $0xf0] sm:$0xff]  }
 0x137   :  { %4533 = vmatprep.subr.msk.bf16.mxu1 %vm370_vm0, %v4531_v8  ;;  %v5759_v36 = vld [vmem:[#allocation6 + $0x160] sm:$0xff]   ;;  %v5760_v37 = vld [vmem:[#allocation6 + $0x138] sm:$0xff]   ;;  %v5762_v39 = vld [vmem:[#allocation6 + $0x168] sm:$0xff]  }
 0x138   :  { %v5761_v38 = vld [vmem:[#allocation6 + $0xf8] sm:$0xff]   ;;  %v5763_v40 = vld [vmem:[#allocation6 + $0x40] sm:$0xff]   ;;  %v5765_v41 = vld [vmem:[#allocation6 + $0x170] sm:$0xff]  }
 0x139   :  { %4914 = vmatpush3.bf16.msra.mxu0 %v5746_v23  ;;  %v5768_v42 = vld [vmem:[#allocation6 + $0x178] sm:$0xff]   ;;  %v6744_v43 = vld [vmem:[#allocation6 + $0x80] sm:$0xff]  }
 0x13a   :  { %387 = vmatpush1.bf16.msra.mxu1 %v372_v14  ;;  %4915 = vmatprep.subr.bf16.mxu0 %v5748_v25  ;;  %v280_v46 = vld [vmem:[#allocation4] ss:$4 sm:$0x7]  ;;  %v495_v49 = vld [vmem:[#allocation4 + $0x1] ss:$4 sm:$0x7] }
 0x13b   :  { %5313 = vmatprep.subr.bf16.mxu1 %v5736_v11  ;;  %v285_v50 = vrot.slane %v280_v46, %v284_v47  ;;  %v525_v51 = vld [vmem:[#allocation4 + $0x2] ss:$4 sm:$0x7]  ;;  %v289_v52 = vrot.slane %v280_v46, %v288_v48  ;;  %v500_v55 = vrot.slane %v495_v49, %v284_v47  ;;  %v504_v58 = vrot.slane %v495_v49, %v288_v48 }
 0x13c   :  { %v530_v62 = vrot.slane %v525_v51, %v284_v47  ;;  %v534_v2 = vrot.slane %v525_v51, %v288_v48 }
 0x13d   :  { %4534 = vmatmul.mubr.msk.bf16.vlgmr.msra.gmra.mrb[0].mxu1 %vm363_vm1, %v5735_v15  ;;  %4916 = vmatpush3.bf16.msra.mxu0 %v5749_v26 }
 0x13e   :  { %5314 = vmatpush3.bf16.msra.mxu1 %v5736_v11  ;;  %422 = vmatprep.mubr.bf16.mxu1 %v6403_v0  ;;  %v6755_v11 = vrot.slane %v495_v49, %v292_v60 }
 0x13f   :  { %5315 = vmatprep.subr.bf16.mxu1 %v5737_v19  ;;  %4917 = vmatprep.subr.bf16.mxu0 %v5751_v28 }
 0x141   :  { %4918 = vmatpush3.bf16.msra.mxu0 %v5752_v29 }
 0x142   :  { %5316 = vmatpush3.bf16.msra.mxu1 %v5737_v19  ;;  %4919 = vmatprep.subr.bf16.mxu0 %v5754_v31 }
 0x143   :  { %5317 = vmatprep.subr.bf16.mxu1 %v5739_v21 }
 0x145   :  { %4535 = vmatmul.mubr.msk.bf16.gmra.mrb[4].mxu1 %vm363_vm1, %v5738_v22  ;;  %4920 = vmatpush3.bf16.msra.mxu0 %v5755_v32 }
 0x146   :  { %5318 = vmatpush3.bf16.msra.mxu1 %v5739_v21  ;;  %5321 = vmatprep.mubr.msk.bf16.mxu1 %vm363_vm1, %v5735_v15  ;;  %v6759_v15 = vrot.slane %v525_v51, %v292_v60 }
 0x147   :  { %5701 = vmatprep.subr.msk.bf16.mxu1 %vm370_vm0, %v5740_v10  ;;  %4921 = vmatprep.subr.bf16.mxu0 %v5757_v34  ;;  %v293_v10 = vrot.slane %v280_v46, %v292_v60 }
 0x149   :  { %4922 = vmatpush3.bf16.msra.mxu0 %v5758_v35 }
 0x14a   :  { %5320 = vmatpush3.bf16.msra.mxu1 %v378_v20  ;;  %4923 = vmatprep.subr.bf16.mxu0 %v5760_v37 }
 0x14b   :  { %5325 = vmatprep.subr.bf16.mxu1 %v5747_v24 }
 0x14d   :  { %5322 = vmatmul.mubr.msk.bf16.vlgmr.msra.gmra.mrb[8].mxu1 %vm363_vm1, %v5738_v22  ;;  %4924 = vmatpush3.bf16.msra.mxu0 %v5761_v38 }
 0x14e   :  { %5326 = vmatpush3.bf16.msra.mxu1 %v5747_v24  ;;  %4947 = vmatprep.subr.bf16.mxu0 %v5763_v40 }
 0x14f   :  { %5327 = vmatprep.subr.bf16.mxu1 %v5750_v27 }
 0x152   :  { %5328 = vmatpush3.bf16.msra.mxu1 %v5750_v27 }
 0x153   :  { %5329 = vmatprep.subr.bf16.mxu1 %v5753_v30 }
 0x156   :  { %5330 = vmatpush3.bf16.msra.mxu1 %v5753_v30 }
 0x157   :  { %5331 = vmatprep.subr.bf16.mxu1 %v5756_v33 }
 0x15a   :  { %5332 = vmatpush3.bf16.msra.mxu1 %v5756_v33 }
 0x15b   :  { %5333 = vmatprep.subr.bf16.mxu1 %v5759_v36 }
 0x15e   :  { %5334 = vmatpush3.bf16.msra.mxu1 %v5759_v36 }
 0x15f   :  { %5335 = vmatprep.subr.bf16.mxu1 %v5762_v39 }
 0x162   :  { %5336 = vmatpush3.bf16.msra.mxu1 %v5762_v39 }
 0x163   :  { %5337 = vmatprep.subr.bf16.mxu1 %v5765_v41 }
 0x166   :  { %5338 = vmatpush3.bf16.msra.mxu1 %v5765_v41 }
 0x167   :  { %5339 = vmatprep.subr.bf16.mxu1 %v5768_v42 }
 0x16a   :  { %5340 = vmatpush3.bf16.msra.mxu1 %v5768_v42 }
 0x16b   :  { %5345 = vmatprep.subr.bf16.mxu1 %v6744_v43 }
 0x210   :  { %v414_v53 = vpop.f32.mrb[0].mxu1 }
 0x211   :  { %v415_v54 = vadd.f32 %v414_v53, %v285_v50  ;;  %v416_v56 = vpop.f32.mrb[1].mxu1 }
 0x212   :  { %v417_v57 = vadd.f32 %v416_v56, %v289_v52  ;;  %v418_v59 = vpop.f32.mrb[2].mxu1 }
 0x213   :  { %v482_v61 = vmax.f32 %v415_v54, 0.0  ;;  %v419_v63 = vadd.f32 %v418_v59, %v285_v50  ;;  %v420_v0 = vpop.f32.mrb[3].mxu1 }
 0x214   :  { %v483_v1 = vmax.f32 %v417_v57, 0.0  ;;  %v421_v3 = vadd.f32 %v420_v0, %v289_v52 }
 0x215   :  { %v512_v4 = vmul.f32 %v500_v55, %v482_v61  ;;  %v485_v5 = vmax.f32 %v419_v63, 0.0 }
 0x216   :  { %v513_v6 = vmul.f32 %v504_v58, %v483_v1  ;;  %v486_v7 = vmax.f32 %v421_v3, 0.0 }
 0x217   :  { %v6753_v8 = vadd.f32 %v530_v62, %v512_v4  ;;  %v515_v9 = vmul.f32 %v500_v55, %v485_v5 }
 0x218   :  { %v6757_v12 = vadd.f32 %v534_v2, %v513_v6  ;;  %v516_v13 = vmul.f32 %v504_v58, %v486_v7  ;;  %v424_v14 = vpop.f32.mrb[4].mxu1 }
 0x219   :  { %v1174_v16 = vrot.slane %v6753_v8, 2  ;;  %v1500_v17 = vrot.slane %v6753_v8, 3  ;;  %v6764_v18 = vadd.f32 %v530_v62, %v515_v9  ;;  %v425_v19 = vadd.f32 %v424_v14, %v285_v50  ;;  %v426_v20 = vpop.f32.mrb[5].mxu1 }
 0x21a   :  { %v6766_v21 = vadd.f32 %v534_v2, %v516_v13  ;;  %v427_v22 = vadd.f32 %v426_v20, %v289_v52  ;;  %v428_v23 = vpop.f32.mrb[6].mxu1  ;;  %v609_v24 = vrot.slane %v6757_v12, 1  ;;  %v608_v25 = vrot.slane %v6753_v8, 1 }
 0x21b   :  { %v1177_v26 = vrot.slane %v6764_v18, 2  ;;  %v1503_v27 = vrot.slane %v6764_v18, 3  ;;  %v488_v28 = vmax.f32 %v425_v19, 0.0  ;;  %v429_v29 = vadd.f32 %v428_v23, %v285_v50  ;;  %v430_v30 = vpop.f32.mrb[7].mxu1 }
 0x21c   :  { %v489_v31 = vmax.f32 %v427_v22, 0.0  ;;  %v431_v32 = vadd.f32 %v430_v30, %v289_v52  ;;  %v612_v33 = vrot.slane %v6766_v21, 1  ;;  %v611_v34 = vrot.slane %v6764_v18, 1  ;;  %v5764_v22 = vld [vmem:[#allocation6] sm:$0xff]   ;;  %v5766_v30 = vld [vmem:[#allocation6 + $0x48] sm:$0xff]  }
 0x21d   :  { %v518_v35 = vmul.f32 %v500_v55, %v488_v28  ;;  %v491_v36 = vmax.f32 %v429_v29, 0.0  ;;  %v603_v37 = vpack.c.bf16 %v6766_v21, %v6757_v12  ;;  %v602_v38 = vpack.c.bf16 %v6764_v18, %v6753_v8  ;;  %v5798_v8 = vld [vmem:[#allocation6 + $0x208] sm:$0xff]   ;;  %v5797_v18 = vld [vmem:[#allocation6 + $0x198] sm:$0xff]  }
 0x21e   :  { %v519_v39 = vmul.f32 %v504_v58, %v489_v31  ;;  %v492_v40 = vmax.f32 %v431_v32, 0.0  ;;  %v630_v41 = vsel %vm622_vm2, %v609_v24, %v612_v33  ;;  %v629_v42 = vsel %vm622_vm2, %v608_v25, %v611_v34 }
 0x21f   :  { %v6784_v44 = vadd.f32 %v530_v62, %v518_v35  ;;  %v521_v46 = vmul.f32 %v500_v55, %v491_v36  ;;  %v1175_v47 = vrot.slane %v6757_v12, 2  ;;  %v1178_v48 = vrot.slane %v6766_v21, 2 }
 0x220   :  { %v6788_v49 = vadd.f32 %v534_v2, %v519_v39  ;;  %v522_v50 = vmul.f32 %v504_v58, %v492_v40  ;;  %v5323_v51 = vpop.f32.mrb[8].mxu1  ;;  %v6796_v52 = vsel %vm1186_vm3, %v1174_v16, %v1177_v26  ;;  %v1501_v53 = vrot.slane %v6757_v12, 3 }
 0x221   :  { %v1180_v54 = vrot.slane %v6784_v44, 2  ;;  %v1506_v55 = vrot.slane %v6784_v44, 3  ;;  %v6801_v56 = vadd.f32 %v530_v62, %v521_v46  ;;  %v476_v57 = vadd.f32 %v5323_v51, %v293_v10  ;;  %v467_v59 = vpop.f32.mrb[9].mxu1  ;;  %v5769_v51 = vld [vmem:[#allocation6 + $0x50] sm:$0xff]  }
 0x222   :  { %v6803_v58 = vadd.f32 %v534_v2, %v522_v50  ;;  %v468_v60 = vadd.f32 %v467_v59, %v293_v10  ;;  %v5324_v61 = vpop.f32.mrb[10].mxu1  ;;  %v615_v63 = vrot.slane %v6788_v49, 1  ;;  %v614_v0 = vrot.slane %v6784_v44, 1 }
 0x223   :  { %v490_v1 = vmax.f32 %v476_v57, 0.0  ;;  %v479_v3 = vadd.f32 %v5324_v61, %v293_v10  ;;  %v470_v4 = vpop.f32.mrb[11].mxu1  ;;  %v617_v5 = vrot.slane %v6801_v56, 1  ;;  %v605_v6 = vpack.c.bf16 %v6801_v56, %v6784_v44  ;;  %v5801_v44 = vld [vmem:[#allocation6 + $0x210] sm:$0xff]  }
 0x224   :  { %v484_v62 = vmax.f32 %v468_v60, 0.0  ;;  %v471_v7 = vadd.f32 %v470_v4, %v293_v10  ;;  %v627_v2 = vsel %vm622_vm2, %v612_v33, %v615_v63  ;;  %v626_v9 = vsel %vm622_vm2, %v611_v34, %v614_v0 }
 0x225   :  { %v520_v13 = vmul.f32 %v6755_v11, %v490_v1  ;;  %v493_v14 = vmax.f32 %v479_v3, 0.0  ;;  %v685_v19 = vpack.c.bf16 %v627_v2, %v630_v41  ;;  %v684_v20 = vpack.c.bf16 %v626_v9, %v629_v42  ;;  %v5767_v42 = vld [vmem:[#allocation6 + $0x8] sm:$0xff]  }
 0x226   :  { %v514_v23 = vmul.f32 %v6755_v11, %v484_v62  ;;  %v487_v28 = vmax.f32 %v471_v7, 0.0  ;;  %v618_v29 = vrot.slane %v6803_v58, 1  ;;  %v623_v10 = vsel %vm622_vm2, %v614_v0, %v617_v5 }
 0x227   :  { %v6820_v31 = vadd.f32 %v6759_v15, %v520_v13  ;;  %v523_v32 = vmul.f32 %v6755_v11, %v493_v14  ;;  %866 = vmatprep.mubr.bf16.mxu0 %v685_v19  ;;  %v632_v33 = vsel %vm622_vm2, %v617_v5, %v608_v25  ;;  %v606_v34 = vpack.c.bf16 %v6803_v58, %v6788_v49  ;;  %v5770_v5 = vld [vmem:[#allocation6 + $0x10] sm:$0xff]  }
 0x228   :  { %v6828_v35 = vadd.f32 %v6759_v15, %v514_v23  ;;  %v517_v36 = vmul.f32 %v6755_v11, %v487_v28  ;;  %867 = vmatmul.mubr.bf16.vlgmr.msra.gmra.mrb[0].mxu0 %v684_v20  ;;  %v624_v39 = vsel %vm622_vm2, %v615_v63, %v618_v29  ;;  %v633_v40 = vsel %vm622_vm2, %v618_v29, %v609_v24  ;;  %v5774_v29 = vld [vmem:[#allocation6 + $0x88] sm:$0xff]  }
 0x229   :  { %v6839_v25 = vadd.f32 %v6759_v15, %v523_v32  ;;  %4948 = vmatpush3.bf16.msra.mxu0 %v5764_v22  ;;  %v688_v41 = vpack.c.bf16 %v633_v40, %v624_v39  ;;  %v687_v46 = vpack.c.bf16 %v632_v33, %v623_v10  ;;  %v616_v11 = vrot.slane %v6820_v31, 1  ;;  %v5772_v22 = vld [vmem:[#allocation6 + $0x58] sm:$0xff]  }
 0x22a   :  { %v6843_v50 = vadd.f32 %v6759_v15, %v517_v36  ;;  %4949 = vmatprep.subr.bf16.mxu0 %v5766_v30  ;;  %v610_v57 = vrot.slane %v6828_v35, 1  ;;  %v1181_v24 = vrot.slane %v6788_v49, 2  ;;  %v6853_v59 = vsel %vm1186_vm3, %v1175_v47, %v1178_v48  ;;  %v5773_v36 = vld [vmem:[#allocation6 + $0x18] sm:$0xff]  }
 0x22b   :  { %874 = vmatprep.mubr.bf16.mxu0 %v688_v41  ;;  %v619_v60 = vrot.slane %v6839_v25, 1  ;;  %v607_v15 = vpack.c.bf16 %v6839_v25, %v6820_v31  ;;  %v1176_v61 = vrot.slane %v6828_v35, 2  ;;  %v1182_v63 = vrot.slane %v6820_v31, 2 }
 0x22c   :  { %v613_v0 = vrot.slane %v6843_v50, 1  ;;  %v604_v1 = vpack.c.bf16 %v6843_v50, %v6828_v35  ;;  %v6867_v3 = vsel %vm1186_vm3, %v1178_v48, %v1181_v24  ;;  %v1179_v4 = vrot.slane %v6843_v50, 2 }
 0x22d   :  { %4950 = vmatpush3.bf16.msra.mxu0 %v5767_v42  ;;  %v625_v62 = vsel %vm622_vm2, %v616_v11, %v619_v60  ;;  %v634_v7 = vsel %vm622_vm2, %v619_v60, %v610_v57  ;;  %v1249_v2 = vpack.c.bf16 %v6867_v3, %v6853_v59  ;;  %v6882_v48 = vsel %vm1186_vm3, %v1177_v26, %v1180_v54  ;;  %v5808_v59 = vld [vmem:[#allocation6 + $0x1f8] sm:$0xff]  }
 0x22e   :  { %4951 = vmatprep.subr.bf16.mxu0 %v5769_v51  ;;  %v628_v9 = vsel %vm622_vm2, %v613_v0, %v616_v11  ;;  %v631_v13 = vsel %vm622_vm2, %v610_v57, %v613_v0  ;;  %v689_v14 = vpack.c.bf16 %v634_v7, %v625_v62  ;;  %v6890_v19 = vsel %vm1186_vm3, %v1179_v4, %v1182_v63  ;;  %v5776_v0 = vld [vmem:[#allocation6 + $0x20] sm:$0xff]   ;;  %v5809_v3 = vld [vmem:[#allocation6 + $0x1b8] sm:$0xff]  }
 0x22f   :  { %v686_v20 = vpack.c.bf16 %v628_v9, %v631_v13  ;;  %v6894_v23 = vsel %vm1186_vm3, %v1176_v61, %v1179_v4  ;;  %v1248_v26 = vpack.c.bf16 %v6882_v48, %v6796_v52  ;;  %v1184_v28 = vrot.slane %v6803_v58, 2  ;;  %v5822_v52 = vld [vmem:[#allocation6 + $0x2c8] sm:$0xff]   ;;  %v5821_v48 = vld [vmem:[#allocation6 + $0x258] sm:$0xff]  }
 0x230   :  { %875 = vmatmul.mubr.bf16.gmra.mrb[4].mxu0 %v687_v46  ;;  %v1250_v30 = vpack.c.bf16 %v6890_v19, %v6894_v23  ;;  %v1183_v10 = vrot.slane %v6801_v56, 2  ;;  %v1504_v32 = vrot.slane %v6766_v21, 3  ;;  %v1507_v33 = vrot.slane %v6788_v49, 3  ;;  %v5775_v46 = vld [vmem:[#allocation6 + $0x60] sm:$0xff]   ;;  %v5813_v19 = vld [vmem:[#allocation6 + $0x230] sm:$0xff]  }
 0x231   :  { %4952 = vmatpush3.bf16.msra.mxu0 %v5770_v5  ;;  %5341 = vmatprep.mubr.bf16.mxu1 %v686_v20  ;;  %v6906_v39 = vsel %vm1186_vm3, %v1181_v24, %v1184_v28  ;;  %v6912_v40 = vsel %vm1186_vm3, %v1184_v28, %v1175_v47  ;;  %v1185_v41 = vrot.slane %v6839_v25, 2  ;;  %v1502_v42 = vrot.slane %v6828_v35, 3  ;;  %v5780_v28 = vld [vmem:[#allocation6 + $0x98] sm:$0xff]   ;;  %v5800_v49 = vld [vmem:[#allocation6 + $0x1a0] sm:$0xff]  }
 0x232   :  { %1108 = vmatprep.mubr.bf16.mxu0 %v603_v37  ;;  %5342 = vmatmul.mubr.bf16.vlgmr.msra.gmra.mrb[12].mxu1 %v689_v14  ;;  %v1252_v11 = vpack.c.bf16 %v6912_v40, %v6906_v39  ;;  %v6925_v51 = vsel %vm1186_vm3, %v1180_v54, %v1183_v10  ;;  %v6931_v47 = vsel %vm1186_vm3, %v1183_v10, %v1174_v16  ;;  %v1505_v21 = vrot.slane %v6843_v50, 3  ;;  %v5777_v50 = vld [vmem:[#allocation6 + $0x90] sm:$0xff]   ;;  %v5779_v10 = vld [vmem:[#allocation6 + $0x28] sm:$0xff]   ;;  %v5812_v23 = vld [vmem:[#allocation6 + $0x240] sm:$0xff]  }
 0x233   :  { %5346 = vmatpush3.bf16.msra.mxu1 %v6744_v43  ;;  %4953 = vmatprep.subr.bf16.mxu0 %v5772_v22  ;;  %v1251_v37 = vpack.c.bf16 %v6931_v47, %v6925_v51  ;;  %v6939_v35 = vsel %vm1512_vm4, %v1504_v32, %v1507_v33  ;;  %v6945_v54 = vsel %vm1512_vm4, %v1501_v53, %v1504_v32  ;;  %v1508_v16 = vrot.slane %v6820_v31, 3  ;;  %v5805_v31 = vld [vmem:[#allocation6 + $0x1f0] sm:$0xff]   ;;  %v5824_v40 = vld [vmem:[#allocation6 + $0x260] sm:$0xff]   ;;  %v5828_v51 = vld [vmem:[#allocation6 + $0x2d8] sm:$0xff]  }
 0x234   :  { %5361 = vmatprep.mubr.bf16.mxu1 %v604_v1  ;;  %5347 = vmatprep.subr.bf16.mxu1 %v5774_v29  ;;  %v1575_v43 = vpack.c.bf16 %v6939_v35, %v6945_v54  ;;  %v6952_v57 = vsel %vm1186_vm3, %v1182_v63, %v1185_v41  ;;  %v6956_v24 = vsel %vm1186_vm3, %v1185_v41, %v1176_v61  ;;  %v1510_v60 = vrot.slane %v6803_v58, 3  ;;  %v5778_v63 = vld [vmem:[#allocation6 + $0x68] sm:$0xff]   ;;  %v5782_v41 = vld [vmem:[#allocation6 + $0x30] sm:$0xff]   ;;  %v5804_v58 = vld [vmem:[#allocation6 + $0x218] sm:$0xff]  }
 0x235   :  { %4954 = vmatpush3.bf16.msra.mxu0 %v5773_v36  ;;  %v1253_v1 = vpack.c.bf16 %v6956_v24, %v6952_v57  ;;  %v6963_v4 = vsel %vm1512_vm4, %v1505_v21, %v1508_v16  ;;  %v6967_v5 = vsel %vm1512_vm4, %v1502_v42, %v1505_v21  ;;  %v6975_v61 = vsel %vm1512_vm4, %v1503_v27, %v1506_v55  ;;  %v5786_v21 = vld [vmem:[#allocation6 + $0xa8] sm:$0xff]   ;;  %v5825_v39 = vld [vmem:[#allocation6 + $0x2d0] sm:$0xff]   ;;  %v5831_v35 = vld [vmem:[#allocation6 + $0x2e0] sm:$0xff]  }
 0x236   :  { %4955 = vmatprep.subr.bf16.mxu0 %v5775_v46  ;;  %v1576_v62 = vpack.c.bf16 %v6963_v4, %v6967_v5  ;;  %v6985_v7 = vsel %vm1512_vm4, %v1500_v17, %v1503_v27  ;;  %v6989_v9 = vsel %vm1512_vm4, %v1507_v33, %v1510_v60  ;;  %v6995_v13 = vsel %vm1512_vm4, %v1510_v60, %v1501_v53  ;;  %v5781_v33 = vld [vmem:[#allocation6 + $0x70] sm:$0xff]   ;;  %v5784_v46 = vld [vmem:[#allocation6 + $0x78] sm:$0xff]   ;;  %v5827_v47 = vld [vmem:[#allocation6 + $0x268] sm:$0xff]  }
 0x237   :  { %5348 = vmatpush3.bf16.msra.mxu1 %v5774_v29  ;;  %v1574_v14 = vpack.c.bf16 %v6975_v61, %v6985_v7  ;;  %v1578_v20 = vpack.c.bf16 %v6995_v13, %v6989_v9  ;;  %v1509_v27 = vrot.slane %v6801_v56, 3  ;;  %v1511_v22 = vrot.slane %v6839_v25, 3  ;;  %v5789_v60 = vld [vmem:[#allocation6 + $0xb0] sm:$0xff]   ;;  %v5802_v56 = vld [vmem:[#allocation6 + $0x1e8] sm:$0xff]   ;;  %v5833_v24 = vld [vmem:[#allocation6 + $0x278] sm:$0xff]  }
 0x238   :  { %5349 = vmatprep.subr.bf16.mxu1 %v5777_v50  ;;  %v5806_v25 = vld [vmem:[#allocation6 + $0x1b0] sm:$0xff]   ;;  %v5834_v57 = vld [vmem:[#allocation6 + $0x2e8] sm:$0xff]   ;;  %v5836_v4 = vld [vmem:[#allocation6 + $0x2f8] sm:$0xff]   ;;  %v6404_v5 = vmov 0.0  }
 0x239   :  { %4956 = vmatpush3.bf16.msra.mxu0 %v5776_v0  ;;  %v7007_v12 = vsel %vm1512_vm4, %v1506_v55, %v1509_v27  ;;  %v7013_v53 = vsel %vm1512_vm4, %v1509_v27, %v1500_v17  ;;  %v7017_v29 = vsel %vm1512_vm4, %v1508_v16, %v1511_v22  ;;  %v7021_v32 = vsel %vm1512_vm4, %v1511_v22, %v1502_v42  ;;  %v5783_v17 = vld [vmem:[#allocation6 + $0xa0] sm:$0xff]   ;;  %v5785_v42 = vld [vmem:[#allocation6 + $0x38] sm:$0xff]   ;;  %v5791_v27 = vld [vmem:[#allocation6 + $0x188] sm:$0xff]  }
 0x23a   :  { %4957 = vmatprep.subr.bf16.mxu0 %v5778_v63  ;;  %v1577_v55 = vpack.c.bf16 %v7013_v53, %v7007_v12  ;;  %v1579_v36 = vpack.c.bf16 %v7021_v32, %v7017_v29  ;;  %v5787_v16 = vld [vmem:[#allocation6 + $0x1c0] sm:$0xff]   ;;  %v5792_v63 = vld [vmem:[#allocation6 + $0xb8] sm:$0xff]   ;;  %v5793_v22 = vld [vmem:[#allocation6 + $0x1d0] sm:$0xff]  }
 0x23b   :  { %5350 = vmatpush3.bf16.msra.mxu1 %v5777_v50  ;;  %v5788_v0 = vld [vmem:[#allocation6 + $0x180] sm:$0xff]   ;;  %v5790_v50 = vld [vmem:[#allocation6 + $0x1c8] sm:$0xff]   ;;  %v5830_v54 = vld [vmem:[#allocation6 + $0x270] sm:$0xff]  }
 0x23c   :  { %5351 = vmatprep.subr.bf16.mxu1 %v5780_v28  ;;  %v5838_v61 = vld [vmem:[%s7491_s6 + $0x40] sm:$0xff]   ;;  %v5841_v7 = vld [vmem:[%s7491_s6 + $0x48] sm:$0xff]   ;;  %v5844_v13 = vld [vmem:[%s7491_s6 + $0x50] sm:$0xff]  }
 0x23d   :  { %4958 = vmatpush3.bf16.msra.mxu0 %v5779_v10  ;;  %v5794_v10 = vld [vmem:[#allocation6 + $0x190] sm:$0xff]   ;;  %v5842_v9 = vld [vmem:[%s7491_s6 + $0x8] sm:$0xff]   ;;  %v5847_v32 = vld [vmem:[%s7491_s6 + $0x58] sm:$0xff]  }
 0x23e   :  { %4959 = vmatprep.subr.bf16.mxu0 %v5781_v33  ;;  %v5796_v33 = vld [vmem:[#allocation6 + $0x1d8] sm:$0xff]  }
 0x23f   :  { %5352 = vmatpush3.bf16.msra.mxu1 %v5780_v28  ;;  %v5795_v28 = vld [vmem:[#allocation6 + $0x200] sm:$0xff]  }
 0x240   :  { %5353 = vmatprep.subr.bf16.mxu1 %v5783_v17 }
 0x241   :  { %4960 = vmatpush3.bf16.msra.mxu0 %v5782_v41  ;;  %v5815_v41 = vld [vmem:[#allocation6 + $0x248] sm:$0xff]  }
 0x242   :  { %4961 = vmatprep.subr.bf16.mxu0 %v5784_v46  ;;  %v5817_v46 = vld [vmem:[#allocation6 + $0x290] sm:$0xff]  }
 0x243   :  { %5354 = vmatpush3.bf16.msra.mxu1 %v5783_v17  ;;  %v5816_v17 = vld [vmem:[#allocation6 + $0x238] sm:$0xff]  }
 0x244   :  { %5355 = vmatprep.subr.bf16.mxu1 %v5786_v21 }
 0x245   :  { %4962 = vmatpush3.bf16.msra.mxu0 %v5785_v42  ;;  %v5818_v42 = vld [vmem:[#allocation6 + $0x250] sm:$0xff]  }
 0x246   :  { %4985 = vmatprep.subr.bf16.mxu0 %v5787_v16  ;;  %v5820_v16 = vld [vmem:[#allocation6 + $0x298] sm:$0xff]  }
 0x247   :  { %5356 = vmatpush3.bf16.msra.mxu1 %v5786_v21  ;;  %v5819_v21 = vld [vmem:[#allocation6 + $0x2c0] sm:$0xff]  }
 0x248   :  { %1109 = vmatmul.mubr.bf16.vlgmr.msra.gmra.mrb[8].mxu0 %v602_v38  ;;  %5357 = vmatprep.subr.bf16.mxu1 %v5789_v60  ;;  %v5799_v38 = vld [vmem:[#allocation6 + $0x1e0] sm:$0xff]  }
 0x249   :  { %1116 = vmatprep.mubr.bf16.mxu0 %v606_v34  ;;  %4986 = vmatpush3.bf16.msra.mxu0 %v5788_v0  ;;  %v5807_v34 = vld [vmem:[#allocation6 + $0x220] sm:$0xff]  }
 0x24a   :  { %4987 = vmatprep.subr.bf16.mxu0 %v5790_v50 }
 0x24b   :  { %5358 = vmatpush3.bf16.msra.mxu1 %v5789_v60  ;;  %v5848_v60 = vld [vmem:[%s7491_s6 + $0x18] sm:$0xff]  }
 0x24c   :  { %5359 = vmatprep.subr.bf16.mxu1 %v5792_v63 }
 0x24d   :  { %4988 = vmatpush3.bf16.msra.mxu0 %v5791_v27 }
 0x24e   :  { %4989 = vmatprep.subr.bf16.mxu0 %v5793_v22 }
 0x24f   :  { %5360 = vmatpush3.bf16.msra.mxu1 %v5792_v63 }
 0x250   :  { %1117 = vmatmul.mubr.bf16.gmra.mrb[12].mxu0 %v605_v6  ;;  %5365 = vmatprep.subr.bf16.mxu1 %v5795_v28  ;;  %v5803_v6 = vld [vmem:[#allocation6 + $0x1a8] sm:$0xff]  }
 0x251   :  { %4990 = vmatpush3.bf16.msra.mxu0 %v5794_v10  ;;  %1430 = vmatprep.mubr.bf16.mxu0 %v1249_v2  ;;  %v5811_v2 = vld [vmem:[#allocation6 + $0x280] sm:$0xff]  }
 0x252   :  { %5362 = vmatmul.mubr.bf16.vlgmr.msra.gmra.mrb[12].mxu1 %v607_v15  ;;  %4991 = vmatprep.subr.bf16.mxu0 %v5796_v33  ;;  %v5810_v15 = vld [vmem:[#allocation6 + $0x228] sm:$0xff]  }
 0x253   :  { %5366 = vmatpush3.bf16.msra.mxu1 %v5795_v28  ;;  %5381 = vmatprep.mubr.bf16.mxu1 %v1250_v30  ;;  %v5814_v30 = vld [vmem:[#allocation6 + $0x288] sm:$0xff]  }
 0x254   :  { %5367 = vmatprep.subr.bf16.mxu1 %v5798_v8 }
 0x255   :  { %4992 = vmatpush3.bf16.msra.mxu0 %v5797_v18 }
 0x256   :  { %4993 = vmatprep.subr.bf16.mxu0 %v5799_v38 }
 0x257   :  { %5368 = vmatpush3.bf16.msra.mxu1 %v5798_v8 }
 0x258   :  { %5369 = vmatprep.subr.bf16.mxu1 %v5801_v44 }
 0x259   :  { %4994 = vmatpush3.bf16.msra.mxu0 %v5800_v49 }
 0x25a   :  { %4995 = vmatprep.subr.bf16.mxu0 %v5802_v56 }
 0x25b   :  { %5370 = vmatpush3.bf16.msra.mxu1 %v5801_v44 }
 0x25c   :  { %5371 = vmatprep.subr.bf16.mxu1 %v5804_v58 }
 0x25d   :  { %4996 = vmatpush3.bf16.msra.mxu0 %v5803_v6 }
 0x25e   :  { %4997 = vmatprep.subr.bf16.mxu0 %v5805_v31 }
 0x25f   :  { %5372 = vmatpush3.bf16.msra.mxu1 %v5804_v58 }
 0x260   :  { %5373 = vmatprep.subr.bf16.mxu1 %v5807_v34 }
 0x261   :  { %4998 = vmatpush3.bf16.msra.mxu0 %v5806_v25 }
 0x262   :  { %4999 = vmatprep.subr.bf16.mxu0 %v5808_v59 }
 0x263   :  { %5374 = vmatpush3.bf16.msra.mxu1 %v5807_v34 }
 0x264   :  { %5375 = vmatprep.subr.bf16.mxu1 %v5810_v15 }
 0x265   :  { %5000 = vmatpush3.bf16.msra.mxu0 %v5809_v3 }
 0x266   :  { %5023 = vmatprep.subr.bf16.mxu0 %v5811_v2 }
 0x267   :  { %5376 = vmatpush3.bf16.msra.mxu1 %v5810_v15 }
 0x268   :  { %1431 = vmatmul.mubr.bf16.vlgmr.msra.gmra.mrb[16].mxu0 %v1248_v26  ;;  %5377 = vmatprep.subr.bf16.mxu1 %v5813_v19  ;;  %v5823_v26 = vld [vmem:[#allocation6 + $0x2a0] sm:$0xff]  }
 0x269   :  { %1438 = vmatprep.mubr.bf16.mxu0 %v1252_v11  ;;  %5024 = vmatpush3.bf16.msra.mxu0 %v5812_v23  ;;  %v5826_v11 = vld [vmem:[#allocation6 + $0x2a8] sm:$0xff]  }
 0x26a   :  { %5025 = vmatprep.subr.bf16.mxu0 %v5814_v30 }
 0x26b   :  { %5378 = vmatpush3.bf16.msra.mxu1 %v5813_v19 }
 0x26c   :  { %5379 = vmatprep.subr.bf16.mxu1 %v5816_v17 }
 0x26d   :  { %5026 = vmatpush3.bf16.msra.mxu0 %v5815_v41 }
 0x26e   :  { %5027 = vmatprep.subr.bf16.mxu0 %v5817_v46 }
 0x26f   :  { %5380 = vmatpush3.bf16.msra.mxu1 %v5816_v17 }
 0x270   :  { %1439 = vmatmul.mubr.bf16.gmra.mrb[20].mxu0 %v1251_v37  ;;  %5385 = vmatprep.subr.bf16.mxu1 %v5819_v21  ;;  %v5829_v37 = vld [vmem:[#allocation6 + $0x2b0] sm:$0xff]  }
 0x271   :  { %5028 = vmatpush3.bf16.msra.mxu0 %v5818_v42  ;;  %1756 = vmatprep.mubr.bf16.mxu0 %v1575_v43  ;;  %v5832_v43 = vld [vmem:[#allocation6 + $0x2b8] sm:$0xff]  }
 0x272   :  { %5382 = vmatmul.mubr.bf16.vlgmr.msra.gmra.mrb[12].mxu1 %v1253_v1  ;;  %5029 = vmatprep.subr.bf16.mxu0 %v5820_v16  ;;  %v5835_v1 = vld [vmem:[#allocation6 + $0x2f0] sm:$0xff]  }
 0x273   :  { %5386 = vmatpush3.bf16.msra.mxu1 %v5819_v21  ;;  %5401 = vmatprep.mubr.bf16.mxu1 %v1576_v62  ;;  %v5839_v62 = vld [vmem:[%s7491_s6] sm:$0xff]  }
 0x274   :  { %5387 = vmatprep.subr.bf16.mxu1 %v5822_v52 }
 0x275   :  { %5030 = vmatpush3.bf16.msra.mxu0 %v5821_v48 }
 0x276   :  { %5031 = vmatprep.subr.bf16.mxu0 %v5823_v26 }
 0x277   :  { %5388 = vmatpush3.bf16.msra.mxu1 %v5822_v52 }
 0x278   :  { %5389 = vmatprep.subr.bf16.mxu1 %v5825_v39 }
 0x279   :  { %5032 = vmatpush3.bf16.msra.mxu0 %v5824_v40 }
 0x27a   :  { %5033 = vmatprep.subr.bf16.mxu0 %v5826_v11 }
 0x27b   :  { %5390 = vmatpush3.bf16.msra.mxu1 %v5825_v39 }
 0x27c   :  { %5391 = vmatprep.subr.bf16.mxu1 %v5828_v51 }
 0x27d   :  { %5034 = vmatpush3.bf16.msra.mxu0 %v5827_v47 }
 0x27e   :  { %5035 = vmatprep.subr.bf16.mxu0 %v5829_v37 }
 0x27f   :  { %5392 = vmatpush3.bf16.msra.mxu1 %v5828_v51 }
 0x280   :  { %5393 = vmatprep.subr.bf16.mxu1 %v5831_v35 }
 0x281   :  { %5036 = vmatpush3.bf16.msra.mxu0 %v5830_v54 }
 0x282   :  { %5037 = vmatprep.subr.bf16.mxu0 %v5832_v43 }
 0x283   :  { %5394 = vmatpush3.bf16.msra.mxu1 %v5831_v35 }
 0x284   :  { %5395 = vmatprep.subr.bf16.mxu1 %v5834_v57 }
 0x285   :  { %5038 = vmatpush3.bf16.msra.mxu0 %v5833_v24 }
 0x286   :  { %5064 = vmatprep.subr.bf16.mxu0 %v5838_v61 }
 0x287   :  { %5396 = vmatpush3.bf16.msra.mxu1 %v5834_v57 }
 0x288   :  { %1757 = vmatmul.mubr.bf16.vlgmr.msra.gmra.mrb[24].mxu0 %v1574_v14  ;;  %5397 = vmatprep.subr.bf16.mxu1 %v5835_v1 }
 0x289   :  { %1764 = vmatprep.mubr.bf16.mxu0 %v1578_v20  ;;  %5065 = vmatpush3.bf16.msra.mxu0 %v5839_v62  ;;  %v5845_v20 = vld [vmem:[%s7491_s6 + $0x10] sm:$0xff]  }
 0x28a   :  { %5066 = vmatprep.subr.bf16.mxu0 %v5841_v7 }
 0x28b   :  { %5398 = vmatpush3.bf16.msra.mxu1 %v5835_v1 }
 0x28c   :  { %5399 = vmatprep.subr.bf16.mxu1 %v5836_v4 }
 0x28d   :  { %5067 = vmatpush3.bf16.msra.mxu0 %v5842_v9 }
 0x28e   :  { %5068 = vmatprep.subr.bf16.mxu0 %v5844_v13 }
 0x28f   :  { %5400 = vmatpush3.bf16.msra.mxu1 %v5836_v4 }
 0x290   :  { %1765 = vmatmul.mubr.bf16.gmra.mrb[28].mxu0 %v1577_v55  ;;  %5405 = vmatprep.subr.bf16.mxu1 %v6404_v5 }
 0x291   :  { %5069 = vmatpush3.bf16.msra.mxu0 %v5845_v20 }
 0x292   :  { %5402 = vmatmul.mubr.bf16.vlgmr.msra.gmra.mrb[12].mxu1 %v1579_v36  ;;  %5070 = vmatprep.subr.bf16.mxu0 %v5847_v32 }
 0x293   :  { %5409 = vmatprep.mubr.msk.bf16.mxu1 %vm6405_vm5, %v6404_v5 }
 0x295   :  { %5071 = vmatpush3.bf16.msra.mxu0 %v5848_v60 }
 0x2fb   :  { %v4925_v14 = vpop.f32.mrb[0].mxu0 }
 0x2fc   :  { %v4926_v12 = vpop.f32.mrb[1].mxu0 }
 0x2fd   :  { %v4927_v53 = vadd.f32 %v4926_v12, %v4925_v14  ;;  %v4928_v29 = vpop.f32.mrb[2].mxu0 }
 0x2fe   :  { %v4929_v55 = vpop.f32.mrb[3].mxu0 }
 0x2ff   :  { %v4930_v36 = vadd.f32 %v4929_v55, %v4928_v29 }
 0x303   :  { %v4931_v0 = vpop.f32.mrb[4].mxu0 }
 0x304   :  { %v4932_v50 = vpop.f32.mrb[5].mxu0 }
 0x305   :  { %v4933_v63 = vadd.f32 %v4932_v50, %v4931_v0  ;;  %v4934_v27 = vpop.f32.mrb[6].mxu0 }
 0x306   :  { %v4935_v22 = vpop.f32.mrb[7].mxu0 }
 0x307   :  { %v4936_v28 = vadd.f32 %v4935_v22, %v4934_v27  ;;  %v5840_v27 = vld [vmem:[%s7491_s6 + $0x80] sm:$0xff]   ;;  %v5843_v22 = vld [vmem:[%s7491_s6 + $0x88] sm:$0xff]  }
 0x31b   :  { %v4963_v10 = vpop.f32.mrb[8].mxu0 }
 0x31c   :  { %v4964_v33 = vpop.f32.mrb[9].mxu0 }
 0x31d   :  { %v4965_v8 = vadd.f32 %v4964_v33, %v4963_v10  ;;  %v4966_v18 = vpop.f32.mrb[10].mxu0  ;;  %v5849_v10 = vld [vmem:[%s7491_s6 + $0x98] sm:$0xff]   ;;  %v5850_v33 = vld [vmem:[%s7491_s6 + $0x60] sm:$0xff]  }
 0x31e   :  { %v4967_v38 = vpop.f32.mrb[11].mxu0  ;;  %5072 = vmatprep.subr.bf16.mxu0 %v5850_v33  ;;  %v5882_v33 = vld [vmem:[#allocation10 + $0xb0] sm:$0xff]  }
 0x31f   :  { %v5677_v44 = vadd.f32 %v4965_v8, %v4927_v53  ;;  %v4968_v49 = vadd.f32 %v4967_v38, %v4966_v18  ;;  %v5851_v8 = vld [vmem:[%s7491_s6 + $0x20] sm:$0xff]   ;;  %v5853_v38 = vld [vmem:[%s7491_s6 + $0x68] sm:$0xff]  }
 0x320   :  { %v5852_v18 = vld [vmem:[%s7491_s6 + $0xa0] sm:$0xff]   ;;  %5073 = vmatpush3.bf16.msra.mxu0 %v5851_v8 }
 0x321   :  { %v5685_v56 = vadd.f32 %v4968_v49, %v4930_v36  ;;  %v5855_v49 = vld [vmem:[%s7491_s6 + $0xa8] sm:$0xff]   ;;  %5074 = vmatprep.subr.bf16.mxu0 %v5853_v38  ;;  %v5881_v8 = vld [vmem:[#allocation10 + $0x30] sm:$0xff]  }
 0x322   :  { %v5885_v38 = vld [vmem:[#allocation10 + $0xb8] sm:$0xff]  }
 0x323   :  { %v4969_v58 = vpop.f32.mrb[12].mxu0 }
 0x324   :  { %v4970_v6 = vpop.f32.mrb[13].mxu0 }
 0x325   :  { %v4971_v31 = vadd.f32 %v4970_v6, %v4969_v58  ;;  %v4972_v34 = vpop.f32.mrb[14].mxu0  ;;  %v5858_v58 = vld [vmem:[%s7491_s6 + $0xb0] sm:$0xff]  }
 0x326   :  { %v4973_v25 = vpop.f32.mrb[15].mxu0  ;;  %v5857_v6 = vld [vmem:[%s7491_s6 + $0x30] sm:$0xff]  }
 0x327   :  { %v5673_v59 = vadd.f32 %v4971_v31, %v4933_v63  ;;  %v4974_v15 = vadd.f32 %v4973_v25, %v4972_v34  ;;  %v5837_v63 = vld [vmem:[#allocation7] sm:$0xff]   ;;  %v5859_v31 = vld [vmem:[%s7491_s6 + $0x78] sm:$0xff]  }
 0x328   :  { %v5861_v34 = vld [vmem:[%s7491_s6 + $0xb8] sm:$0xff]  }
 0x329   :  { %v5681_v3 = vadd.f32 %v4974_v15, %v4936_v28  ;;  %v5846_v28 = vld [vmem:[%s7491_s6 + $0x90] sm:$0xff]   ;;  %v5860_v25 = vld [vmem:[%s7491_s6 + $0x38] sm:$0xff]   ;;  %v4634_v15 = vld [vmem:[#allocation9] ss:$0 sm:$0xff] }
 0x33b   :  { %v5001_v2 = vpop.f32.mrb[16].mxu0 }
 0x33c   :  { %v5002_v19 = vpop.f32.mrb[17].mxu0 }
 0x33d   :  { %v5003_v23 = vadd.f32 %v5002_v19, %v5001_v2  ;;  %v5004_v30 = vpop.f32.mrb[18].mxu0 }
 0x33e   :  { %v5005_v17 = vpop.f32.mrb[19].mxu0 }
 0x33f   :  { %v5678_v41 = vadd.f32 %v5677_v44, %v5003_v23  ;;  %v5006_v46 = vadd.f32 %v5005_v17, %v5004_v30  ;;  %v5854_v44 = vld [vmem:[%s7491_s6 + $0x28] sm:$0xff]   ;;  %v1901_v23 = vadd.s32 8, %v6747_v45 }
 0x340   :  { %5075 = vmatpush3.bf16.msra.mxu0 %v5854_v44  ;;  %v4637_v30 = vld [vmem:[#allocation9 + $0x1] ss:$0 sm:$0xff] }
 0x341   :  { %v5686_v21 = vadd.f32 %v5685_v56, %v5006_v46  ;;  %v5856_v56 = vld [vmem:[%s7491_s6 + $0x70] sm:$0xff]   ;;  %v5884_v44 = vld [vmem:[#allocation10 + $0x38] sm:$0xff]  }
 0x342   :  { %5076 = vmatprep.subr.bf16.mxu0 %v5856_v56 }
 0x343   :  { %v5007_v42 = vpop.f32.mrb[20].mxu0 }
 0x344   :  { %v5008_v16 = vpop.f32.mrb[21].mxu0  ;;  %5077 = vmatpush3.bf16.msra.mxu0 %v5857_v6  ;;  %v4639_v6 = vld [vmem:[#allocation12] ss:$0 sm:$0xff] }
 0x345   :  { %v5009_v52 = vadd.f32 %v5008_v16, %v5007_v42  ;;  %v5010_v48 = vpop.f32.mrb[22].mxu0  ;;  %5078 = vmatprep.subr.bf16.mxu0 %v5859_v31  ;;  %v4638_v42 = vld [vmem:[#allocation9 + $0x2] ss:$0 sm:$0xff] }
 0x346   :  { %v5011_v26 = vpop.f32.mrb[23].mxu0 }
 0x347   :  { %v5674_v39 = vadd.f32 %v5673_v59, %v5009_v52  ;;  %v5012_v40 = vadd.f32 %v5011_v26, %v5010_v48  ;;  %v5862_v59 = vld [vmem:[#allocation10 + $0x40] sm:$0xff]   ;;  %v1902_v48 = vand.u32 7, %v6747_v45  ;;  %v1903_v26 = vand.u32 7, %v1901_v23 }
 0x348   :  { %5079 = vmatpush3.bf16.msra.mxu0 %v5860_v25 }
 0x349   :  { %v5682_v11 = vadd.f32 %v5681_v3, %v5012_v40  ;;  %5095 = vmatprep.subr.bf16.mxu0 %v5862_v59  ;;  %vm1904_vm7 = vcmp.ge.s32.totalorder %v1902_v48, 1  ;;  %vm1905_vm8 = vcmp.ge.s32.totalorder %v1903_v26, 1  ;;  %vm1906_vm10 = vcmp.le.s32.totalorder %v1902_v48, 6 }
 0x34a   :  { %vm1907_vm11 = vcmp.le.s32.totalorder %v1903_v26, 6  ;;  %vm7175_vm12 = vmpackc.low %vm1905_vm8, %vm1904_vm7 }
 0x34b   :  { %vm7187_vm13 = vmpackc.low %vm1907_vm11, %vm1906_vm10 }
 0x35b   :  { %v5039_v51 = vpop.f32.mrb[24].mxu0 }
 0x35c   :  { %v5040_v47 = vpop.f32.mrb[25].mxu0 }
 0x35d   :  { %v5041_v37 = vadd.f32 %v5040_v47, %v5039_v51  ;;  %v5042_v35 = vpop.f32.mrb[26].mxu0 }
 0x35e   :  { %v5043_v54 = vpop.f32.mrb[27].mxu0 }
 0x35f   :  { %v5044_v43 = vadd.f32 %v5043_v54, %v5042_v35  ;;  %v5679_v57 = vadd.f32 %v5678_v41, %v5041_v37 }
 0x361   :  { %v5687_v24 = vadd.f32 %v5686_v21, %v5044_v43  ;;  %v5986_v43 = vld [vmem:[%s7500_s15 + $0x10] sm:$0xff]  }
 0x363   :  { %v5045_v1 = vpop.f32.mrb[28].mxu0 }
 0x364   :  { %v5046_v4 = vpop.f32.mrb[29].mxu0 }
 0x365   :  { %v5047_v61 = vadd.f32 %v5046_v4, %v5045_v1  ;;  %v5048_v62 = vpop.f32.mrb[30].mxu0  ;;  %v5403_v7 = vpop.f32.mrb[12].mxu1 }
 0x366   :  { %v5049_v9 = vpop.f32.mrb[31].mxu0  ;;  %v1807_v13 = vpop.f32.mrb[13].mxu1 }
 0x367   :  { %v5675_v14 = vadd.f32 %v5674_v39, %v5047_v61  ;;  %v5050_v20 = vadd.f32 %v5049_v9, %v5048_v62  ;;  %v5680_v12 = vadd.f32 %v5679_v57, %v1807_v13  ;;  %v5404_v53 = vpop.f32.mrb[14].mxu1  ;;  %v5863_v62 = vld [vmem:[#allocation10] sm:$0xff]  }
 0x368   :  { %v1810_v29 = vpop.f32.mrb[15].mxu1  ;;  %v5987_v61 = vld [vmem:[%s7500_s15 + $0x50] sm:$0xff]  }
 0x369   :  { %v5676_v32 = vadd.f32 %v5675_v14, %v5403_v7  ;;  %v5683_v55 = vadd.f32 %v5682_v11, %v5050_v20  ;;  %v5688_v36 = vadd.f32 %v5687_v24, %v1810_v29  ;;  %v5864_v7 = vld [vmem:[#allocation10 + $0x80] sm:$0xff]   ;;  %v5865_v14 = vld [vmem:[#allocation10 + $0x48] sm:$0xff]   ;;  %v5869_v29 = vld [vmem:[#allocation10 + $0x10] sm:$0xff]  }
 0x36a   :  { %v5866_v20 = vld [vmem:[#allocation10 + $0x8] sm:$0xff]  }
 0x36b   :  { %v5684_v60 = vadd.f32 %v5683_v55, %v5404_v53  ;;  %v1828_v0 = vpack.c.bf16 %v5688_v36, %v5680_v12  ;;  %v5867_v12 = vld [vmem:[#allocation10 + $0x88] sm:$0xff]   ;;  %v5868_v53 = vld [vmem:[#allocation10 + $0x50] sm:$0xff]   ;;  %v5871_v55 = vld [vmem:[#allocation10 + $0x58] sm:$0xff]  }
 0x36c   :  { %v5872_v36 = vld [vmem:[#allocation10 + $0x18] sm:$0xff]  }
 0x36d   :  { %v1829_v50 = vpack.c.bf16 %v5684_v60, %v5676_v32  ;;  %5406 = vmatpush3.bf16.msra.mxu1 %v1828_v0  ;;  %v5870_v32 = vld [vmem:[#allocation10 + $0x90] sm:$0xff]   ;;  %v5873_v60 = vld [vmem:[#allocation10 + $0x98] sm:$0xff]   ;;  %v5874_v0 = vld [vmem:[#allocation10 + $0x60] sm:$0xff]  }
 0x36e   :  { %5407 = vmatprep.subr.bf16.mxu1 %v6404_v5 }
 0x371   :  { %5408 = vmatpush3.bf16.msra.mxu1 %v1829_v50  ;;  %v5875_v50 = vld [vmem:[#allocation10 + $0x20] sm:$0xff]  }
 0x372   :  { %5413 = vmatprep.subr.bf16.mxu1 %v6404_v5 }
 0x374   :  { %5410 = vmatmul.mubr.msk.bf16.vlgmr.msra.gmra.mrb[16].mxu1 %vm1840_vm6, %v5837_v63  ;;  %v5876_v63 = vld [vmem:[#allocation10 + $0xa0] sm:$0xff]  }
 0x375   :  { %5414 = vmatpush3.bf16.msra.mxu1 %v5840_v27  ;;  %5429 = vmatprep.mubr.msk.bf16.mxu1 %vm6405_vm5, %v6404_v5  ;;  %v5877_v27 = vld [vmem:[#allocation10 + $0x68] sm:$0xff]  }
 0x376   :  { %5415 = vmatprep.subr.bf16.mxu1 %v6404_v5 }
 0x379   :  { %5416 = vmatpush3.bf16.msra.mxu1 %v5843_v22  ;;  %v5879_v22 = vld [vmem:[#allocation10 + $0xa8] sm:$0xff]  }
 0x37a   :  { %5417 = vmatprep.subr.bf16.mxu1 %v6404_v5 }
 0x37d   :  { %5418 = vmatpush3.bf16.msra.mxu1 %v5846_v28  ;;  %v5878_v28 = vld [vmem:[#allocation10 + $0x28] sm:$0xff]  }
 0x37e   :  { %5419 = vmatprep.subr.bf16.mxu1 %v6404_v5 }
 0x381   :  { %5420 = vmatpush3.bf16.msra.mxu1 %v5849_v10  ;;  %v5880_v10 = vld [vmem:[#allocation10 + $0x70] sm:$0xff]  }
 0x382   :  { %5421 = vmatprep.subr.bf16.mxu1 %v6404_v5 }
 0x385   :  { %5422 = vmatpush3.bf16.msra.mxu1 %v5852_v18  ;;  %v5883_v18 = vld [vmem:[#allocation10 + $0x78] sm:$0xff]  }
 0x386   :  { %5423 = vmatprep.subr.bf16.mxu1 %v6404_v5 }
 0x389   :  { %5424 = vmatpush3.bf16.msra.mxu1 %v5855_v49  ;;  %v5886_v49 = vld [vmem:[#allocation13 + $0x40] sm:$0xff]  }
 0x38a   :  { %5425 = vmatprep.subr.bf16.mxu1 %v6404_v5 }
 0x38d   :  { %5426 = vmatpush3.bf16.msra.mxu1 %v5858_v58 }
 0x38e   :  { %5427 = vmatprep.subr.bf16.mxu1 %v6404_v5 }
 0x391   :  { %5428 = vmatpush3.bf16.msra.mxu1 %v5861_v34 }
 0x392   :  { %5433 = vmatprep.subr.bf16.mxu1 %v6404_v5 }
 0x447   :  { %v1878_v3 = vpop.f32.mrb[16].mxu1 }
 0x448   :  { %v1879_v2 = vadd.f32 %v4634_v15, %v1878_v3  ;;  %v5411_v19 = vpop.f32.mrb[17].mxu1 }
 0x449   :  { %v1881_v17 = vpop.f32.mrb[18].mxu1 }
 0x44a   :  { %v1885_v41 = vmax.f32 %v1879_v2, 0.0  ;;  %v1882_v46 = vadd.f32 %v4634_v15, %v1881_v17  ;;  %v5412_v21 = vpop.f32.mrb[19].mxu1 }
 0x44c   :  { %v1892_v16 = vmul.f32 %v4637_v30, %v1885_v41  ;;  %v1886_v52 = vmax.f32 %v1882_v46, 0.0 }
 0x44e   :  { %v7164_v39 = vadd.f32 %v4638_v42, %v1892_v16  ;;  %v1893_v40 = vmul.f32 %v4637_v30, %v1886_v52 }
 0x450   :  { %v7166_v11 = vadd.f32 %v4638_v42, %v1893_v40  ;;  %v1908_v51 = vrot.slane %v7164_v39, 7  ;;  %v1915_v47 = vrot.slane %v7164_v39, 1 }
 0x452   :  { %v1909_v37 = vrot.slane %v7166_v11, 7  ;;  %v1916_v35 = vrot.slane %v7166_v11, 1  ;;  %v1970_v54 = vpack.c.bf16 %v7166_v11, %v7164_v39 }
 0x454   :  { %v1911_v57 = vsel %vm1910_vm9, %v1908_v51, %v1909_v37  ;;  %v1912_v24 = vsel %vm1910_vm9, %v1909_v37, %v1908_v51  ;;  %2153 = vmatprep.mubr.bf16.mxu0 %v1970_v54  ;;  %v1917_v1 = vsel %vm622_vm2, %v1915_v47, %v1916_v35  ;;  %v1918_v4 = vsel %vm622_vm2, %v1916_v35, %v1915_v47  ;;  %v5887_v35 = vld [vmem:[#allocation13] sm:$0xff]  }
 0x455   :  { %v4665_v9 = vpack.c.bf16 %v1911_v57, %v1912_v24  ;;  %v4668_v13 = vpack.c.bf16 %v1918_v4, %v1917_v1  ;;  %v5888_v54 = vld [vmem:[#allocation13 + $0x80] sm:$0xff]   ;;  %v5889_v1 = vld [vmem:[#allocation13 + $0x48] sm:$0xff]  }
 0x456   :  { %v5890_v4 = vld [vmem:[#allocation13 + $0x8] sm:$0xff]  }
 0x457   :  { %4666 = vmatmul.mubr.msk.bf16.vlgmr.msra.gmra.mrb[32].mxu0 %vm7175_vm12, %v4665_v9  ;;  %5430 = vmatmul.mubr.msk.bf16.vlgmr.msra.gmra.mrb[20].mxu1 %vm7187_vm13, %v4668_v13  ;;  %v5893_v9 = vld [vmem:[#allocation13 + $0x10] sm:$0xff]  }
 0x458   :  { %5096 = vmatpush3.bf16.msra.mxu0 %v5863_v62  ;;  %5434 = vmatpush3.bf16.msra.mxu1 %v5864_v7  ;;  %v5891_v62 = vld [vmem:[#allocation13 + $0x88] sm:$0xff]   ;;  %v5892_v7 = vld [vmem:[#allocation13 + $0x50] sm:$0xff]  }
 0x459   :  { %5097 = vmatprep.subr.bf16.mxu0 %v5865_v14  ;;  %5435 = vmatprep.subr.bf16.mxu1 %v6404_v5  ;;  %v5894_v13 = vld [vmem:[#allocation13 + $0x90] sm:$0xff]   ;;  %v5895_v14 = vld [vmem:[#allocation13 + $0x58] sm:$0xff]  }
 0x45a   :  { %5449 = vmatprep.mubr.msk.bf16.mxu1 %vm6405_vm5, %v6404_v5 }
 0x45c   :  { %5098 = vmatpush3.bf16.msra.mxu0 %v5866_v20  ;;  %5436 = vmatpush3.bf16.msra.mxu1 %v5867_v12  ;;  %v5896_v20 = vld [vmem:[#allocation13 + $0x18] sm:$0xff]  }
 0x45d   :  { %5099 = vmatprep.subr.bf16.mxu0 %v5868_v53  ;;  %5437 = vmatprep.subr.bf16.mxu1 %v6404_v5  ;;  %v5897_v12 = vld [vmem:[#allocation13 + $0x98] sm:$0xff]   ;;  %v5898_v53 = vld [vmem:[#allocation13 + $0x60] sm:$0xff]  }
 0x460   :  { %5100 = vmatpush3.bf16.msra.mxu0 %v5869_v29  ;;  %5438 = vmatpush3.bf16.msra.mxu1 %v5870_v32  ;;  %v5899_v29 = vld [vmem:[#allocation13 + $0x20] sm:$0xff]  }
 0x461   :  { %5101 = vmatprep.subr.bf16.mxu0 %v5871_v55  ;;  %5439 = vmatprep.subr.bf16.mxu1 %v6404_v5  ;;  %v5900_v32 = vld [vmem:[#allocation13 + $0xa0] sm:$0xff]   ;;  %v5901_v55 = vld [vmem:[#allocation13 + $0x68] sm:$0xff]  }
 0x464   :  { %5102 = vmatpush3.bf16.msra.mxu0 %v5872_v36  ;;  %5440 = vmatpush3.bf16.msra.mxu1 %v5873_v60  ;;  %v5903_v36 = vld [vmem:[#allocation13 + $0xa8] sm:$0xff]  }
 0x465   :  { %5441 = vmatprep.subr.bf16.mxu1 %v6404_v5  ;;  %5103 = vmatprep.subr.bf16.mxu0 %v5874_v0  ;;  %v5902_v60 = vld [vmem:[#allocation13 + $0x28] sm:$0xff]   ;;  %v5904_v0 = vld [vmem:[#allocation13 + $0x70] sm:$0xff]  }
 0x468   :  { %5442 = vmatpush3.bf16.msra.mxu1 %v5876_v63  ;;  %5104 = vmatpush3.bf16.msra.mxu0 %v5875_v50  ;;  %v5906_v50 = vld [vmem:[#allocation13 + $0xb0] sm:$0xff]  }
 0x469   :  { %5443 = vmatprep.subr.bf16.mxu1 %v6404_v5  ;;  %5105 = vmatprep.subr.bf16.mxu0 %v5877_v27  ;;  %v5905_v63 = vld [vmem:[#allocation13 + $0x30] sm:$0xff]   ;;  %v5907_v27 = vld [vmem:[#allocation13 + $0x78] sm:$0xff]  }
 0x46c   :  { %5444 = vmatpush3.bf16.msra.mxu1 %v5879_v22  ;;  %5106 = vmatpush3.bf16.msra.mxu0 %v5878_v28  ;;  %v5909_v22 = vld [vmem:[#allocation13 + $0xb8] sm:$0xff]  }
 0x46d   :  { %5445 = vmatprep.subr.bf16.mxu1 %v6404_v5  ;;  %5107 = vmatprep.subr.bf16.mxu0 %v5880_v10  ;;  %v5908_v28 = vld [vmem:[#allocation13 + $0x38] sm:$0xff]   ;;  %v5910_v10 = vld [vmem:[#allocation15 + $0x40] sm:$0xff]  }
 0x470   :  { %5446 = vmatpush3.bf16.msra.mxu1 %v5882_v33  ;;  %5108 = vmatpush3.bf16.msra.mxu0 %v5881_v8 }
 0x471   :  { %5447 = vmatprep.subr.bf16.mxu1 %v6404_v5  ;;  %5109 = vmatprep.subr.bf16.mxu0 %v5883_v18  ;;  %v4670_v18 = vld [vmem:[#allocation12 + $0x1] ss:$0 sm:$0xff] }
 0x474   :  { %5448 = vmatpush3.bf16.msra.mxu1 %v5885_v38  ;;  %5110 = vmatpush3.bf16.msra.mxu0 %v5884_v44 }
 0x475   :  { %5453 = vmatprep.subr.bf16.mxu1 %v6404_v5  ;;  %5126 = vmatprep.subr.bf16.mxu0 %v5886_v49 }
 0x52a   :  { %v5080_v56 = vpop.f32.mrb[32].mxu0  ;;  %v2196_v58 = vpop.f32.mrb[20].mxu1 }
 0x52b   :  { %v5081_v31 = vpop.f32.mrb[33].mxu0  ;;  %v5431_v34 = vpop.f32.mrb[21].mxu1 }
 0x52c   :  { %v5082_v25 = vadd.f32 %v5081_v31, %v5080_v56  ;;  %v5083_v59 = vpop.f32.mrb[34].mxu0  ;;  %v2199_v15 = vpop.f32.mrb[22].mxu1 }
 0x52d   :  { %v5084_v3 = vpop.f32.mrb[35].mxu0  ;;  %v5432_v2 = vpop.f32.mrb[23].mxu1 }
 0x52e   :  { %v2156_v19 = vadd.f32 %v5082_v25, %v4639_v6  ;;  %v5085_v23 = vadd.f32 %v5084_v3, %v5083_v59 }
 0x530   :  { %v2197_v30 = vadd.f32 %v2196_v58, %v2156_v19  ;;  %v2159_v17 = vadd.f32 %v5085_v23, %v4639_v6 }
 0x532   :  { %v2203_v41 = vmax.f32 %v2197_v30, 0.0  ;;  %v2200_v46 = vadd.f32 %v2199_v15, %v2159_v17 }
 0x534   :  { %v2204_v21 = vmax.f32 %v2200_v46, 0.0  ;;  %v2205_v42 = vrot.slane %v2203_v41, 7  ;;  %v2211_v16 = vrot.slane %v2203_v41, 1 }
 0x536   :  { %v2206_v52 = vrot.slane %v2204_v21, 7  ;;  %v2212_v48 = vrot.slane %v2204_v21, 1  ;;  %v2266_v26 = vpack.c.bf16 %v2204_v21, %v2203_v41 }
 0x538   :  { %2449 = vmatprep.mubr.bf16.mxu0 %v2266_v26  ;;  %v2207_v40 = vsel %vm1910_vm9, %v2205_v42, %v2206_v52  ;;  %v2208_v51 = vsel %vm1910_vm9, %v2206_v52, %v2205_v42  ;;  %v2213_v47 = vsel %vm622_vm2, %v2211_v16, %v2212_v48  ;;  %v2214_v37 = vsel %vm622_vm2, %v2212_v48, %v2211_v16  ;;  %v5911_v48 = vld [vmem:[#allocation15] sm:$0xff]  }
 0x539   :  { %v4696_v57 = vpack.c.bf16 %v2207_v40, %v2208_v51  ;;  %v4699_v24 = vpack.c.bf16 %v2214_v37, %v2213_v47  ;;  %v5912_v26 = vld [vmem:[#allocation15 + $0x80] sm:$0xff]   ;;  %v5913_v47 = vld [vmem:[#allocation15 + $0x48] sm:$0xff]  }
 0x53a   :  { %v5914_v37 = vld [vmem:[#allocation15 + $0x8] sm:$0xff]  }
 0x53b   :  { %4697 = vmatmul.mubr.msk.bf16.vlgmr.msra.gmra.mrb[36].mxu0 %vm7175_vm12, %v4696_v57  ;;  %5450 = vmatmul.mubr.msk.bf16.vlgmr.msra.gmra.mrb[24].mxu1 %vm7187_vm13, %v4699_v24  ;;  %v5917_v57 = vld [vmem:[#allocation15 + $0x10] sm:$0xff]  }
 0x53c   :  { %5127 = vmatpush3.bf16.msra.mxu0 %v5887_v35  ;;  %5454 = vmatpush3.bf16.msra.mxu1 %v5888_v54  ;;  %v5915_v35 = vld [vmem:[#allocation15 + $0x88] sm:$0xff]   ;;  %v5916_v54 = vld [vmem:[#allocation15 + $0x50] sm:$0xff]  }
 0x53d   :  { %5128 = vmatprep.subr.bf16.mxu0 %v5889_v1  ;;  %5455 = vmatprep.subr.bf16.mxu1 %v6404_v5  ;;  %v5918_v24 = vld [vmem:[#allocation15 + $0x90] sm:$0xff]   ;;  %v5919_v1 = vld [vmem:[#allocation15 + $0x58] sm:$0xff]  }
 0x53e   :  { %5469 = vmatprep.mubr.msk.bf16.mxu1 %vm6405_vm5, %v6404_v5 }
 0x540   :  { %5129 = vmatpush3.bf16.msra.mxu0 %v5890_v4  ;;  %5456 = vmatpush3.bf16.msra.mxu1 %v5891_v62  ;;  %v5920_v4 = vld [vmem:[#allocation15 + $0x18] sm:$0xff]  }
 0x541   :  { %5130 = vmatprep.subr.bf16.mxu0 %v5892_v7  ;;  %5457 = vmatprep.subr.bf16.mxu1 %v6404_v5  ;;  %v5921_v62 = vld [vmem:[#allocation15 + $0x98] sm:$0xff]   ;;  %v5922_v7 = vld [vmem:[#allocation15 + $0x60] sm:$0xff]  }
 0x544   :  { %5131 = vmatpush3.bf16.msra.mxu0 %v5893_v9  ;;  %5458 = vmatpush3.bf16.msra.mxu1 %v5894_v13  ;;  %v5923_v9 = vld [vmem:[#allocation15 + $0x20] sm:$0xff]  }
 0x545   :  { %5132 = vmatprep.subr.bf16.mxu0 %v5895_v14  ;;  %5459 = vmatprep.subr.bf16.mxu1 %v6404_v5  ;;  %v5924_v13 = vld [vmem:[#allocation15 + $0xa0] sm:$0xff]   ;;  %v5925_v14 = vld [vmem:[#allocation15 + $0x68] sm:$0xff]  }
 0x548   :  { %5133 = vmatpush3.bf16.msra.mxu0 %v5896_v20  ;;  %5460 = vmatpush3.bf16.msra.mxu1 %v5897_v12  ;;  %v5927_v20 = vld [vmem:[#allocation15 + $0xa8] sm:$0xff]  }
 0x549   :  { %5461 = vmatprep.subr.bf16.mxu1 %v6404_v5  ;;  %5134 = vmatprep.subr.bf16.mxu0 %v5898_v53  ;;  %v5926_v12 = vld [vmem:[#allocation15 + $0x28] sm:$0xff]   ;;  %v5928_v53 = vld [vmem:[#allocation15 + $0x70] sm:$0xff]  }
 0x54c   :  { %5462 = vmatpush3.bf16.msra.mxu1 %v5900_v32  ;;  %5135 = vmatpush3.bf16.msra.mxu0 %v5899_v29  ;;  %v5930_v29 = vld [vmem:[#allocation15 + $0xb0] sm:$0xff]  }
 0x54d   :  { %5463 = vmatprep.subr.bf16.mxu1 %v6404_v5  ;;  %5136 = vmatprep.subr.bf16.mxu0 %v5901_v55  ;;  %v5929_v32 = vld [vmem:[#allocation15 + $0x30] sm:$0xff]   ;;  %v5931_v55 = vld [vmem:[#allocation15 + $0x78] sm:$0xff]  }
 0x550   :  { %5464 = vmatpush3.bf16.msra.mxu1 %v5903_v36  ;;  %5137 = vmatpush3.bf16.msra.mxu0 %v5902_v60  ;;  %v5933_v36 = vld [vmem:[#allocation15 + $0xb8] sm:$0xff]  }
 0x551   :  { %5465 = vmatprep.subr.bf16.mxu1 %v6404_v5  ;;  %5138 = vmatprep.subr.bf16.mxu0 %v5904_v0  ;;  %v5932_v60 = vld [vmem:[#allocation15 + $0x38] sm:$0xff]   ;;  %v5934_v0 = vld [vmem:[#allocation18 + $0x40] sm:$0xff]  }
 0x554   :  { %5466 = vmatpush3.bf16.msra.mxu1 %v5906_v50  ;;  %5139 = vmatpush3.bf16.msra.mxu0 %v5905_v63 }
 0x555   :  { %5467 = vmatprep.subr.bf16.mxu1 %v6404_v5  ;;  %5140 = vmatprep.subr.bf16.mxu0 %v5907_v27  ;;  %v4701_v27 = vld [vmem:[#allocation16] ss:$0 sm:$0xff] }
 0x558   :  { %5468 = vmatpush3.bf16.msra.mxu1 %v5909_v22  ;;  %5141 = vmatpush3.bf16.msra.mxu0 %v5908_v28 }
 0x559   :  { %5473 = vmatprep.subr.bf16.mxu1 %v6404_v5  ;;  %5157 = vmatprep.subr.bf16.mxu0 %v5910_v10 }
 0x60e   :  { %v5111_v33 = vpop.f32.mrb[36].mxu0  ;;  %v2492_v8 = vpop.f32.mrb[24].mxu1 }
 0x60f   :  { %v5112_v38 = vpop.f32.mrb[37].mxu0  ;;  %v5451_v44 = vpop.f32.mrb[25].mxu1 }
 0x610   :  { %v5113_v49 = vadd.f32 %v5112_v38, %v5111_v33  ;;  %v5114_v56 = vpop.f32.mrb[38].mxu0  ;;  %v2495_v58 = vpop.f32.mrb[26].mxu1 }
 0x611   :  { %v5115_v6 = vpop.f32.mrb[39].mxu0  ;;  %v5452_v31 = vpop.f32.mrb[27].mxu1 }
 0x612   :  { %v2452_v34 = vadd.f32 %v5113_v49, %v4670_v18  ;;  %v5116_v25 = vadd.f32 %v5115_v6, %v5114_v56 }
 0x614   :  { %v2493_v59 = vadd.f32 %v2492_v8, %v2452_v34  ;;  %v2455_v15 = vadd.f32 %v5116_v25, %v4670_v18 }
 0x616   :  { %v2499_v3 = vadd.f32 %v2493_v59, %v7164_v39  ;;  %v2496_v2 = vadd.f32 %v2495_v58, %v2455_v15 }
 0x618   :  { %v7228_v19 = vmax.f32 %v2499_v3, 0.0  ;;  %v2500_v23 = vadd.f32 %v2496_v2, %v7166_v11 }
 0x61a   :  { %v7231_v30 = vmax.f32 %v2500_v23, 0.0  ;;  %v2503_v17 = vrot.slane %v7228_v19, 7  ;;  %v2509_v41 = vrot.slane %v7228_v19, 1 }
 0x61c   :  { %v2504_v46 = vrot.slane %v7231_v30, 7  ;;  %v2510_v21 = vrot.slane %v7231_v30, 1  ;;  %v2564_v42 = vpack.c.bf16 %v7231_v30, %v7228_v19 }
 0x61e   :  { %2747 = vmatprep.mubr.bf16.mxu0 %v2564_v42  ;;  %v2505_v39 = vsel %vm1910_vm9, %v2503_v17, %v2504_v46  ;;  %v2506_v11 = vsel %vm1910_vm9, %v2504_v46, %v2503_v17  ;;  %v2511_v16 = vsel %vm622_vm2, %v2509_v41, %v2510_v21  ;;  %v2512_v52 = vsel %vm622_vm2, %v2510_v21, %v2509_v41  ;;  %v5935_v21 = vld [vmem:[#allocation18] sm:$0xff]  }
 0x61f   :  { %v4727_v40 = vpack.c.bf16 %v2505_v39, %v2506_v11  ;;  %v4730_v51 = vpack.c.bf16 %v2512_v52, %v2511_v16  ;;  %v5936_v42 = vld [vmem:[#allocation18 + $0x80] sm:$0xff]   ;;  %v5937_v16 = vld [vmem:[#allocation18 + $0x48] sm:$0xff]  }
 0x620   :  { %v5938_v52 = vld [vmem:[#allocation18 + $0x8] sm:$0xff]  }
 0x621   :  { %4728 = vmatmul.mubr.msk.bf16.vlgmr.msra.gmra.mrb[40].mxu0 %vm7175_vm12, %v4727_v40  ;;  %5470 = vmatmul.mubr.msk.bf16.vlgmr.msra.gmra.mrb[28].mxu1 %vm7187_vm13, %v4730_v51  ;;  %v5941_v40 = vld [vmem:[#allocation18 + $0x10] sm:$0xff]  }
 0x622   :  { %5158 = vmatpush3.bf16.msra.mxu0 %v5911_v48  ;;  %5474 = vmatpush3.bf16.msra.mxu1 %v5912_v26  ;;  %v5939_v48 = vld [vmem:[#allocation18 + $0x88] sm:$0xff]   ;;  %v5940_v26 = vld [vmem:[#allocation18 + $0x50] sm:$0xff]  }
 0x623   :  { %5159 = vmatprep.subr.bf16.mxu0 %v5913_v47  ;;  %5475 = vmatprep.subr.bf16.mxu1 %v6404_v5  ;;  %v5942_v51 = vld [vmem:[#allocation18 + $0x90] sm:$0xff]   ;;  %v5943_v47 = vld [vmem:[#allocation18 + $0x58] sm:$0xff]  }
 0x624   :  { %5489 = vmatprep.mubr.msk.bf16.mxu1 %vm6405_vm5, %v6404_v5 }
 0x626   :  { %5160 = vmatpush3.bf16.msra.mxu0 %v5914_v37  ;;  %5476 = vmatpush3.bf16.msra.mxu1 %v5915_v35  ;;  %v5944_v37 = vld [vmem:[#allocation18 + $0x18] sm:$0xff]  }
 0x627   :  { %5161 = vmatprep.subr.bf16.mxu0 %v5916_v54  ;;  %5477 = vmatprep.subr.bf16.mxu1 %v6404_v5  ;;  %v5945_v35 = vld [vmem:[#allocation18 + $0x98] sm:$0xff]   ;;  %v5946_v54 = vld [vmem:[#allocation18 + $0x60] sm:$0xff]  }
 0x62a   :  { %5162 = vmatpush3.bf16.msra.mxu0 %v5917_v57  ;;  %5478 = vmatpush3.bf16.msra.mxu1 %v5918_v24  ;;  %v5947_v57 = vld [vmem:[#allocation18 + $0x20] sm:$0xff]  }
 0x62b   :  { %5163 = vmatprep.subr.bf16.mxu0 %v5919_v1  ;;  %5479 = vmatprep.subr.bf16.mxu1 %v6404_v5  ;;  %v5948_v24 = vld [vmem:[#allocation18 + $0xa0] sm:$0xff]   ;;  %v5949_v1 = vld [vmem:[#allocation18 + $0x68] sm:$0xff]  }
 0x62e   :  { %5164 = vmatpush3.bf16.msra.mxu0 %v5920_v4  ;;  %5480 = vmatpush3.bf16.msra.mxu1 %v5921_v62  ;;  %v5951_v4 = vld [vmem:[#allocation18 + $0xa8] sm:$0xff]  }
 0x62f   :  { %5481 = vmatprep.subr.bf16.mxu1 %v6404_v5  ;;  %5165 = vmatprep.subr.bf16.mxu0 %v5922_v7  ;;  %v5950_v62 = vld [vmem:[#allocation18 + $0x28] sm:$0xff]   ;;  %v5952_v7 = vld [vmem:[#allocation18 + $0x70] sm:$0xff]  }
 0x632   :  { %5482 = vmatpush3.bf16.msra.mxu1 %v5924_v13  ;;  %5166 = vmatpush3.bf16.msra.mxu0 %v5923_v9  ;;  %v5954_v9 = vld [vmem:[#allocation18 + $0xb0] sm:$0xff]  }
 0x633   :  { %5483 = vmatprep.subr.bf16.mxu1 %v6404_v5  ;;  %5167 = vmatprep.subr.bf16.mxu0 %v5925_v14  ;;  %v5953_v13 = vld [vmem:[#allocation18 + $0x30] sm:$0xff]   ;;  %v5955_v14 = vld [vmem:[#allocation18 + $0x78] sm:$0xff]  }
 0x636   :  { %5484 = vmatpush3.bf16.msra.mxu1 %v5927_v20  ;;  %5168 = vmatpush3.bf16.msra.mxu0 %v5926_v12  ;;  %v5957_v20 = vld [vmem:[#allocation18 + $0xb8] sm:$0xff]  }
 0x637   :  { %5485 = vmatprep.subr.bf16.mxu1 %v6404_v5  ;;  %5169 = vmatprep.subr.bf16.mxu0 %v5928_v53  ;;  %v5956_v12 = vld [vmem:[#allocation18 + $0x38] sm:$0xff]   ;;  %v5958_v53 = vld [vmem:[#allocation19 + $0x40] sm:$0xff]  }
 0x63a   :  { %5486 = vmatpush3.bf16.msra.mxu1 %v5930_v29  ;;  %5170 = vmatpush3.bf16.msra.mxu0 %v5929_v32 }
 0x63b   :  { %5487 = vmatprep.subr.bf16.mxu1 %v6404_v5  ;;  %5171 = vmatprep.subr.bf16.mxu0 %v5931_v55  ;;  %v4732_v55 = vld [vmem:[#allocation16 + $0x1] ss:$0 sm:$0xff] }
 0x63e   :  { %5488 = vmatpush3.bf16.msra.mxu1 %v5933_v36  ;;  %5172 = vmatpush3.bf16.msra.mxu0 %v5932_v60 }
 0x63f   :  { %5493 = vmatprep.subr.bf16.mxu1 %v6404_v5  ;;  %5188 = vmatprep.subr.bf16.mxu0 %v5934_v0 }
 0x6f4   :  { %v5142_v50 = vpop.f32.mrb[40].mxu0  ;;  %v2790_v63 = vpop.f32.mrb[28].mxu1 }
 0x6f5   :  { %v5143_v22 = vpop.f32.mrb[41].mxu0  ;;  %v5471_v28 = vpop.f32.mrb[29].mxu1 }
 0x6f6   :  { %v5144_v10 = vadd.f32 %v5143_v22, %v5142_v50  ;;  %v5145_v33 = vpop.f32.mrb[42].mxu0  ;;  %v2793_v8 = vpop.f32.mrb[30].mxu1 }
 0x6f7   :  { %v5146_v18 = vpop.f32.mrb[43].mxu0  ;;  %v5472_v38 = vpop.f32.mrb[31].mxu1 }
 0x6f8   :  { %v2750_v44 = vadd.f32 %v5144_v10, %v4701_v27  ;;  %v5147_v49 = vadd.f32 %v5146_v18, %v5145_v33 }
 0x6fa   :  { %v2791_v56 = vadd.f32 %v2790_v63, %v2750_v44  ;;  %v2753_v58 = vadd.f32 %v5147_v49, %v4701_v27 }
 0x6fc   :  { %v2797_v6 = vmax.f32 %v2791_v56, 0.0  ;;  %v2794_v31 = vadd.f32 %v2793_v8, %v2753_v58 }
 0x6fe   :  { %v2798_v34 = vmax.f32 %v2794_v31, 0.0  ;;  %v2799_v25 = vrot.slane %v2797_v6, 7  ;;  %v2805_v59 = vrot.slane %v2797_v6, 1 }
 0x700   :  { %v2800_v15 = vrot.slane %v2798_v34, 7  ;;  %v2806_v3 = vrot.slane %v2798_v34, 1  ;;  %v2860_v2 = vpack.c.bf16 %v2798_v34, %v2797_v6 }
 0x702   :  { %3043 = vmatprep.mubr.bf16.mxu0 %v2860_v2  ;;  %v2801_v23 = vsel %vm1910_vm9, %v2799_v25, %v2800_v15  ;;  %v2802_v17 = vsel %vm1910_vm9, %v2800_v15, %v2799_v25  ;;  %v2807_v41 = vsel %vm622_vm2, %v2805_v59, %v2806_v3  ;;  %v2808_v46 = vsel %vm622_vm2, %v2806_v3, %v2805_v59  ;;  %v5959_v3 = vld [vmem:[#allocation19] sm:$0xff]  }
 0x703   :  { %v4758_v39 = vpack.c.bf16 %v2801_v23, %v2802_v17  ;;  %v4761_v11 = vpack.c.bf16 %v2808_v46, %v2807_v41  ;;  %v5960_v2 = vld [vmem:[#allocation19 + $0x80] sm:$0xff]   ;;  %v5961_v41 = vld [vmem:[#allocation19 + $0x48] sm:$0xff]  }
 0x704   :  { %v5962_v46 = vld [vmem:[#allocation19 + $0x8] sm:$0xff]  }
 0x705   :  { %4759 = vmatmul.mubr.msk.bf16.vlgmr.msra.gmra.mrb[44].mxu0 %vm7175_vm12, %v4758_v39  ;;  %5490 = vmatmul.mubr.msk.bf16.vlgmr.msra.gmra.mrb[32].mxu1 %vm7187_vm13, %v4761_v11  ;;  %v5965_v39 = vld [vmem:[#allocation19 + $0x10] sm:$0xff]  }
 0x706   :  { %5189 = vmatpush3.bf16.msra.mxu0 %v5935_v21  ;;  %5494 = vmatpush3.bf16.msra.mxu1 %v5936_v42  ;;  %v5963_v21 = vld [vmem:[#allocation19 + $0x88] sm:$0xff]   ;;  %v5964_v42 = vld [vmem:[#allocation19 + $0x50] sm:$0xff]  }
 0x707   :  { %5190 = vmatprep.subr.bf16.mxu0 %v5937_v16  ;;  %5495 = vmatprep.subr.bf16.mxu1 %v6404_v5  ;;  %v5966_v11 = vld [vmem:[#allocation19 + $0x90] sm:$0xff]   ;;  %v5967_v16 = vld [vmem:[#allocation19 + $0x58] sm:$0xff]  }
 0x708   :  { %5509 = vmatprep.mubr.msk.bf16.mxu1 %vm6405_vm5, %v6404_v5 }
 0x70a   :  { %5191 = vmatpush3.bf16.msra.mxu0 %v5938_v52  ;;  %5496 = vmatpush3.bf16.msra.mxu1 %v5939_v48  ;;  %v5968_v52 = vld [vmem:[#allocation19 + $0x18] sm:$0xff]  }
 0x70b   :  { %5192 = vmatprep.subr.bf16.mxu0 %v5940_v26  ;;  %5497 = vmatprep.subr.bf16.mxu1 %v6404_v5  ;;  %v5969_v48 = vld [vmem:[#allocation19 + $0x98] sm:$0xff]   ;;  %v5970_v26 = vld [vmem:[#allocation19 + $0x60] sm:$0xff]  }
 0x70e   :  { %5193 = vmatpush3.bf16.msra.mxu0 %v5941_v40  ;;  %5498 = vmatpush3.bf16.msra.mxu1 %v5942_v51  ;;  %v5971_v40 = vld [vmem:[#allocation19 + $0x20] sm:$0xff]  }
 0x70f   :  { %5194 = vmatprep.subr.bf16.mxu0 %v5943_v47  ;;  %5499 = vmatprep.subr.bf16.mxu1 %v6404_v5  ;;  %v5972_v51 = vld [vmem:[#allocation19 + $0xa0] sm:$0xff]   ;;  %v5973_v47 = vld [vmem:[#allocation19 + $0x68] sm:$0xff]  }
 0x712   :  { %5195 = vmatpush3.bf16.msra.mxu0 %v5944_v37  ;;  %5500 = vmatpush3.bf16.msra.mxu1 %v5945_v35  ;;  %v5975_v37 = vld [vmem:[#allocation19 + $0xa8] sm:$0xff]  }
 0x713   :  { %5501 = vmatprep.subr.bf16.mxu1 %v6404_v5  ;;  %5196 = vmatprep.subr.bf16.mxu0 %v5946_v54  ;;  %v5974_v35 = vld [vmem:[#allocation19 + $0x28] sm:$0xff]   ;;  %v5976_v54 = vld [vmem:[#allocation19 + $0x70] sm:$0xff]  }
 0x716   :  { %5502 = vmatpush3.bf16.msra.mxu1 %v5948_v24  ;;  %5197 = vmatpush3.bf16.msra.mxu0 %v5947_v57  ;;  %v5978_v57 = vld [vmem:[#allocation19 + $0xb0] sm:$0xff]  }
 0x717   :  { %5503 = vmatprep.subr.bf16.mxu1 %v6404_v5  ;;  %5198 = vmatprep.subr.bf16.mxu0 %v5949_v1  ;;  %v5977_v24 = vld [vmem:[#allocation19 + $0x30] sm:$0xff]   ;;  %v5979_v1 = vld [vmem:[#allocation19 + $0x78] sm:$0xff]  }
 0x71a   :  { %5504 = vmatpush3.bf16.msra.mxu1 %v5951_v4  ;;  %5199 = vmatpush3.bf16.msra.mxu0 %v5950_v62  ;;  %v5981_v4 = vld [vmem:[#allocation19 + $0xb8] sm:$0xff]  }
 0x71b   :  { %5505 = vmatprep.subr.bf16.mxu1 %v6404_v5  ;;  %5200 = vmatprep.subr.bf16.mxu0 %v5952_v7  ;;  %v5980_v62 = vld [vmem:[#allocation19 + $0x38] sm:$0xff]  }
 0x71e   :  { %5506 = vmatpush3.bf16.msra.mxu1 %v5954_v9  ;;  %5201 = vmatpush3.bf16.msra.mxu0 %v5953_v13  ;;  %v4763_v13 = vld [vmem:[#allocation21] ss:$0 sm:$0xff] }
 0x71f   :  { %5507 = vmatprep.subr.bf16.mxu1 %v6404_v5  ;;  %5202 = vmatprep.subr.bf16.mxu0 %v5955_v14 }
 0x722   :  { %5508 = vmatpush3.bf16.msra.mxu1 %v5957_v20  ;;  %5203 = vmatpush3.bf16.msra.mxu0 %v5956_v12 }
 0x723   :  { %5513 = vmatprep.subr.bf16.mxu1 %v6404_v5  ;;  %5219 = vmatprep.subr.bf16.mxu0 %v5958_v53 }
 0x7d8   :  { %v5173_v29 = vpop.f32.mrb[44].mxu0  ;;  %v3086_v32 = vpop.f32.mrb[32].mxu1 }
 0x7d9   :  { %v5174_v36 = vpop.f32.mrb[45].mxu0  ;;  %v5491_v60 = vpop.f32.mrb[33].mxu1 }
 0x7da   :  { %v5175_v0 = vadd.f32 %v5174_v36, %v5173_v29  ;;  %v5176_v50 = vpop.f32.mrb[46].mxu0  ;;  %v3089_v63 = vpop.f32.mrb[34].mxu1 }
 0x7db   :  { %v5177_v27 = vpop.f32.mrb[47].mxu0  ;;  %v5492_v22 = vpop.f32.mrb[35].mxu1 }
 0x7dc   :  { %v3046_v28 = vadd.f32 %v5175_v0, %v4732_v55  ;;  %v5178_v10 = vadd.f32 %v5177_v27, %v5176_v50 }
 0x7de   :  { %v3087_v33 = vadd.f32 %v3086_v32, %v3046_v28  ;;  %v3049_v8 = vadd.f32 %v5178_v10, %v4732_v55 }
 0x7e0   :  { %v3093_v18 = vadd.f32 %v3087_v33, %v7228_v19  ;;  %v3090_v38 = vadd.f32 %v3089_v63, %v3049_v8 }
 0x7e2   :  { %v7284_v44 = vmax.f32 %v3093_v18, 0.0  ;;  %v3094_v49 = vadd.f32 %v3090_v38, %v7231_v30 }
 0x7e4   :  { %v7287_v56 = vmax.f32 %v3094_v49, 0.0  ;;  %v3097_v58 = vrot.slane %v7284_v44, 7  ;;  %v3103_v6 = vrot.slane %v7284_v44, 1 }
 0x7e6   :  { %v3098_v31 = vrot.slane %v7287_v56, 7  ;;  %v3104_v34 = vrot.slane %v7287_v56, 1  ;;  %v3158_v25 = vpack.c.bf16 %v7287_v56, %v7284_v44 }
 0x7e8   :  { %3341 = vmatprep.mubr.bf16.mxu0 %v3158_v25  ;;  %v3099_v19 = vsel %vm1910_vm9, %v3097_v58, %v3098_v31  ;;  %v3100_v30 = vsel %vm1910_vm9, %v3098_v31, %v3097_v58  ;;  %v3105_v59 = vsel %vm622_vm2, %v3103_v6, %v3104_v34  ;;  %v3106_v15 = vsel %vm622_vm2, %v3104_v34, %v3103_v6  ;;  %v5982_v31 = vld [vmem:[%s7500_s15] sm:$0xff]  }
 0x7e9   :  { %v4789_v23 = vpack.c.bf16 %v3099_v19, %v3100_v30  ;;  %v4792_v17 = vpack.c.bf16 %v3106_v15, %v3105_v59  ;;  %v5983_v34 = vld [vmem:[%s7500_s15 + $0x40] sm:$0xff]   ;;  %v5984_v30 = vld [vmem:[%s7500_s15 + $0x8] sm:$0xff]   ;;  %v5988_v15 = vld [vmem:[%s7500_s15 + $0x18] sm:$0xff]  }
 0x7ea   :  { %v5985_v59 = vld [vmem:[%s7500_s15 + $0x48] sm:$0xff]  }
 0x7eb   :  { %4790 = vmatmul.mubr.msk.bf16.vlgmr.msra.gmra.mrb[48].mxu0 %vm7175_vm12, %v4789_v23  ;;  %5510 = vmatmul.mubr.msk.bf16.vlgmr.msra.gmra.mrb[36].mxu1 %vm7187_vm13, %v4792_v17  ;;  %v5991_v23 = vld [vmem:[%s7500_s15 + $0x60] sm:$0xff]   ;;  %v5992_v17 = vld [vmem:[%s7500_s15 + $0x28] sm:$0xff]  }
 0x7ec   :  { %5220 = vmatpush3.bf16.msra.mxu0 %v5959_v3  ;;  %5514 = vmatpush3.bf16.msra.mxu1 %v5960_v2  ;;  %v5989_v3 = vld [vmem:[%s7500_s15 + $0x58] sm:$0xff]   ;;  %v5990_v2 = vld [vmem:[%s7500_s15 + $0x20] sm:$0xff]  }
 0x7ed   :  { %5221 = vmatprep.subr.bf16.mxu0 %v5961_v41  ;;  %5515 = vmatprep.subr.bf16.mxu1 %v6404_v5  ;;  %v5993_v41 = vld [vmem:[%s7500_s15 + $0x68] sm:$0xff]  }
 0x7ee   :  { %5529 = vmatprep.mubr.msk.bf16.mxu1 %vm6405_vm5, %v6404_v5 }
 0x7f0   :  { %5222 = vmatpush3.bf16.msra.mxu0 %v5962_v46  ;;  %5516 = vmatpush3.bf16.msra.mxu1 %v5963_v21  ;;  %v5994_v46 = vld [vmem:[%s7500_s15 + $0x30] sm:$0xff]  }
 0x7f1   :  { %5223 = vmatprep.subr.bf16.mxu0 %v5964_v42  ;;  %5517 = vmatprep.subr.bf16.mxu1 %v6404_v5  ;;  %v5995_v21 = vld [vmem:[%s7500_s15 + $0x70] sm:$0xff]   ;;  %v5996_v42 = vld [vmem:[%s7500_s15 + $0x38] sm:$0xff]  }
 0x7f4   :  { %5224 = vmatpush3.bf16.msra.mxu0 %v5965_v39  ;;  %5518 = vmatpush3.bf16.msra.mxu1 %v5966_v11  ;;  %v5997_v39 = vld [vmem:[%s7500_s15 + $0x78] sm:$0xff]  }
 0x7f5   :  { %5225 = vmatprep.subr.bf16.mxu0 %v5967_v16  ;;  %5519 = vmatprep.subr.bf16.mxu1 %v6404_v5 }
 0x7f8   :  { %5226 = vmatpush3.bf16.msra.mxu0 %v5968_v52  ;;  %5520 = vmatpush3.bf16.msra.mxu1 %v5969_v48  ;;  %v4794_v52 = vld [vmem:[#allocation21 + $0x1] ss:$0 sm:$0xff] }
 0x7f9   :  { %5521 = vmatprep.subr.bf16.mxu1 %v6404_v5  ;;  %5227 = vmatprep.subr.bf16.mxu0 %v5970_v26 }
 0x7fc   :  { %5522 = vmatpush3.bf16.msra.mxu1 %v5972_v51  ;;  %5228 = vmatpush3.bf16.msra.mxu0 %v5971_v40 }
 0x7fd   :  { %5523 = vmatprep.subr.bf16.mxu1 %v6404_v5  ;;  %5229 = vmatprep.subr.bf16.mxu0 %v5973_v47 }
 0x800   :  { %5524 = vmatpush3.bf16.msra.mxu1 %v5975_v37  ;;  %5230 = vmatpush3.bf16.msra.mxu0 %v5974_v35 }
 0x801   :  { %5525 = vmatprep.subr.bf16.mxu1 %v6404_v5  ;;  %5231 = vmatprep.subr.bf16.mxu0 %v5976_v54 }
 0x804   :  { %5526 = vmatpush3.bf16.msra.mxu1 %v5978_v57  ;;  %5232 = vmatpush3.bf16.msra.mxu0 %v5977_v24 }
 0x805   :  { %5527 = vmatprep.subr.bf16.mxu1 %v6404_v5  ;;  %5233 = vmatprep.subr.bf16.mxu0 %v5979_v1 }
 0x808   :  { %5528 = vmatpush3.bf16.msra.mxu1 %v5981_v4  ;;  %5234 = vmatpush3.bf16.msra.mxu0 %v5980_v62 }
 0x809   :  { %5553 = vmatprep.subr.bf16.mxu1 %v6404_v5  ;;  %5533 = vmatprep.subr.bf16.mxu0 %v6404_v5 }
 0x8be   :  { %v5204_v7 = vpop.f32.mrb[48].mxu0  ;;  %v3384_v9 = vpop.f32.mrb[36].mxu1 }
 0x8bf   :  { %v5205_v14 = vpop.f32.mrb[49].mxu0  ;;  %v5511_v20 = vpop.f32.mrb[37].mxu1 }
 0x8c0   :  { %v5206_v12 = vadd.f32 %v5205_v14, %v5204_v7  ;;  %v5207_v53 = vpop.f32.mrb[50].mxu0  ;;  %v3387_v29 = vpop.f32.mrb[38].mxu1 }
 0x8c1   :  { %v5208_v32 = vpop.f32.mrb[51].mxu0  ;;  %v5512_v55 = vpop.f32.mrb[39].mxu1 }
 0x8c2   :  { %v3344_v36 = vadd.f32 %v5206_v12, %v4763_v13  ;;  %v5209_v60 = vadd.f32 %v5208_v32, %v5207_v53  ;;  %v5998_v55 = vld [vmem:[#allocation22] sm:$0xff]  }
 0x8c4   :  { %v3385_v0 = vadd.f32 %v3384_v9, %v3344_v36  ;;  %v3347_v50 = vadd.f32 %v5209_v60, %v4763_v13  ;;  %v5999_v36 = vld [vmem:[#allocation22 + $0x40] sm:$0xff]  }
 0x8c6   :  { %v3391_v63 = vmax.f32 %v3385_v0, 0.0  ;;  %v3388_v27 = vadd.f32 %v3387_v29, %v3347_v50  ;;  %v6002_v0 = vld [vmem:[#allocation22 + $0x10] sm:$0xff]  }
 0x8c7   :  { %v6003_v50 = vld [vmem:[#allocation22 + $0x50] sm:$0xff]  }
 0x8c8   :  { %v3392_v22 = vmax.f32 %v3388_v27, 0.0  ;;  %v3393_v28 = vrot.slane %v3391_v63, 7  ;;  %v3399_v10 = vrot.slane %v3391_v63, 1  ;;  %v6005_v27 = vld [vmem:[#allocation22 + $0x58] sm:$0xff]  }
 0x8ca   :  { %v3394_v33 = vrot.slane %v3392_v22, 7  ;;  %v3400_v8 = vrot.slane %v3392_v22, 1  ;;  %v3454_v18 = vpack.c.bf16 %v3392_v22, %v3391_v63  ;;  %v6004_v63 = vld [vmem:[#allocation22 + $0x18] sm:$0xff]   ;;  %v6006_v22 = vld [vmem:[#allocation22 + $0x20] sm:$0xff]  }
 0x8cc   :  { %3637 = vmatprep.mubr.bf16.mxu0 %v3454_v18  ;;  %v3395_v38 = vsel %vm1910_vm9, %v3393_v28, %v3394_v33  ;;  %v3396_v49 = vsel %vm1910_vm9, %v3394_v33, %v3393_v28  ;;  %v3401_v58 = vsel %vm622_vm2, %v3399_v10, %v3400_v8  ;;  %v3402_v6 = vsel %vm622_vm2, %v3400_v8, %v3399_v10  ;;  %v6007_v28 = vld [vmem:[#allocation22 + $0x60] sm:$0xff]   ;;  %v6008_v10 = vld [vmem:[#allocation22 + $0x28] sm:$0xff]   ;;  %v6010_v8 = vld [vmem:[#allocation22 + $0x30] sm:$0xff]  }
 0x8cd   :  { %v4820_v25 = vpack.c.bf16 %v3395_v38, %v3396_v49  ;;  %v4823_v19 = vpack.c.bf16 %v3402_v6, %v3401_v58  ;;  %v6009_v33 = vld [vmem:[#allocation22 + $0x68] sm:$0xff]   ;;  %v6011_v18 = vld [vmem:[#allocation22 + $0x70] sm:$0xff]   ;;  %v6012_v38 = vld [vmem:[#allocation22 + $0x38] sm:$0xff]  }
 0x8ce   :  { %v6013_v49 = vld [vmem:[#allocation22 + $0x78] sm:$0xff]  }
 0x8cf   :  { %4821 = vmatmul.mubr.msk.bf16.vlgmr.msra.gmra.mrb[52].mxu0 %vm7175_vm12, %v4820_v25  ;;  %5530 = vmatmul.mubr.msk.bf16.vlgmr.msra.gmra.mrb[40].mxu1 %vm7187_vm13, %v4823_v19 }
 0x8d0   :  { %5534 = vmatpush3.bf16.msra.mxu0 %v5982_v31  ;;  %5554 = vmatpush3.bf16.msra.mxu1 %v5983_v34  ;;  %v4857_v31 = vld [vmem:[%s7501_s16] ss:$0 sm:$0xff] }
 0x8d1   :  { %5535 = vmatprep.subr.bf16.mxu0 %v6404_v5  ;;  %5555 = vmatprep.subr.bf16.mxu1 %v6404_v5 }
 0x8d2   :  { %5549 = vmatprep.mubr.msk.bf16.mxu0 %vm6405_vm5, %v6404_v5  ;;  %5569 = vmatprep.mubr.msk.bf16.mxu1 %vm6405_vm5, %v6404_v5 }
 0x8d4   :  { %5536 = vmatpush3.bf16.msra.mxu0 %v5984_v30  ;;  %5556 = vmatpush3.bf16.msra.mxu1 %v5985_v59  ;;  %v4858_v30 = vld [vmem:[%s7501_s16 + $0x1] ss:$0 sm:$0xff] }
 0x8d5   :  { %5537 = vmatprep.subr.bf16.mxu0 %v6404_v5  ;;  %5557 = vmatprep.subr.bf16.mxu1 %v6404_v5 }
 0x8d8   :  { %5538 = vmatpush3.bf16.msra.mxu0 %v5986_v43  ;;  %5558 = vmatpush3.bf16.msra.mxu1 %v5987_v61 }
 0x8d9   :  { %5539 = vmatprep.subr.bf16.mxu0 %v6404_v5  ;;  %5559 = vmatprep.subr.bf16.mxu1 %v6404_v5 }
 0x8dc   :  { %5540 = vmatpush3.bf16.msra.mxu0 %v5988_v15  ;;  %5560 = vmatpush3.bf16.msra.mxu1 %v5989_v3 }
 0x8dd   :  { %5541 = vmatprep.subr.bf16.mxu0 %v6404_v5  ;;  %5561 = vmatprep.subr.bf16.mxu1 %v6404_v5 }
 0x8e0   :  { %5542 = vmatpush3.bf16.msra.mxu0 %v5990_v2  ;;  %5562 = vmatpush3.bf16.msra.mxu1 %v5991_v23 }
 0x8e1   :  { %5543 = vmatprep.subr.bf16.mxu0 %v6404_v5  ;;  %5563 = vmatprep.subr.bf16.mxu1 %v6404_v5 }
 0x8e4   :  { %5544 = vmatpush3.bf16.msra.mxu0 %v5992_v17  ;;  %5564 = vmatpush3.bf16.msra.mxu1 %v5993_v41 }
 0x8e5   :  { %5545 = vmatprep.subr.bf16.mxu0 %v6404_v5  ;;  %5565 = vmatprep.subr.bf16.mxu1 %v6404_v5 }
 0x8e8   :  { %5546 = vmatpush3.bf16.msra.mxu0 %v5994_v46  ;;  %5566 = vmatpush3.bf16.msra.mxu1 %v5995_v21 }
 0x8e9   :  { %5547 = vmatprep.subr.bf16.mxu0 %v6404_v5  ;;  %5567 = vmatprep.subr.bf16.mxu1 %v6404_v5 }
 0x8ec   :  { %5548 = vmatpush3.bf16.msra.mxu0 %v5996_v42  ;;  %5568 = vmatpush3.bf16.msra.mxu1 %v5997_v39 }
 0x8ed   :  { %5593 = vmatprep.subr.bf16.mxu1 %v6404_v5  ;;  %5573 = vmatprep.subr.bf16.mxu0 %v6404_v5 }
 0x9a2   :  { %v5235_v11 = vpop.f32.mrb[52].mxu0  ;;  %v3680_v16 = vpop.f32.mrb[40].mxu1 }
 0x9a3   :  { %v5236_v48 = vpop.f32.mrb[53].mxu0  ;;  %v5531_v26 = vpop.f32.mrb[41].mxu1 }
 0x9a4   :  { %v5237_v40 = vadd.f32 %v5236_v48, %v5235_v11  ;;  %v5238_v51 = vpop.f32.mrb[54].mxu0  ;;  %v3683_v47 = vpop.f32.mrb[42].mxu1  ;;  %v6014_v48 = vld [vmem:[#allocation22 + $0x80] sm:$0xff]  }
 0x9a5   :  { %v5239_v37 = vpop.f32.mrb[55].mxu0  ;;  %v5532_v35 = vpop.f32.mrb[43].mxu1 }
 0x9a6   :  { %v3640_v54 = vadd.f32 %v5237_v40, %v4794_v52  ;;  %v5240_v57 = vadd.f32 %v5239_v37, %v5238_v51  ;;  %v6015_v37 = vld [vmem:[#allocation22 + $0x88] sm:$0xff]   ;;  %v6016_v35 = vld [vmem:[#allocation22 + $0x90] sm:$0xff]  }
 0x9a8   :  { %v3681_v24 = vadd.f32 %v3680_v16, %v3640_v54  ;;  %v3643_v1 = vadd.f32 %v5240_v57, %v4794_v52  ;;  %v6017_v54 = vld [vmem:[#allocation22 + $0x98] sm:$0xff]   ;;  %v6018_v57 = vld [vmem:[#allocation22 + $0xa0] sm:$0xff]  }
 0x9aa   :  { %v3687_v4 = vadd.f32 %v3681_v24, %v7284_v44  ;;  %v3684_v62 = vadd.f32 %v3683_v47, %v3643_v1  ;;  %v6000_v44 = vld [vmem:[#allocation22 + $0x8] sm:$0xff]   ;;  %v6020_v1 = vld [vmem:[#allocation22 + $0xb0] sm:$0xff]  }
 0x9ab   :  { %v6019_v24 = vld [vmem:[#allocation22 + $0xa8] sm:$0xff]  }
 0x9ac   :  { %v3689_v7 = vmax.f32 %v3687_v4, 0.0  ;;  %v3688_v9 = vadd.f32 %v3684_v62, %v7287_v56  ;;  %v6001_v56 = vld [vmem:[#allocation22 + $0x48] sm:$0xff]   ;;  %v6021_v4 = vld [vmem:[#allocation22 + $0xb8] sm:$0xff]   ;;  %v6022_v62 = vld [vmem:[#allocation24] sm:$0xff]  }
 0x9ae   :  { %v3690_v13 = vmax.f32 %v3688_v9, 0.0  ;;  %v3691_v14 = vrot.slane %v3689_v7, 1  ;;  %v6024_v9 = vld [vmem:[#allocation24 + $0x8] sm:$0xff]  }
 0x9b0   :  { %v3692_v20 = vrot.slane %v3690_v13, 1 }
 0x9b2   :  { %v3694_v12 = vsel %vm622_vm2, %v3692_v20, %v3691_v14  ;;  %v3693_v53 = vsel %vm622_vm2, %v3691_v14, %v3692_v20  ;;  %v6026_v14 = vld [vmem:[#allocation24 + $0x10] sm:$0xff]  }
 0x9b3   :  { %v3696_v29 = vmax.f32 %v3690_v13, %v3694_v12  ;;  %v3695_v32 = vmax.f32 %v3689_v7, %v3693_v53  ;;  %v6023_v7 = vld [vmem:[#allocation24 + $0x40] sm:$0xff]   ;;  %v6025_v13 = vld [vmem:[#allocation24 + $0x48] sm:$0xff]   ;;  %v6027_v20 = vld [vmem:[#allocation24 + $0x50] sm:$0xff]  }
 0x9b4   :  { %v6028_v12 = vld [vmem:[#allocation24 + $0x18] sm:$0xff]  }
 0x9b5   :  { %v3713_v60 = vpack.c.bf16 %v3696_v29, %v3695_v32  ;;  %v6029_v53 = vld [vmem:[#allocation24 + $0x58] sm:$0xff]   ;;  %v6030_v29 = vld [vmem:[#allocation24 + $0x20] sm:$0xff]  }
 0x9b6   :  { %v6031_v32 = vld [vmem:[#allocation24 + $0x60] sm:$0xff]  }
 0x9b7   :  { %5550 = vmatmul.mubr.bf16.vlgmr.msra.gmra.mrb[56].mxu0 %v3713_v60  ;;  %5570 = vmatmul.mubr.bf16.vlgmr.msra.gmra.mrb[44].mxu1 %v3713_v60  ;;  %v6034_v60 = vld [vmem:[#allocation24 + $0x30] sm:$0xff]  }
 0x9b8   :  { %5594 = vmatpush3.bf16.msra.mxu1 %v5998_v55  ;;  %5574 = vmatpush3.bf16.msra.mxu0 %v5999_v36  ;;  %v6032_v55 = vld [vmem:[#allocation24 + $0x28] sm:$0xff]  }
 0x9b9   :  { %5595 = vmatprep.subr.bf16.mxu1 %v6404_v5  ;;  %5575 = vmatprep.subr.bf16.mxu0 %v6404_v5  ;;  %v6033_v36 = vld [vmem:[#allocation24 + $0x68] sm:$0xff]  }
 0x9ba   :  { %5609 = vmatprep.mubr.msk.bf16.mxu1 %vm6405_vm5, %v6404_v5  ;;  %5589 = vmatprep.mubr.msk.bf16.mxu0 %vm6405_vm5, %v6404_v5 }
 0x9bc   :  { %5596 = vmatpush3.bf16.msra.mxu1 %v6000_v44  ;;  %5576 = vmatpush3.bf16.msra.mxu0 %v6001_v56  ;;  %v6035_v44 = vld [vmem:[#allocation24 + $0x70] sm:$0xff]   ;;  %v6036_v56 = vld [vmem:[#allocation24 + $0x38] sm:$0xff]  }
 0x9bd   :  { %5597 = vmatprep.subr.bf16.mxu1 %v6404_v5  ;;  %5577 = vmatprep.subr.bf16.mxu0 %v6404_v5 }
 0x9c0   :  { %5598 = vmatpush3.bf16.msra.mxu1 %v6002_v0  ;;  %5578 = vmatpush3.bf16.msra.mxu0 %v6003_v50  ;;  %v6037_v0 = vld [vmem:[#allocation24 + $0x78] sm:$0xff]  }
 0x9c1   :  { %5599 = vmatprep.subr.bf16.mxu1 %v6404_v5  ;;  %5579 = vmatprep.subr.bf16.mxu0 %v6404_v5 }
 0x9c4   :  { %5600 = vmatpush3.bf16.msra.mxu1 %v6004_v63  ;;  %5580 = vmatpush3.bf16.msra.mxu0 %v6005_v27 }
 0x9c5   :  { %5601 = vmatprep.subr.bf16.mxu1 %v6404_v5  ;;  %5581 = vmatprep.subr.bf16.mxu0 %v6404_v5 }
 0x9c8   :  { %5602 = vmatpush3.bf16.msra.mxu1 %v6006_v22  ;;  %5582 = vmatpush3.bf16.msra.mxu0 %v6007_v28 }
 0x9c9   :  { %5603 = vmatprep.subr.bf16.mxu1 %v6404_v5  ;;  %5583 = vmatprep.subr.bf16.mxu0 %v6404_v5 }
 0x9cc   :  { %5604 = vmatpush3.bf16.msra.mxu1 %v6008_v10  ;;  %5584 = vmatpush3.bf16.msra.mxu0 %v6009_v33 }
 0x9cd   :  { %5605 = vmatprep.subr.bf16.mxu1 %v6404_v5  ;;  %5585 = vmatprep.subr.bf16.mxu0 %v6404_v5 }
 0x9d0   :  { %5606 = vmatpush3.bf16.msra.mxu1 %v6010_v8  ;;  %5586 = vmatpush3.bf16.msra.mxu0 %v6011_v18 }
 0x9d1   :  { %5607 = vmatprep.subr.bf16.mxu1 %v6404_v5  ;;  %5587 = vmatprep.subr.bf16.mxu0 %v6404_v5 }
 0x9d4   :  { %5608 = vmatpush3.bf16.msra.mxu1 %v6012_v38  ;;  %5588 = vmatpush3.bf16.msra.mxu0 %v6013_v49 }
 0x9d5   :  { %5633 = vmatprep.subr.bf16.mxu1 %v6404_v5  ;;  %5613 = vmatprep.subr.bf16.mxu0 %v6404_v5 }
 0xa8a   :  { %v3796_v58 = vpop.f32.mrb[56].mxu0  ;;  %v3902_v6 = vpop.f32.mrb[44].mxu1 }
 0xa8b   :  { %v3909_v34 = vmax.f32 %v3796_v58, %v3902_v6  ;;  %v5551_v25 = vpop.f32.mrb[57].mxu0  ;;  %v5571_v19 = vpop.f32.mrb[45].mxu1  ;;  %v4883_v58 = vld [vmem:[%s7503_s18] ss:$0 sm:$0xff] }
 0xa8c   :  { %v3799_v59 = vpop.f32.mrb[58].mxu0  ;;  %v3905_v43 = vpop.f32.mrb[46].mxu1 }
 0xa8d   :  { %v3916_v61 = vmul.f32 %v4857_v31, %v3909_v34  ;;  %v3910_v15 = vmax.f32 %v3799_v59, %v3905_v43  ;;  %v5552_v3 = vpop.f32.mrb[59].mxu0  ;;  %v5572_v2 = vpop.f32.mrb[47].mxu1 }
 0xa8f   :  { %v3923_v23 = vadd.f32 %v4858_v30, %v3916_v61  ;;  %v3917_v17 = vmul.f32 %v4857_v31, %v3910_v15  ;;  %v4885_v61 = vld [vmem:[%s7503_s18 + $0x2] ss:$0 sm:$0xff] }
 0xa91   :  { %v3924_v41 = vadd.f32 %v4858_v30, %v3917_v17  ;;  %v3942_v46 = vrot.slane %v3923_v23, 2  ;;  %v4142_v21 = vrot.slane %v3923_v23, 4  ;;  %v4884_v30 = vld [vmem:[%s7503_s18 + $0x1] ss:$0 sm:$0xff] }
 0xa93   :  { %v3943_v42 = vrot.slane %v3924_v41, 2  ;;  %v4143_v39 = vrot.slane %v3924_v41, 4  ;;  %v3941_v11 = vpack.c.bf16 %v3924_v41, %v3923_v23 }
 0xa95   :  { %5610 = vmatmul.mubr.bf16.vlgmr.msra.gmra.mrb[48].mxu1 %v3941_v11  ;;  %v3944_v16 = vsel %vm1186_vm3, %v3942_v46, %v3943_v42  ;;  %v3945_v52 = vsel %vm1186_vm3, %v3943_v42, %v3942_v46  ;;  %v4145_v26 = vsel %vm4144_vm14, %v4142_v21, %v4143_v39  ;;  %v4146_v40 = vsel %vm4144_vm14, %v4143_v39, %v4142_v21 }
 0xa96   :  { %v3963_v51 = vpack.c.bf16 %v3945_v52, %v3944_v16  ;;  %v4164_v47 = vpack.c.bf16 %v4146_v40, %v4145_v26  ;;  %5649 = vmatprep.mubr.msk.bf16.mxu1 %vm6405_vm5, %v6404_v5  ;;  %5634 = vmatpush3.bf16.msra.mxu1 %v6023_v7  ;;  %v4902_v40 = vld [vmem:[%s7505_s20] ss:$0 sm:$0xff] }
 0xa97   :  { %5635 = vmatprep.subr.bf16.mxu1 %v6404_v5 }
 0xa98   :  { %5590 = vmatmul.mubr.bf16.vlgmr.msra.gmra.mrb[60].mxu0 %v3963_v51 }
 0xa99   :  { %5614 = vmatpush3.bf16.msra.mxu0 %v6014_v48  ;;  %5629 = vmatprep.mubr.msk.bf16.mxu0 %vm6405_vm5, %v6404_v5 }
 0xa9a   :  { %5615 = vmatprep.subr.bf16.mxu0 %v6404_v5  ;;  %5636 = vmatpush3.bf16.msra.mxu1 %v6025_v13 }
 0xa9b   :  { %5637 = vmatprep.subr.bf16.mxu1 %v6404_v5 }
 0xa9d   :  { %5616 = vmatpush3.bf16.msra.mxu0 %v6015_v37 }
 0xa9e   :  { %5617 = vmatprep.subr.bf16.mxu0 %v6404_v5  ;;  %5638 = vmatpush3.bf16.msra.mxu1 %v6027_v20 }
 0xa9f   :  { %5639 = vmatprep.subr.bf16.mxu1 %v6404_v5 }
 0xaa1   :  { %5618 = vmatpush3.bf16.msra.mxu0 %v6016_v35 }
 0xaa2   :  { %5619 = vmatprep.subr.bf16.mxu0 %v6404_v5  ;;  %5640 = vmatpush3.bf16.msra.mxu1 %v6029_v53 }
 0xaa3   :  { %5641 = vmatprep.subr.bf16.mxu1 %v6404_v5 }
 0xaa5   :  { %5620 = vmatpush3.bf16.msra.mxu0 %v6017_v54 }
 0xaa6   :  { %5621 = vmatprep.subr.bf16.mxu0 %v6404_v5  ;;  %5642 = vmatpush3.bf16.msra.mxu1 %v6031_v32 }
 0xaa7   :  { %5643 = vmatprep.subr.bf16.mxu1 %v6404_v5 }
 0xaa9   :  { %5622 = vmatpush3.bf16.msra.mxu0 %v6018_v57 }
 0xaaa   :  { %5623 = vmatprep.subr.bf16.mxu0 %v6404_v5  ;;  %5644 = vmatpush3.bf16.msra.mxu1 %v6033_v36 }
 0xaab   :  { %5645 = vmatprep.subr.bf16.mxu1 %v6404_v5 }
 0xaad   :  { %5624 = vmatpush3.bf16.msra.mxu0 %v6019_v24 }
 0xaae   :  { %5625 = vmatprep.subr.bf16.mxu0 %v6404_v5  ;;  %5646 = vmatpush3.bf16.msra.mxu1 %v6035_v44 }
 0xaaf   :  { %5647 = vmatprep.subr.bf16.mxu1 %v6404_v5 }
 0xab1   :  { %5626 = vmatpush3.bf16.msra.mxu0 %v6020_v1 }
 0xab2   :  { %5627 = vmatprep.subr.bf16.mxu0 %v6404_v5  ;;  %5648 = vmatpush3.bf16.msra.mxu1 %v6037_v0 }
 0xab5   :  { %5628 = vmatpush3.bf16.msra.mxu0 %v6021_v4 }
 0xab6   :  { %5653 = vmatprep.subr.bf16.mxu0 %v6404_v5 }
 0xab8   :  { %5630 = vmatmul.mubr.bf16.vlgmr.msra.gmra.mrb[64].mxu0 %v4164_v47 }
 0xab9   :  { %5669 = vmatprep.mubr.msk.bf16.mxu0 %vm6405_vm5, %v6404_v5  ;;  %5654 = vmatpush3.bf16.msra.mxu0 %v6022_v62 }
 0xaba   :  { %5655 = vmatprep.subr.bf16.mxu0 %v6404_v5 }
 0xabd   :  { %5656 = vmatpush3.bf16.msra.mxu0 %v6024_v9 }
 0xabe   :  { %5657 = vmatprep.subr.bf16.mxu0 %v6404_v5 }
 0xac1   :  { %5658 = vmatpush3.bf16.msra.mxu0 %v6026_v14 }
 0xac2   :  { %5659 = vmatprep.subr.bf16.mxu0 %v6404_v5 }
 0xac5   :  { %5660 = vmatpush3.bf16.msra.mxu0 %v6028_v12 }
 0xac6   :  { %5661 = vmatprep.subr.bf16.mxu0 %v6404_v5 }
 0xac9   :  { %5662 = vmatpush3.bf16.msra.mxu0 %v6030_v29 }
 0xaca   :  { %5663 = vmatprep.subr.bf16.mxu0 %v6404_v5 }
 0xacd   :  { %5664 = vmatpush3.bf16.msra.mxu0 %v6032_v55 }
 0xace   :  { %5665 = vmatprep.subr.bf16.mxu0 %v6404_v5 }
 0xad1   :  { %5666 = vmatpush3.bf16.msra.mxu0 %v6034_v60 }
 0xad2   :  { %5667 = vmatprep.subr.bf16.mxu0 %v6404_v5 }
 0xad5   :  { %5668 = vmatpush3.bf16.msra.mxu0 %v6036_v56 }
 0xb68   :  { %v4135_v50 = vpop.f32.mrb[48].mxu1 }
 0xb69   :  { %v5611_v63 = vpop.f32.mrb[49].mxu1 }
 0xb6a   :  { %v4138_v27 = vpop.f32.mrb[50].mxu1 }
 0xb6b   :  { %v4046_v22 = vpop.f32.mrb[60].mxu0  ;;  %v5612_v28 = vpop.f32.mrb[51].mxu1 }
 0xb6c   :  { %v4136_v10 = vadd.f32 %v4135_v50, %v4046_v22  ;;  %v5591_v33 = vpop.f32.mrb[61].mxu0 }
 0xb6d   :  { %v4049_v8 = vpop.f32.mrb[62].mxu0 }
 0xb6e   :  { %v4139_v18 = vadd.f32 %v4138_v27, %v4049_v8  ;;  %v5592_v38 = vpop.f32.mrb[63].mxu0 }
 0xb8b   :  { %v4247_v49 = vpop.f32.mrb[64].mxu0 }
 0xb8c   :  { %v4254_v6 = vadd.f32 %v4247_v49, %v4136_v10  ;;  %v5631_v31 = vpop.f32.mrb[65].mxu0 }
 0xb8d   :  { %v4250_v5 = vpop.f32.mrb[66].mxu0 }
 0xb8e   :  { %v4261_v34 = vadd.f32 %v4883_v58, %v4254_v6  ;;  %v4255_v25 = vadd.f32 %v4250_v5, %v4139_v18  ;;  %v5632_v19 = vpop.f32.mrb[67].mxu0 }
 0xb90   :  { %v4263_v59 = vmax.f32 %v4261_v34, 0.0  ;;  %v4262_v43 = vadd.f32 %v4883_v58, %v4255_v25 }
 0xb92   :  { %v4270_v15 = vmul.f32 %v4884_v30, %v4263_v59  ;;  %v4264_v3 = vmax.f32 %v4262_v43, 0.0 }
 0xb94   :  { %v4277_v2 = vadd.f32 %v4885_v61, %v4270_v15  ;;  %v4271_v23 = vmul.f32 %v4884_v30, %v4264_v3 }
 0xb96   :  { %v4278_v17 = vadd.f32 %v4885_v61, %v4271_v23  ;;  %v4296_v41 = vrot.slane %v4277_v2, 2 }
 0xb98   :  { %v4297_v46 = vrot.slane %v4278_v17, 2  ;;  %v4295_v21 = vpack.c.bf16 %v4278_v17, %v4277_v2 }
 0xb9a   :  { %5670 = vmatmul.mubr.bf16.vlgmr.msra.gmra.mrb[68].mxu0 %v4295_v21  ;;  %v4298_v42 = vsel %vm1186_vm3, %v4296_v41, %v4297_v46  ;;  %v4299_v39 = vsel %vm1186_vm3, %v4297_v46, %v4296_v41 }
 0xb9b   :  { %v4317_v11 = vpack.c.bf16 %v4299_v39, %v4298_v42 }
 0xb9d   :  { %5650 = vmatmul.mubr.bf16.vlgmr.msra.gmra.mrb[52].mxu1 %v4317_v11 }
 0xc6d   :  { %v4489_v16 = vpop.f32.mrb[68].mxu0 }
 0xc6e   :  { %v5671_v52 = vpop.f32.mrb[69].mxu0 }
 0xc6f   :  { %v4492_v48 = vpop.f32.mrb[70].mxu0 }
 0xc70   :  { %v4400_v26 = vpop.f32.mrb[52].mxu1  ;;  %v5672_v51 = vpop.f32.mrb[71].mxu0 }
 0xc71   :  { %v4490_v47 = vadd.f32 %v4489_v16, %v4400_v26  ;;  %v5651_v37 = vpop.f32.mrb[53].mxu1 }
 0xc72   :  { %v4403_v35 = vpop.f32.mrb[54].mxu1 }
 0xc73   :  { %v4503_v54 = vadd.f32 %v4902_v40, %v4490_v47  ;;  %v4493_v57 = vadd.f32 %v4492_v48, %v4403_v35  ;;  %v5652_v24 = vpop.f32.mrb[55].mxu1 }
 0xc75   :  { %4505 = vst [vmem:[%s7531_s29] sm:$0xff] %v4503_v54  ;;  %v4504_v45 = vadd.f32 %v4902_v40, %v4493_v57 }
 0xc77   :  { %4506 = vst [vmem:[%s7531_s29 + $0x8] sm:$0xff] %v4504_v45 }
 0xc78   :  { %4511 = vsyncpa [#allocation3], 1 }
 0xc79   :  { %4512 = vsyncpa [#allocation5], 1 }
 0xc7a   :  { %4513 = vsyncpa [#allocation8], 1 }
 0xc7b   :  { %4514 = vsyncpa [#allocation11], 1 }
 0xc7c   :  { %4515 = vsyncpa [#allocation14], 1 }
 0xc7d   :  { %4516 = vsyncpa [#allocation17], 1 }
 0xc7e   :  { %4517 = vsyncpa [#allocation20], 1 }
 0xc7f   :  { %4518 = vsyncpa [#allocation23], 1 }

</bundles_post_ra>
